<compile_context>
chip_gen: v5e
topology: v5e:2x2
jax: 0.10.0
libtpu: 0.0.40
codegen_flags: <defaults>
</compile_context>

<pallas_src>
import jax
import jax.numpy as jnp
from jax.experimental import pallas as pl
from jax.experimental.pallas import tpu as pltpu


def _round_up(x, m):
    return ((x + m - 1) // m) * m


# -----------------------------------------------------------------------------
# Kernel 1: pointwise  relu(x @ W' + b)     (1x1 Conv + folded BN + ReLU)
# -----------------------------------------------------------------------------
def _point_kernel(x_ref, w_ref, b_ref, o_ref):
    tm = x_ref.shape[0]
    rs = 256 if tm % 256 == 0 else tm          # bound the f32 epilogue chunk
    w = w_ref[...]
    b = b_ref[...]
    for r in range(0, tm, rs):
        y = jnp.dot(x_ref[r:r + rs, :], w, preferred_element_type=jnp.float32)
        o_ref[r:r + rs, :] = jnp.maximum(y + b, 0.0).astype(o_ref.dtype)


def fused_conv_bn_relu(x, w, bias):
    """x: (R, Cin) -> (R, Cout) bf16 = relu(x @ w + bias); BN scale pre-folded."""
    R, Cin = x.shape
    Cout = w.shape[1]
    tn = 256 if Cout % 256 == 0 else (128 if Cout % 128 == 0 else Cout)
    tm = 1024 if R >= 1024 else _round_up(R, 8)
    grid = (pl.cdiv(R, tm), pl.cdiv(Cout, tn))
    return pl.pallas_call(
        _point_kernel,
        out_shape=jax.ShapeDtypeStruct((R, Cout), jnp.bfloat16),
        grid_spec=pltpu.PrefetchScalarGridSpec(
            num_scalar_prefetch=0,
            grid=grid,
            in_specs=[
                pl.BlockSpec((tm, Cin), lambda i, j: (i, 0)),
                pl.BlockSpec((Cin, tn), lambda i, j: (0, j)),
                pl.BlockSpec((1, tn), lambda i, j: (0, j)),
            ],
            out_specs=pl.BlockSpec((tm, tn), lambda i, j: (i, j)),
        ),
        compiler_params=pltpu.CompilerParams(
            dimension_semantics=("parallel", "parallel")),
    )(x.astype(jnp.bfloat16), w.astype(jnp.bfloat16),
      bias.reshape(1, Cout).astype(jnp.float32))


# -----------------------------------------------------------------------------
# Kernel 2: fused GeometricExtractor MLPs
#   relu( max_k( relu(x_k @ W1 + b1) @ W2 ) + b2 )   -- max kept in vregs
# -----------------------------------------------------------------------------
def _ge_kernel(x_ref, w1_ref, b1_ref, w2_ref, b2_ref, o_ref):
    K = x_ref.shape[1]
    w1 = w1_ref[...]
    b1 = b1_ref[...]
    w2 = w2_ref[...]
    acc = None
    for g in range(K):                         # static K=9; functional vreg max
        h = jnp.maximum(
            jnp.dot(x_ref[:, g, :], w1, preferred_element_type=jnp.float32) + b1,
            0.0)
        z = jnp.dot(h, w2, preferred_element_type=jnp.float32)
        acc = z if acc is None else jnp.maximum(acc, z)
    # bias2 + ReLU hoisted out of the k-max (monotone => exact)
    o_ref[...] = jnp.maximum(acc + b2_ref[...], 0.0).astype(o_ref.dtype)


def fused_ge_mlp(feature, p1, p2):
    """feature: (R, K, 7) f32 -> (R, 10) bf16 (mlp1 -> mlp2 -> max over K)."""
    R, K, Cin = feature.shape
    C1, C2 = p1["w"].shape[1], p2["w"].shape[1]
    tm = 256 if R >= 256 else _round_up(R, 8)
    return pl.pallas_call(
        _ge_kernel,
        out_shape=jax.ShapeDtypeStruct((R, C2), jnp.bfloat16),
        grid_spec=pltpu.PrefetchScalarGridSpec(
            num_scalar_prefetch=0,
            grid=(pl.cdiv(R, tm),),
            in_specs=[
                pl.BlockSpec((tm, K, Cin), lambda i: (i, 0, 0)),
                pl.BlockSpec((Cin, C1), lambda i: (0, 0)),
                pl.BlockSpec((1, C1), lambda i: (0, 0)),
                pl.BlockSpec((C1, C2), lambda i: (0, 0)),
                pl.BlockSpec((1, C2), lambda i: (0, 0)),
            ],
            out_specs=pl.BlockSpec((tm, C2), lambda i: (i, 0)),
        ),
        compiler_params=pltpu.CompilerParams(
            dimension_semantics=("parallel",)),
    )(feature.astype(jnp.float32),
      p1["w"].astype(jnp.float32), p1["b"].reshape(1, C1).astype(jnp.float32),
      p2["w"].astype(jnp.float32), p2["b"].reshape(1, C2).astype(jnp.float32))


# -----------------------------------------------------------------------------
# Kernel 3: ec5 with fused max over N
#   out[b] = relu( max_n( f[b, n, :] @ W ) + b )  -- accumulator in VMEM scratch
# -----------------------------------------------------------------------------
def _ec5_kernel(x_ref, w_ref, b_ref, o_ref, acc_ref):
    i = pl.program_id(2)                       # reduction axis over N (last)

    @pl.when(i == 0)
    def _init():
        acc_ref[...] = jnp.full(acc_ref.shape, -jnp.inf, acc_ref.dtype)

    y = jnp.dot(x_ref[0], w_ref[...], preferred_element_type=jnp.float32)
    acc_ref[...] = jnp.maximum(acc_ref[...], jnp.max(y, axis=0, keepdims=True))

    @pl.when(i == pl.num_programs(2) - 1)
    def _fin():
        # bias + ReLU hoisted out of the N-max (monotone => exact)
        o_ref[0] = jnp.maximum(acc_ref[...] + b_ref[...], 0.0).astype(o_ref.dtype)


def fused_ec5_max_over_n(f, w, bias):
    """f: (B, N, Cin) -> (B, Cout) bf16 = relu(max_N(f @ w) + bias)."""
    B, N, Cin = f.shape
    Cout = w.shape[1]
    tn = 256 if Cout % 256 == 0 else (128 if Cout % 128 == 0 else Cout)
    # TODO(synk): on v5e tn=128 would avoid the 256-wide tile (4x128 MXU).
    tmn = N                                    # N-tile must divide N exactly
    for cand in (128, 64, 32, 16, 8):
        if N % cand == 0:
            tmn = cand
            break
    grid = (B, pl.cdiv(Cout, tn), N // tmn)
    out = pl.pallas_call(
        _ec5_kernel,
        out_shape=jax.ShapeDtypeStruct((B, 1, Cout), jnp.bfloat16),
        grid_spec=pltpu.PrefetchScalarGridSpec(
            num_scalar_prefetch=0,
            grid=grid,
            in_specs=[
                pl.BlockSpec((1, tmn, Cin), lambda b, j, i: (b, i, 0)),
                pl.BlockSpec((Cin, tn), lambda b, j, i: (0, j)),
                pl.BlockSpec((1, tn), lambda b, j, i: (0, j)),
            ],
            out_specs=pl.BlockSpec((1, 1, tn), lambda b, j, i: (b, 0, j)),
            scratch_shapes=[pltpu.VMEM((1, tn), jnp.float32)],
        ),
        compiler_params=pltpu.CompilerParams(
            dimension_semantics=("parallel", "parallel", "arbitrary")),
    )(f.astype(jnp.bfloat16), w.astype(jnp.bfloat16),
      bias.reshape(1, Cout).astype(jnp.float32))
    return out.reshape(B, Cout)


# -----------------------------------------------------------------------------
# Kernel 4: fused ec6 -> ec7 -> ec8 tail (intermediates never leave VMEM)
# -----------------------------------------------------------------------------
def _tail_kernel(x_ref, w6_ref, b6_ref, w7_ref, b7_ref, w8_ref, o_ref, h6_ref):
    tm = x_ref.shape[0]
    C6 = w6_ref.shape[1]
    RS = h6_ref.shape[0]                       # row sub-chunk (<= tm, divides tm)
    CS = 256 if C6 % 256 == 0 else (128 if C6 % 128 == 0 else C6)
    for r in range(0, tm, RS):
        xr = x_ref[r:r + RS, :]
        for j in range(0, C6, CS):             # ec6, chunked to bound vregs
            y = jnp.dot(xr, w6_ref[:, j:j + CS],
                        preferred_element_type=jnp.float32)
            h6_ref[:, j:j + CS] = jnp.maximum(
                y + b6_ref[:, j:j + CS], 0.0).astype(h6_ref.dtype)
        h7 = jnp.maximum(                       # ec7
            jnp.dot(h6_ref[...], w7_ref[...], preferred_element_type=jnp.float32)
            + b7_ref[...], 0.0).astype(jnp.bfloat16)
        o_ref[r:r + RS, :] = jnp.maximum(       # ec8 (+ ReLU per reference)
            jnp.dot(h7, w8_ref[...], preferred_element_type=jnp.float32),
            0.0).astype(o_ref.dtype)


def fused_point_tail(x, w6, b6, w7, b7, w8):
    """relu(relu(relu(x@w6+b6)@w7+b7)@w8) -- ec6/ec7/ec8 in one pallas_call."""
    R, C = x.shape
    C6, C7, C8 = w6.shape[1], w7.shape[1], w8.shape[1]
    tm = 512 if R >= 512 else _round_up(R, 8)
    rs = 128 if tm % 128 == 0 else tm
    return pl.pallas_call(
        _tail_kernel,
        out_shape=jax.ShapeDtypeStruct((R, C8), jnp.bfloat16),
        grid_spec=pltpu.PrefetchScalarGridSpec(
            num_scalar_prefetch=0,
            grid=(pl.cdiv(R, tm),),
            in_specs=[
                pl.BlockSpec((tm, C), lambda i: (i, 0)),
                pl.BlockSpec((C, C6), lambda i: (0, 0)),
                pl.BlockSpec((1, C6), lambda i: (0, 0)),
                pl.BlockSpec((C6, C7), lambda i: (0, 0)),
                pl.BlockSpec((1, C7), lambda i: (0, 0)),
                pl.BlockSpec((C7, C8), lambda i: (0, 0)),
            ],
            out_specs=pl.BlockSpec((tm, C8), lambda i: (i, 0)),
            scratch_shapes=[pltpu.VMEM((rs, C6), jnp.bfloat16)],
        ),
        compiler_params=pltpu.CompilerParams(
            dimension_semantics=("parallel",)),
    )(x.astype(jnp.bfloat16), w6.astype(jnp.bfloat16),
      b6.reshape(1, C6).astype(jnp.float32), w7.astype(jnp.bfloat16),
      b7.reshape(1, C7).astype(jnp.float32), w8.astype(jnp.bfloat16))


# -----------------------------------------------------------------------------
# Plain-JAX glue: kNN graph, gathers, geometric preprocessing
# -----------------------------------------------------------------------------
def knn_indices(feat, k):
    """feat: (B, N, C) -> (B, N, k) nearest-neighbour indices (incl. self)."""
    f = feat.astype(jnp.float32)
    d2 = jnp.sum((f[:, :, None, :] - f[:, None, :, :]) ** 2, axis=-1)
    return jnp.argsort(d2, axis=-1)[..., :k]


def gather_rows(feat, idx):
    """feat: (B, N, C), idx: (B, N, k) -> (B, N, k, C)."""
    return jax.vmap(lambda a, i: a[i])(feat, idx)


def geometric_extractor(pts, p, k=9):
    """pts: (B, N, 3) f32 -> (B, N, 10) bf16. Mirrors GeometricExtractor.forward."""
    B, N, _ = pts.shape
    nb = gather_rows(pts, knn_indices(pts, k + 1))            # (B, N, k+1, 3)
    x_nb = nb - pts[:, :, None, :]
    x_nb = x_nb[:, :, 1:, :]                                  # drop self -> (B,N,k,3)

    # xyz2sphere(...)[..., 2] == phi = atan2(y, x); argsort is normalise-invariant.
    phi = jnp.arctan2(x_nb[..., 1], x_nb[..., 0])
    idx = jnp.argsort(phi, axis=-1)
    sorted_nb = jnp.take_along_axis(x_nb, idx[..., None], axis=2)      # resort_points
    pairs = jnp.stack([sorted_nb, jnp.roll(sorted_nb, -1, axis=2)], axis=-2)

    centroids = jnp.mean(pairs, axis=-2)                      # (B, N, k, 3)
    v1 = pairs[..., 0, :]
    v2 = pairs[..., 1, :]
    normals = jnp.cross(v1, v2)
    normals = normals / (jnp.linalg.norm(normals, axis=-1, keepdims=True) + 1e-6)
    pos_mask = (normals[..., 0:1, 0] > 0).astype(jnp.float32) * 2.0 - 1.0
    normals = normals * pos_mask[..., None]
    position = jnp.sum(normals * centroids, axis=-1) / jnp.sqrt(3.0)
    feature = jnp.concatenate([centroids, normals, position[..., None]], axis=-1)

    f = fused_ge_mlp(feature.reshape(B * N, k, 7), p["ge1"], p["ge2"])  # (B*N, 10)
    return f.reshape(B, N, 10)


# -----------------------------------------------------------------------------
# RepSurf forward
# -----------------------------------------------------------------------------
def repsurf_forward(x, params, k=5):
    """x: (B, C=3, N) -> (B, output_channel, N)  (same convention as PyTorch)."""
    B, _, N = x.shape
    pts = jnp.transpose(x, (0, 2, 1))                         # (B, N, 3)
    feat = geometric_extractor(pts, params, k=9)              # (B, N, 10) bf16

    def edge_block(f, prm):
        # 1x1 conv commutes with the kNN gather: transform every point once,
        # then gather the k neighbours of the TRANSFORMED features and max.
        Bc, Nc, C = f.shape
        idx = knn_indices(f, k)                               # graph from layer input
        z = fused_conv_bn_relu(f.reshape(Bc * Nc, C), prm["w"], prm["b"])
        z = z.reshape(Bc, Nc, -1)
        return jnp.max(gather_rows(z, idx), axis=2)           # (B, N, Cout)

    f = edge_block(feat, params["ec1"])                       # (B, N, 64)
    x1 = edge_block(f, params["ec2"])                         # (B, N, 64)
    f = edge_block(x1, params["ec3"])                         # (B, N, 64)
    f = edge_block(f, params["ec4"])                          # (B, N, 64)

    # edge_cov5 with the max over N fused inside the kernel.
    g = fused_ec5_max_over_n(f, params["ec5"]["w"], params["ec5"]["b"])  # (B, 1024)

    # cat[x1, repeat(g)] -> (B, N, 1088), then fused ec6 -> ec7 -> ec8.
    cat = jnp.concatenate(
        [x1, jnp.broadcast_to(g[:, None, :].astype(x1.dtype),
                              (B, N, g.shape[-1]))], axis=-1)
    out = fused_point_tail(cat.reshape(B * N, -1),
                           params["ec6"]["w"], params["ec6"]["b"],
                           params["ec7"]["w"], params["ec7"]["b"],
                           params["ec8"]["w"])                # (B*N, out_ch)
    out = out.reshape(B, N, -1).astype(jnp.float32)
    return jnp.transpose(out, (0, 2, 1))                      # (B, out_ch, N)


# -----------------------------------------------------------------------------
# Deterministic parameter construction (synthetic; BN folded into W / bias)
# -----------------------------------------------------------------------------
def _layer(key, cin, cout, lin_bias=False, bn=True, eps=1e-5):
    k1, k2, k3, k4 = jax.random.split(key, 4)
    w = jax.random.normal(k1, (cin, cout), jnp.float32) / jnp.sqrt(float(cin))
    lb = (0.1 * jax.random.normal(k2, (cout,), jnp.float32)
          if lin_bias else jnp.zeros((cout,), jnp.float32))
    if bn:
        gamma = 1.0 + 0.1 * jax.random.normal(k3, (cout,), jnp.float32)
        beta = 0.1 * jax.random.normal(k4, (cout,), jnp.float32)
        rm = jnp.zeros((cout,), jnp.float32)
        rv = jnp.ones((cout,), jnp.float32)
        s = gamma / jnp.sqrt(rv + eps)
        b = s * (lb - rm) + beta
    else:
        s = jnp.ones((cout,), jnp.float32)
        b = lb
    # BN scale folded into the weight; kernels cast to bf16 / keep f32 as needed.
    return {"w": w * s[None, :], "b": b}


def init_params(key, output_channel):
    ks = jax.random.split(key, 10)
    return {
        "ge1": _layer(ks[0], 7, 10, lin_bias=True),
        "ge2": _layer(ks[1], 10, 10, lin_bias=True),
        "ec1": _layer(ks[2], 10, 64),
        "ec2": _layer(ks[3], 64, 64),
        "ec3": _layer(ks[4], 64, 64),
        "ec4": _layer(ks[5], 64, 64),
        "ec5": _layer(ks[6], 64, 1024),
        "ec6": _layer(ks[7], 1088, 512),
        "ec7": _layer(ks[8], 512, 128),
        "ec8": _layer(ks[9], 128, output_channel, bn=False),
    }


# -----------------------------------------------------------------------------
if __name__ == "__main__":
    B, C, N = 2, 3, 16
    output_channel = 32

    key = jax.random.PRNGKey(0)
    kx, kp = jax.random.split(key)
    x = jax.random.normal(kx, (B, C, N), jnp.float32)
    params = init_params(kp, output_channel)

    fwd = jax.jit(repsurf_forward, static_argnames=("k",))
    y = jax.block_until_ready(fwd(x, params, k=5))
    assert y.shape == (B, output_channel, N), y.shape
    assert bool(jnp.all(jnp.isfinite(y)))
    print("KERNEL_OK")
</pallas_src>

<mosaic_0001>
module attributes {stable_mosaic.version = 11 : i64} {
  func.func @_ge_kernel(%arg0: i32, %arg1: memref<32x9x7xf32, #tpu.memory_space<vmem>>, %arg2: memref<7x10xf32, #tpu.memory_space<vmem>>, %arg3: memref<1x10xf32, #tpu.memory_space<vmem>>, %arg4: memref<10x10xf32, #tpu.memory_space<vmem>>, %arg5: memref<1x10xf32, #tpu.memory_space<vmem>>, %arg6: memref<32x10xbf16, #tpu.memory_space<vmem>>) attributes {dimension_semantics = [#tpu.dimension_semantics<parallel>], iteration_bounds = array<i64: 1>, scalar_prefetch = 0 : i64, scratch_operands = 0 : i64, tpu.core_type = #tpu.core_type<tc>, window_params = [{transform_indices = @transform_0, window_bounds = array<i64: 32, 9, 7>}, {pipeline_mode = #tpu.pipeline_mode<synchronous>, transform_indices = @transform_1, window_bounds = array<i64: 7, 10>}, {pipeline_mode = #tpu.pipeline_mode<synchronous>, transform_indices = @transform_2, window_bounds = array<i64: 1, 10>}, {pipeline_mode = #tpu.pipeline_mode<synchronous>, transform_indices = @transform_3, window_bounds = array<i64: 10, 10>}, {pipeline_mode = #tpu.pipeline_mode<synchronous>, transform_indices = @transform_4, window_bounds = array<i64: 1, 10>}, {transform_indices = @transform_5, window_bounds = array<i64: 32, 10>}]} {
    %c0 = arith.constant 0 : index
    %c0_0 = arith.constant 0 : index
    %0 = vector.load %arg2[%c0, %c0_0] : memref<7x10xf32, #tpu.memory_space<vmem>>, vector<7x10xf32>
    %c0_1 = arith.constant 0 : index
    %c0_2 = arith.constant 0 : index
    %1 = vector.load %arg3[%c0_1, %c0_2] : memref<1x10xf32, #tpu.memory_space<vmem>>, vector<1x10xf32>
    %c0_3 = arith.constant 0 : index
    %c0_4 = arith.constant 0 : index
    %2 = vector.load %arg4[%c0_3, %c0_4] : memref<10x10xf32, #tpu.memory_space<vmem>>, vector<10x10xf32>
    %c0_5 = arith.constant 0 : index
    %c0_6 = arith.constant 0 : index
    %c0_7 = arith.constant 0 : index
    %3 = vector.load %arg1[%c0_5, %c0_6, %c0_7] : memref<32x9x7xf32, #tpu.memory_space<vmem>>, vector<32x1x7xf32>
    %4 = vector.shape_cast %3 : vector<32x1x7xf32> to vector<32x7xf32>
    %cst = arith.constant dense<0.000000e+00> : vector<32x10xf32>
    %5 = tpu.matmul %4, %0, %cst {dimension_numbers = #tpu.dot_dimension_numbers<[1], [0], [0], [1], [0, 0, 1, 1], [], []>} : vector<32x7xf32>, vector<7x10xf32>, vector<32x10xf32> -> vector<32x10xf32>
    %6 = vector.broadcast %1 : vector<1x10xf32> to vector<32x10xf32>
    %7 = arith.addf %5, %6 : vector<32x10xf32>
    %cst_8 = arith.constant 0.000000e+00 : f32
    %8 = vector.broadcast %cst_8 : f32 to vector<32x10xf32>
    %9 = arith.maximumf %7, %8 : vector<32x10xf32>
    %cst_9 = arith.constant dense<0.000000e+00> : vector<32x10xf32>
    %10 = tpu.matmul %9, %2, %cst_9 {dimension_numbers = #tpu.dot_dimension_numbers<[1], [0], [0], [1], [0, 0, 1, 1], [], []>} : vector<32x10xf32>, vector<10x10xf32>, vector<32x10xf32> -> vector<32x10xf32>
    %c0_10 = arith.constant 0 : index
    %c1 = arith.constant 1 : index
    %c0_11 = arith.constant 0 : index
    %11 = vector.load %arg1[%c0_10, %c1, %c0_11] : memref<32x9x7xf32, #tpu.memory_space<vmem>>, vector<32x1x7xf32>
    %12 = vector.shape_cast %11 : vector<32x1x7xf32> to vector<32x7xf32>
    %cst_12 = arith.constant dense<0.000000e+00> : vector<32x10xf32>
    %13 = tpu.matmul %12, %0, %cst_12 {dimension_numbers = #tpu.dot_dimension_numbers<[1], [0], [0], [1], [0, 0, 1, 1], [], []>} : vector<32x7xf32>, vector<7x10xf32>, vector<32x10xf32> -> vector<32x10xf32>
    %14 = vector.broadcast %1 : vector<1x10xf32> to vector<32x10xf32>
    %15 = arith.addf %13, %14 : vector<32x10xf32>
    %cst_13 = arith.constant 0.000000e+00 : f32
    %16 = vector.broadcast %cst_13 : f32 to vector<32x10xf32>
    %17 = arith.maximumf %15, %16 : vector<32x10xf32>
    %cst_14 = arith.constant dense<0.000000e+00> : vector<32x10xf32>
    %18 = tpu.matmul %17, %2, %cst_14 {dimension_numbers = #tpu.dot_dimension_numbers<[1], [0], [0], [1], [0, 0, 1, 1], [], []>} : vector<32x10xf32>, vector<10x10xf32>, vector<32x10xf32> -> vector<32x10xf32>
    %19 = arith.maximumf %10, %18 : vector<32x10xf32>
    %c0_15 = arith.constant 0 : index
    %c2 = arith.constant 2 : index
    %c0_16 = arith.constant 0 : index
    %20 = vector.load %arg1[%c0_15, %c2, %c0_16] : memref<32x9x7xf32, #tpu.memory_space<vmem>>, vector<32x1x7xf32>
    %21 = vector.shape_cast %20 : vector<32x1x7xf32> to vector<32x7xf32>
    %cst_17 = arith.constant dense<0.000000e+00> : vector<32x10xf32>
    %22 = tpu.matmul %21, %0, %cst_17 {dimension_numbers = #tpu.dot_dimension_numbers<[1], [0], [0], [1], [0, 0, 1, 1], [], []>} : vector<32x7xf32>, vector<7x10xf32>, vector<32x10xf32> -> vector<32x10xf32>
    %23 = vector.broadcast %1 : vector<1x10xf32> to vector<32x10xf32>
    %24 = arith.addf %22, %23 : vector<32x10xf32>
    %cst_18 = arith.constant 0.000000e+00 : f32
    %25 = vector.broadcast %cst_18 : f32 to vector<32x10xf32>
    %26 = arith.maximumf %24, %25 : vector<32x10xf32>
    %cst_19 = arith.constant dense<0.000000e+00> : vector<32x10xf32>
    %27 = tpu.matmul %26, %2, %cst_19 {dimension_numbers = #tpu.dot_dimension_numbers<[1], [0], [0], [1], [0, 0, 1, 1], [], []>} : vector<32x10xf32>, vector<10x10xf32>, vector<32x10xf32> -> vector<32x10xf32>
    %28 = arith.maximumf %19, %27 : vector<32x10xf32>
    %c0_20 = arith.constant 0 : index
    %c3 = arith.constant 3 : index
    %c0_21 = arith.constant 0 : index
    %29 = vector.load %arg1[%c0_20, %c3, %c0_21] : memref<32x9x7xf32, #tpu.memory_space<vmem>>, vector<32x1x7xf32>
    %30 = vector.shape_cast %29 : vector<32x1x7xf32> to vector<32x7xf32>
    %cst_22 = arith.constant dense<0.000000e+00> : vector<32x10xf32>
    %31 = tpu.matmul %30, %0, %cst_22 {dimension_numbers = #tpu.dot_dimension_numbers<[1], [0], [0], [1], [0, 0, 1, 1], [], []>} : vector<32x7xf32>, vector<7x10xf32>, vector<32x10xf32> -> vector<32x10xf32>
    %32 = vector.broadcast %1 : vector<1x10xf32> to vector<32x10xf32>
    %33 = arith.addf %31, %32 : vector<32x10xf32>
    %cst_23 = arith.constant 0.000000e+00 : f32
    %34 = vector.broadcast %cst_23 : f32 to vector<32x10xf32>
    %35 = arith.maximumf %33, %34 : vector<32x10xf32>
    %cst_24 = arith.constant dense<0.000000e+00> : vector<32x10xf32>
    %36 = tpu.matmul %35, %2, %cst_24 {dimension_numbers = #tpu.dot_dimension_numbers<[1], [0], [0], [1], [0, 0, 1, 1], [], []>} : vector<32x10xf32>, vector<10x10xf32>, vector<32x10xf32> -> vector<32x10xf32>
    %37 = arith.maximumf %28, %36 : vector<32x10xf32>
    %c0_25 = arith.constant 0 : index
    %c4 = arith.constant 4 : index
    %c0_26 = arith.constant 0 : index
    %38 = vector.load %arg1[%c0_25, %c4, %c0_26] : memref<32x9x7xf32, #tpu.memory_space<vmem>>, vector<32x1x7xf32>
    %39 = vector.shape_cast %38 : vector<32x1x7xf32> to vector<32x7xf32>
    %cst_27 = arith.constant dense<0.000000e+00> : vector<32x10xf32>
    %40 = tpu.matmul %39, %0, %cst_27 {dimension_numbers = #tpu.dot_dimension_numbers<[1], [0], [0], [1], [0, 0, 1, 1], [], []>} : vector<32x7xf32>, vector<7x10xf32>, vector<32x10xf32> -> vector<32x10xf32>
    %41 = vector.broadcast %1 : vector<1x10xf32> to vector<32x10xf32>
    %42 = arith.addf %40, %41 : vector<32x10xf32>
    %cst_28 = arith.constant 0.000000e+00 : f32
    %43 = vector.broadcast %cst_28 : f32 to vector<32x10xf32>
    %44 = arith.maximumf %42, %43 : vector<32x10xf32>
    %cst_29 = arith.constant dense<0.000000e+00> : vector<32x10xf32>
    %45 = tpu.matmul %44, %2, %cst_29 {dimension_numbers = #tpu.dot_dimension_numbers<[1], [0], [0], [1], [0, 0, 1, 1], [], []>} : vector<32x10xf32>, vector<10x10xf32>, vector<32x10xf32> -> vector<32x10xf32>
    %46 = arith.maximumf %37, %45 : vector<32x10xf32>
    %c0_30 = arith.constant 0 : index
    %c5 = arith.constant 5 : index
    %c0_31 = arith.constant 0 : index
    %47 = vector.load %arg1[%c0_30, %c5, %c0_31] : memref<32x9x7xf32, #tpu.memory_space<vmem>>, vector<32x1x7xf32>
    %48 = vector.shape_cast %47 : vector<32x1x7xf32> to vector<32x7xf32>
    %cst_32 = arith.constant dense<0.000000e+00> : vector<32x10xf32>
    %49 = tpu.matmul %48, %0, %cst_32 {dimension_numbers = #tpu.dot_dimension_numbers<[1], [0], [0], [1], [0, 0, 1, 1], [], []>} : vector<32x7xf32>, vector<7x10xf32>, vector<32x10xf32> -> vector<32x10xf32>
    %50 = vector.broadcast %1 : vector<1x10xf32> to vector<32x10xf32>
    %51 = arith.addf %49, %50 : vector<32x10xf32>
    %cst_33 = arith.constant 0.000000e+00 : f32
    %52 = vector.broadcast %cst_33 : f32 to vector<32x10xf32>
    %53 = arith.maximumf %51, %52 : vector<32x10xf32>
    %cst_34 = arith.constant dense<0.000000e+00> : vector<32x10xf32>
    %54 = tpu.matmul %53, %2, %cst_34 {dimension_numbers = #tpu.dot_dimension_numbers<[1], [0], [0], [1], [0, 0, 1, 1], [], []>} : vector<32x10xf32>, vector<10x10xf32>, vector<32x10xf32> -> vector<32x10xf32>
    %55 = arith.maximumf %46, %54 : vector<32x10xf32>
    %c0_35 = arith.constant 0 : index
    %c6 = arith.constant 6 : index
    %c0_36 = arith.constant 0 : index
    %56 = vector.load %arg1[%c0_35, %c6, %c0_36] : memref<32x9x7xf32, #tpu.memory_space<vmem>>, vector<32x1x7xf32>
    %57 = vector.shape_cast %56 : vector<32x1x7xf32> to vector<32x7xf32>
    %cst_37 = arith.constant dense<0.000000e+00> : vector<32x10xf32>
    %58 = tpu.matmul %57, %0, %cst_37 {dimension_numbers = #tpu.dot_dimension_numbers<[1], [0], [0], [1], [0, 0, 1, 1], [], []>} : vector<32x7xf32>, vector<7x10xf32>, vector<32x10xf32> -> vector<32x10xf32>
    %59 = vector.broadcast %1 : vector<1x10xf32> to vector<32x10xf32>
    %60 = arith.addf %58, %59 : vector<32x10xf32>
    %cst_38 = arith.constant 0.000000e+00 : f32
    %61 = vector.broadcast %cst_38 : f32 to vector<32x10xf32>
    %62 = arith.maximumf %60, %61 : vector<32x10xf32>
    %cst_39 = arith.constant dense<0.000000e+00> : vector<32x10xf32>
    %63 = tpu.matmul %62, %2, %cst_39 {dimension_numbers = #tpu.dot_dimension_numbers<[1], [0], [0], [1], [0, 0, 1, 1], [], []>} : vector<32x10xf32>, vector<10x10xf32>, vector<32x10xf32> -> vector<32x10xf32>
    %64 = arith.maximumf %55, %63 : vector<32x10xf32>
    %c0_40 = arith.constant 0 : index
    %c7 = arith.constant 7 : index
    %c0_41 = arith.constant 0 : index
    %65 = vector.load %arg1[%c0_40, %c7, %c0_41] : memref<32x9x7xf32, #tpu.memory_space<vmem>>, vector<32x1x7xf32>
    %66 = vector.shape_cast %65 : vector<32x1x7xf32> to vector<32x7xf32>
    %cst_42 = arith.constant dense<0.000000e+00> : vector<32x10xf32>
    %67 = tpu.matmul %66, %0, %cst_42 {dimension_numbers = #tpu.dot_dimension_numbers<[1], [0], [0], [1], [0, 0, 1, 1], [], []>} : vector<32x7xf32>, vector<7x10xf32>, vector<32x10xf32> -> vector<32x10xf32>
    %68 = vector.broadcast %1 : vector<1x10xf32> to vector<32x10xf32>
    %69 = arith.addf %67, %68 : vector<32x10xf32>
    %cst_43 = arith.constant 0.000000e+00 : f32
    %70 = vector.broadcast %cst_43 : f32 to vector<32x10xf32>
    %71 = arith.maximumf %69, %70 : vector<32x10xf32>
    %cst_44 = arith.constant dense<0.000000e+00> : vector<32x10xf32>
    %72 = tpu.matmul %71, %2, %cst_44 {dimension_numbers = #tpu.dot_dimension_numbers<[1], [0], [0], [1], [0, 0, 1, 1], [], []>} : vector<32x10xf32>, vector<10x10xf32>, vector<32x10xf32> -> vector<32x10xf32>
    %73 = arith.maximumf %64, %72 : vector<32x10xf32>
    %c0_45 = arith.constant 0 : index
    %c8 = arith.constant 8 : index
    %c0_46 = arith.constant 0 : index
    %74 = vector.load %arg1[%c0_45, %c8, %c0_46] : memref<32x9x7xf32, #tpu.memory_space<vmem>>, vector<32x1x7xf32>
    %75 = vector.shape_cast %74 : vector<32x1x7xf32> to vector<32x7xf32>
    %cst_47 = arith.constant dense<0.000000e+00> : vector<32x10xf32>
    %76 = tpu.matmul %75, %0, %cst_47 {dimension_numbers = #tpu.dot_dimension_numbers<[1], [0], [0], [1], [0, 0, 1, 1], [], []>} : vector<32x7xf32>, vector<7x10xf32>, vector<32x10xf32> -> vector<32x10xf32>
    %77 = vector.broadcast %1 : vector<1x10xf32> to vector<32x10xf32>
    %78 = arith.addf %76, %77 : vector<32x10xf32>
    %cst_48 = arith.constant 0.000000e+00 : f32
    %79 = vector.broadcast %cst_48 : f32 to vector<32x10xf32>
    %80 = arith.maximumf %78, %79 : vector<32x10xf32>
    %cst_49 = arith.constant dense<0.000000e+00> : vector<32x10xf32>
    %81 = tpu.matmul %80, %2, %cst_49 {dimension_numbers = #tpu.dot_dimension_numbers<[1], [0], [0], [1], [0, 0, 1, 1], [], []>} : vector<32x10xf32>, vector<10x10xf32>, vector<32x10xf32> -> vector<32x10xf32>
    %82 = arith.maximumf %73, %81 : vector<32x10xf32>
    %c0_50 = arith.constant 0 : index
    %c0_51 = arith.constant 0 : index
    %83 = vector.load %arg5[%c0_50, %c0_51] : memref<1x10xf32, #tpu.memory_space<vmem>>, vector<1x10xf32>
    %84 = vector.broadcast %83 : vector<1x10xf32> to vector<32x10xf32>
    %85 = arith.addf %82, %84 : vector<32x10xf32>
    %cst_52 = arith.constant 0.000000e+00 : f32
    %86 = vector.broadcast %cst_52 : f32 to vector<32x10xf32>
    %87 = arith.maximumf %85, %86 : vector<32x10xf32>
    %88 = arith.truncf %87 : vector<32x10xf32> to vector<32x10xbf16>
    %c0_53 = arith.constant 0 : index
    %c0_54 = arith.constant 0 : index
    %89 = vector.load %arg6[%c0_53, %c0_54] : memref<32x10xbf16, #tpu.memory_space<vmem>>, vector<32x10xbf16>
    tpu.vector_store %arg6[%c0_53, %c0_54], %88 {strides = array<i32>} : memref<32x10xbf16, #tpu.memory_space<vmem>>, vector<32x10xbf16>,
    return
  }
  func.func @transform_0(%arg0: i32) -> (i32, i32, i32) {
    %c0_i32 = arith.constant 0 : i32
    %c0_i32_0 = arith.constant 0 : i32
    %c0_i32_1 = arith.constant 0 : i32
    return %arg0, %c0_i32, %c0_i32_0 : i32, i32, i32
  }
  func.func @transform_1(%arg0: i32) -> (i32, i32) {
    %c0_i32 = arith.constant 0 : i32
    %c0_i32_0 = arith.constant 0 : i32
    %c0_i32_1 = arith.constant 0 : i32
    return %c0_i32, %c0_i32_0 : i32, i32
  }
  func.func @transform_2(%arg0: i32) -> (i32, i32) {
    %c0_i32 = arith.constant 0 : i32
    %c0_i32_0 = arith.constant 0 : i32
    %c0_i32_1 = arith.constant 0 : i32
    return %c0_i32, %c0_i32_0 : i32, i32
  }
  func.func @transform_3(%arg0: i32) -> (i32, i32) {
    %c0_i32 = arith.constant 0 : i32
    %c0_i32_0 = arith.constant 0 : i32
    %c0_i32_1 = arith.constant 0 : i32
    return %c0_i32, %c0_i32_0 : i32, i32
  }
  func.func @transform_4(%arg0: i32) -> (i32, i32) {
    %c0_i32 = arith.constant 0 : i32
    %c0_i32_0 = arith.constant 0 : i32
    %c0_i32_1 = arith.constant 0 : i32
    return %c0_i32, %c0_i32_0 : i32, i32
  }
  func.func @transform_5(%arg0: i32) -> (i32, i32) {
    %c0_i32 = arith.constant 0 : i32
    %c0_i32_0 = arith.constant 0 : i32
    return %arg0, %c0_i32 : i32, i32
  }
}

module attributes {stable_mosaic.version = 11 : i64} {
  func.func @_point_kernel(%arg0: i32, %arg1: i32, %arg2: memref<32x10xbf16, #tpu.memory_space<vmem>>, %arg3: memref<10x64xbf16, #tpu.memory_space<vmem>>, %arg4: memref<1x64xf32, #tpu.memory_space<vmem>>, %arg5: memref<32x64xbf16, #tpu.memory_space<vmem>>) attributes {dimension_semantics = [#tpu.dimension_semantics<parallel>, #tpu.dimension_semantics<parallel>], iteration_bounds = array<i64: 1, 1>, scalar_prefetch = 0 : i64, scratch_operands = 0 : i64, tpu.core_type = #tpu.core_type<tc>, window_params = [{transform_indices = @transform_0, window_bounds = array<i64: 32, 10>}, {transform_indices = @transform_1, window_bounds = array<i64: 10, 64>}, {transform_indices = @transform_2, window_bounds = array<i64: 1, 64>}, {transform_indices = @transform_3, window_bounds = array<i64: 32, 64>}]} {
    %c0 = arith.constant 0 : index
    %c0_0 = arith.constant 0 : index
    %0 = vector.load %arg3[%c0, %c0_0] : memref<10x64xbf16, #tpu.memory_space<vmem>>, vector<10x64xbf16>
    %c0_1 = arith.constant 0 : index
    %c0_2 = arith.constant 0 : index
    %1 = vector.load %arg4[%c0_1, %c0_2] : memref<1x64xf32, #tpu.memory_space<vmem>>, vector<1x64xf32>
    %c0_3 = arith.constant 0 : index
    %c0_4 = arith.constant 0 : index
    %2 = vector.load %arg2[%c0_3, %c0_4] : memref<32x10xbf16, #tpu.memory_space<vmem>>, vector<32x10xbf16>
    %cst = arith.constant dense<0.000000e+00> : vector<32x64xf32>
    %3 = tpu.matmul %2, %0, %cst {dimension_numbers = #tpu.dot_dimension_numbers<[1], [0], [0], [1], [0, 0, 1, 1], [], []>} : vector<32x10xbf16>, vector<10x64xbf16>, vector<32x64xf32> -> vector<32x64xf32>
    %4 = vector.broadcast %1 : vector<1x64xf32> to vector<32x64xf32>
    %5 = arith.addf %3, %4 : vector<32x64xf32>
    %cst_5 = arith.constant 0.000000e+00 : f32
    %6 = vector.broadcast %cst_5 : f32 to vector<32x64xf32>
    %7 = arith.maximumf %5, %6 : vector<32x64xf32>
    %8 = arith.truncf %7 : vector<32x64xf32> to vector<32x64xbf16>
    %c0_6 = arith.constant 0 : index
    %c0_7 = arith.constant 0 : index
    %9 = vector.load %arg5[%c0_6, %c0_7] : memref<32x64xbf16, #tpu.memory_space<vmem>>, vector<32x64xbf16>
    tpu.vector_store %arg5[%c0_6, %c0_7], %8 {strides = array<i32>} : memref<32x64xbf16, #tpu.memory_space<vmem>>, vector<32x64xbf16>,
    return
  }
  func.func @transform_0(%arg0: i32, %arg1: i32) -> (i32, i32) {
    %c0_i32 = arith.constant 0 : i32
    %c0_i32_0 = arith.constant 0 : i32
    return %arg0, %c0_i32 : i32, i32
  }
  func.func @transform_1(%arg0: i32, %arg1: i32) -> (i32, i32) {
    %c0_i32 = arith.constant 0 : i32
    %c0_i32_0 = arith.constant 0 : i32
    return %c0_i32, %arg1 : i32, i32
  }
  func.func @transform_2(%arg0: i32, %arg1: i32) -> (i32, i32) {
    %c0_i32 = arith.constant 0 : i32
    %c0_i32_0 = arith.constant 0 : i32
    return %c0_i32, %arg1 : i32, i32
  }
  func.func @transform_3(%arg0: i32, %arg1: i32) -> (i32, i32) {
    %c0_i32 = arith.constant 0 : i32
    return %arg0, %arg1 : i32, i32
  }
}

module attributes {stable_mosaic.version = 11 : i64} {
  func.func @_point_kernel(%arg0: i32, %arg1: i32, %arg2: memref<32x64xbf16, #tpu.memory_space<vmem>>, %arg3: memref<64x64xbf16, #tpu.memory_space<vmem>>, %arg4: memref<1x64xf32, #tpu.memory_space<vmem>>, %arg5: memref<32x64xbf16, #tpu.memory_space<vmem>>) attributes {dimension_semantics = [#tpu.dimension_semantics<parallel>, #tpu.dimension_semantics<parallel>], iteration_bounds = array<i64: 1, 1>, scalar_prefetch = 0 : i64, scratch_operands = 0 : i64, tpu.core_type = #tpu.core_type<tc>, window_params = [{transform_indices = @transform_0, window_bounds = array<i64: 32, 64>}, {transform_indices = @transform_1, window_bounds = array<i64: 64, 64>}, {transform_indices = @transform_2, window_bounds = array<i64: 1, 64>}, {transform_indices = @transform_3, window_bounds = array<i64: 32, 64>}]} {
    %c0 = arith.constant 0 : index
    %c0_0 = arith.constant 0 : index
    %0 = vector.load %arg3[%c0, %c0_0] : memref<64x64xbf16, #tpu.memory_space<vmem>>, vector<64x64xbf16>
    %c0_1 = arith.constant 0 : index
    %c0_2 = arith.constant 0 : index
    %1 = vector.load %arg4[%c0_1, %c0_2] : memref<1x64xf32, #tpu.memory_space<vmem>>, vector<1x64xf32>
    %c0_3 = arith.constant 0 : index
    %c0_4 = arith.constant 0 : index
    %2 = vector.load %arg2[%c0_3, %c0_4] : memref<32x64xbf16, #tpu.memory_space<vmem>>, vector<32x64xbf16>
    %cst = arith.constant dense<0.000000e+00> : vector<32x64xf32>
    %3 = tpu.matmul %2, %0, %cst {dimension_numbers = #tpu.dot_dimension_numbers<[1], [0], [0], [1], [0, 0, 1, 1], [], []>} : vector<32x64xbf16>, vector<64x64xbf16>, vector<32x64xf32> -> vector<32x64xf32>
    %4 = vector.broadcast %1 : vector<1x64xf32> to vector<32x64xf32>
    %5 = arith.addf %3, %4 : vector<32x64xf32>
    %cst_5 = arith.constant 0.000000e+00 : f32
    %6 = vector.broadcast %cst_5 : f32 to vector<32x64xf32>
    %7 = arith.maximumf %5, %6 : vector<32x64xf32>
    %8 = arith.truncf %7 : vector<32x64xf32> to vector<32x64xbf16>
    %c0_6 = arith.constant 0 : index
    %c0_7 = arith.constant 0 : index
    %9 = vector.load %arg5[%c0_6, %c0_7] : memref<32x64xbf16, #tpu.memory_space<vmem>>, vector<32x64xbf16>
    tpu.vector_store %arg5[%c0_6, %c0_7], %8 {strides = array<i32>} : memref<32x64xbf16, #tpu.memory_space<vmem>>, vector<32x64xbf16>,
    return
  }
  func.func @transform_0(%arg0: i32, %arg1: i32) -> (i32, i32) {
    %c0_i32 = arith.constant 0 : i32
    %c0_i32_0 = arith.constant 0 : i32
    return %arg0, %c0_i32 : i32, i32
  }
  func.func @transform_1(%arg0: i32, %arg1: i32) -> (i32, i32) {
    %c0_i32 = arith.constant 0 : i32
    %c0_i32_0 = arith.constant 0 : i32
    return %c0_i32, %arg1 : i32, i32
  }
  func.func @transform_2(%arg0: i32, %arg1: i32) -> (i32, i32) {
    %c0_i32 = arith.constant 0 : i32
    %c0_i32_0 = arith.constant 0 : i32
    return %c0_i32, %arg1 : i32, i32
  }
  func.func @transform_3(%arg0: i32, %arg1: i32) -> (i32, i32) {
    %c0_i32 = arith.constant 0 : i32
    return %arg0, %arg1 : i32, i32
  }
}

module attributes {stable_mosaic.version = 11 : i64} {
  func.func @_ec5_kernel(%arg0: i32, %arg1: i32, %arg2: i32, %arg3: memref<1x16x64xbf16, #tpu.memory_space<vmem>>, %arg4: memref<64x256xbf16, #tpu.memory_space<vmem>>, %arg5: memref<1x256xf32, #tpu.memory_space<vmem>>, %arg6: memref<1x1x256xbf16, #tpu.memory_space<vmem>>, %arg7: memref<1x256xf32, #tpu.memory_space<vmem>>) attributes {dimension_semantics = [#tpu.dimension_semantics<parallel>, #tpu.dimension_semantics<parallel>, #tpu.dimension_semantics<arbitrary>], iteration_bounds = array<i64: 2, 4, 1>, scalar_prefetch = 0 : i64, scratch_operands = 1 : i64, tpu.core_type = #tpu.core_type<tc>, window_params = [{transform_indices = @transform_0, window_bounds = array<i64: 1, 16, 64>}, {transform_indices = @transform_1, window_bounds = array<i64: 64, 256>}, {transform_indices = @transform_2, window_bounds = array<i64: 1, 256>}, {transform_indices = @transform_3, window_bounds = array<i64: 1, 1, 256>}]} {
    %c0_i32 = arith.constant 0 : i32
    %0 = arith.cmpi eq, %arg2, %c0_i32 : i32
    %1 = arith.extui %0 : i1 to i32
    %c0_i32_0 = arith.constant 0 : i32
    %2 = arith.cmpi ne, %1, %c0_i32_0 : i32
    scf.if %2 {
      %cst_12 = arith.constant 0xFF800000 : f32
      %15 = vector.broadcast %cst_12 : f32 to vector<1x256xf32>
      %c0_13 = arith.constant 0 : index
      %c0_14 = arith.constant 0 : index
      %16 = vector.load %arg7[%c0_13, %c0_14] : memref<1x256xf32, #tpu.memory_space<vmem>>, vector<1x256xf32>
      tpu.vector_store %arg7[%c0_13, %c0_14], %15 {strides = array<i32>} : memref<1x256xf32, #tpu.memory_space<vmem>>, vector<1x256xf32>,
    } else {
    }
    %c0 = arith.constant 0 : index
    %c0_1 = arith.constant 0 : index
    %c0_2 = arith.constant 0 : index
    %3 = vector.load %arg3[%c0, %c0_1, %c0_2] : memref<1x16x64xbf16, #tpu.memory_space<vmem>>, vector<1x16x64xbf16>
    %4 = vector.shape_cast %3 : vector<1x16x64xbf16> to vector<16x64xbf16>
    %c0_3 = arith.constant 0 : index
    %c0_4 = arith.constant 0 : index
    %5 = vector.load %arg4[%c0_3, %c0_4] : memref<64x256xbf16, #tpu.memory_space<vmem>>, vector<64x256xbf16>
    %cst = arith.constant dense<0.000000e+00> : vector<16x256xf32>
    %6 = tpu.matmul %4, %5, %cst {dimension_numbers = #tpu.dot_dimension_numbers<[1], [0], [0], [1], [0, 0, 1, 1], [], []>} : vector<16x64xbf16>, vector<64x256xbf16>, vector<16x256xf32> -> vector<16x256xf32>
    %c0_5 = arith.constant 0 : index
    %c0_6 = arith.constant 0 : index
    %7 = vector.load %arg7[%c0_5, %c0_6] : memref<1x256xf32, #tpu.memory_space<vmem>>, vector<1x256xf32>
    %cst_7 = arith.constant dense<0xFF800000> : vector<256xf32>
    %8 = vector.multi_reduction <maximumf>, %6, %cst_7 [0] : vector<16x256xf32> to vector<256xf32>
    %9 = vector.shape_cast %8 : vector<256xf32> to vector<1x256xf32>
    %10 = arith.maximumf %7, %9 : vector<1x256xf32>
    %c0_8 = arith.constant 0 : index
    %c0_9 = arith.constant 0 : index
    %11 = vector.load %arg7[%c0_8, %c0_9] : memref<1x256xf32, #tpu.memory_space<vmem>>, vector<1x256xf32>
    tpu.vector_store %arg7[%c0_8, %c0_9], %10 {strides = array<i32>} : memref<1x256xf32, #tpu.memory_space<vmem>>, vector<1x256xf32>,
    %c0_i32_10 = arith.constant 0 : i32
    %12 = arith.cmpi eq, %arg2, %c0_i32_10 : i32
    %13 = arith.extui %12 : i1 to i32
    %c0_i32_11 = arith.constant 0 : i32
    %14 = arith.cmpi ne, %13, %c0_i32_11 : i32
    scf.if %14 {
      %c0_12 = arith.constant 0 : index
      %c0_13 = arith.constant 0 : index
      %15 = vector.load %arg7[%c0_12, %c0_13] : memref<1x256xf32, #tpu.memory_space<vmem>>, vector<1x256xf32>
      %c0_14 = arith.constant 0 : index
      %c0_15 = arith.constant 0 : index
      %16 = vector.load %arg5[%c0_14, %c0_15] : memref<1x256xf32, #tpu.memory_space<vmem>>, vector<1x256xf32>
      %17 = arith.addf %15, %16 : vector<1x256xf32>
      %cst_16 = arith.constant 0.000000e+00 : f32
      %18 = vector.broadcast %cst_16 : f32 to vector<1x256xf32>
      %19 = arith.maximumf %17, %18 : vector<1x256xf32>
      %20 = arith.truncf %19 : vector<1x256xf32> to vector<1x256xbf16>
      %c0_17 = arith.constant 0 : index
      %c0_18 = arith.constant 0 : index
      %c0_19 = arith.constant 0 : index
      %21 = vector.load %arg6[%c0_17, %c0_18, %c0_19] : memref<1x1x256xbf16, #tpu.memory_space<vmem>>, vector<1x1x256xbf16>
      %22 = vector.shape_cast %21 : vector<1x1x256xbf16> to vector<1x256xbf16>
      %23 = vector.shape_cast %20 : vector<1x256xbf16> to vector<1x1x256xbf16>
      tpu.vector_store %arg6[%c0_17, %c0_18, %c0_19], %23 {strides = array<i32>} : memref<1x1x256xbf16, #tpu.memory_space<vmem>>, vector<1x1x256xbf16>,
    } else {
    }
    return
  }
  func.func @transform_0(%arg0: i32, %arg1: i32, %arg2: i32) -> (i32, i32, i32) {
    %c0_i32 = arith.constant 0 : i32
    %c0_i32_0 = arith.constant 0 : i32
    return %arg0, %arg2, %c0_i32 : i32, i32, i32
  }
  func.func @transform_1(%arg0: i32, %arg1: i32, %arg2: i32) -> (i32, i32) {
    %c0_i32 = arith.constant 0 : i32
    %c0_i32_0 = arith.constant 0 : i32
    return %c0_i32, %arg1 : i32, i32
  }
  func.func @transform_2(%arg0: i32, %arg1: i32, %arg2: i32) -> (i32, i32) {
    %c0_i32 = arith.constant 0 : i32
    %c0_i32_0 = arith.constant 0 : i32
    return %c0_i32, %arg1 : i32, i32
  }
  func.func @transform_3(%arg0: i32, %arg1: i32, %arg2: i32) -> (i32, i32, i32) {
    %c0_i32 = arith.constant 0 : i32
    %c0_i32_0 = arith.constant 0 : i32
    return %arg0, %c0_i32, %arg1 : i32, i32, i32
  }
}

module attributes {stable_mosaic.version = 11 : i64} {
  func.func @_tail_kernel(%arg0: i32, %arg1: memref<32x1088xbf16, #tpu.memory_space<vmem>>, %arg2: memref<1088x512xbf16, #tpu.memory_space<vmem>>, %arg3: memref<1x512xf32, #tpu.memory_space<vmem>>, %arg4: memref<512x128xbf16, #tpu.memory_space<vmem>>, %arg5: memref<1x128xf32, #tpu.memory_space<vmem>>, %arg6: memref<128x32xbf16, #tpu.memory_space<vmem>>, %arg7: memref<32x32xbf16, #tpu.memory_space<vmem>>, %arg8: memref<32x512xbf16, #tpu.memory_space<vmem>>) attributes {dimension_semantics = [#tpu.dimension_semantics<parallel>], iteration_bounds = array<i64: 1>, scalar_prefetch = 0 : i64, scratch_operands = 1 : i64, tpu.core_type = #tpu.core_type<tc>, window_params = [{transform_indices = @transform_0, window_bounds = array<i64: 32, 1088>}, {pipeline_mode = #tpu.pipeline_mode<synchronous>, transform_indices = @transform_1, window_bounds = array<i64: 1088, 512>}, {pipeline_mode = #tpu.pipeline_mode<synchronous>, transform_indices = @transform_2, window_bounds = array<i64: 1, 512>}, {pipeline_mode = #tpu.pipeline_mode<synchronous>, transform_indices = @transform_3, window_bounds = array<i64: 512, 128>}, {pipeline_mode = #tpu.pipeline_mode<synchronous>, transform_indices = @transform_4, window_bounds = array<i64: 1, 128>}, {pipeline_mode = #tpu.pipeline_mode<synchronous>, transform_indices = @transform_5, window_bounds = array<i64: 128, 32>}, {transform_indices = @transform_6, window_bounds = array<i64: 32, 32>}]} {
    %c0 = arith.constant 0 : index
    %c0_0 = arith.constant 0 : index
    %0 = vector.load %arg1[%c0, %c0_0] : memref<32x1088xbf16, #tpu.memory_space<vmem>>, vector<32x1088xbf16>
    %c0_1 = arith.constant 0 : index
    %c0_2 = arith.constant 0 : index
    %1 = vector.load %arg2[%c0_1, %c0_2] : memref<1088x512xbf16, #tpu.memory_space<vmem>>, vector<1088x256xbf16>
    %cst = arith.constant dense<0.000000e+00> : vector<32x256xf32>
    %2 = tpu.matmul %0, %1, %cst {dimension_numbers = #tpu.dot_dimension_numbers<[1], [0], [0], [1], [0, 0, 1, 1], [], []>} : vector<32x1088xbf16>, vector<1088x256xbf16>, vector<32x256xf32> -> vector<32x256xf32>
    %c0_3 = arith.constant 0 : index
    %c0_4 = arith.constant 0 : index
    %3 = vector.load %arg3[%c0_3, %c0_4] : memref<1x512xf32, #tpu.memory_space<vmem>>, vector<1x256xf32>
    %4 = vector.broadcast %3 : vector<1x256xf32> to vector<32x256xf32>
    %5 = arith.addf %2, %4 : vector<32x256xf32>
    %cst_5 = arith.constant 0.000000e+00 : f32
    %6 = vector.broadcast %cst_5 : f32 to vector<32x256xf32>
    %7 = arith.maximumf %5, %6 : vector<32x256xf32>
    %8 = arith.truncf %7 : vector<32x256xf32> to vector<32x256xbf16>
    %c0_6 = arith.constant 0 : index
    %c0_7 = arith.constant 0 : index
    %9 = vector.load %arg8[%c0_6, %c0_7] : memref<32x512xbf16, #tpu.memory_space<vmem>>, vector<32x256xbf16>
    tpu.vector_store %arg8[%c0_6, %c0_7], %8 {strides = array<i32>} : memref<32x512xbf16, #tpu.memory_space<vmem>>, vector<32x256xbf16>,
    %c0_8 = arith.constant 0 : index
    %c256 = arith.constant 256 : index
    %10 = vector.load %arg2[%c0_8, %c256] : memref<1088x512xbf16, #tpu.memory_space<vmem>>, vector<1088x256xbf16>
    %cst_9 = arith.constant dense<0.000000e+00> : vector<32x256xf32>
    %11 = tpu.matmul %0, %10, %cst_9 {dimension_numbers = #tpu.dot_dimension_numbers<[1], [0], [0], [1], [0, 0, 1, 1], [], []>} : vector<32x1088xbf16>, vector<1088x256xbf16>, vector<32x256xf32> -> vector<32x256xf32>
    %c0_10 = arith.constant 0 : index
    %c256_11 = arith.constant 256 : index
    %12 = vector.load %arg3[%c0_10, %c256_11] : memref<1x512xf32, #tpu.memory_space<vmem>>, vector<1x256xf32>
    %13 = vector.broadcast %12 : vector<1x256xf32> to vector<32x256xf32>
    %14 = arith.addf %11, %13 : vector<32x256xf32>
    %cst_12 = arith.constant 0.000000e+00 : f32
    %15 = vector.broadcast %cst_12 : f32 to vector<32x256xf32>
    %16 = arith.maximumf %14, %15 : vector<32x256xf32>
    %17 = arith.truncf %16 : vector<32x256xf32> to vector<32x256xbf16>
    %c0_13 = arith.constant 0 : index
    %c256_14 = arith.constant 256 : index
    %18 = vector.load %arg8[%c0_13, %c256_14] : memref<32x512xbf16, #tpu.memory_space<vmem>>, vector<32x256xbf16>
    tpu.vector_store %arg8[%c0_13, %c256_14], %17 {strides = array<i32>} : memref<32x512xbf16, #tpu.memory_space<vmem>>, vector<32x256xbf16>,
    %c0_15 = arith.constant 0 : index
    %c0_16 = arith.constant 0 : index
    %19 = vector.load %arg8[%c0_15, %c0_16] : memref<32x512xbf16, #tpu.memory_space<vmem>>, vector<32x512xbf16>
    %c0_17 = arith.constant 0 : index
    %c0_18 = arith.constant 0 : index
    %20 = vector.load %arg4[%c0_17, %c0_18] : memref<512x128xbf16, #tpu.memory_space<vmem>>, vector<512x128xbf16>
    %cst_19 = arith.constant dense<0.000000e+00> : vector<32x128xf32>
    %21 = tpu.matmul %19, %20, %cst_19 {dimension_numbers = #tpu.dot_dimension_numbers<[1], [0], [0], [1], [0, 0, 1, 1], [], []>} : vector<32x512xbf16>, vector<512x128xbf16>, vector<32x128xf32> -> vector<32x128xf32>
    %c0_20 = arith.constant 0 : index
    %c0_21 = arith.constant 0 : index
    %22 = vector.load %arg5[%c0_20, %c0_21] : memref<1x128xf32, #tpu.memory_space<vmem>>, vector<1x128xf32>
    %23 = vector.broadcast %22 : vector<1x128xf32> to vector<32x128xf32>
    %24 = arith.addf %21, %23 : vector<32x128xf32>
    %cst_22 = arith.constant 0.000000e+00 : f32
    %25 = vector.broadcast %cst_22 : f32 to vector<32x128xf32>
    %26 = arith.maximumf %24, %25 : vector<32x128xf32>
    %27 = arith.truncf %26 : vector<32x128xf32> to vector<32x128xbf16>
    %c0_23 = arith.constant 0 : index
    %c0_24 = arith.constant 0 : index
    %28 = vector.load %arg6[%c0_23, %c0_24] : memref<128x32xbf16, #tpu.memory_space<vmem>>, vector<128x32xbf16>
    %cst_25 = arith.constant dense<0.000000e+00> : vector<32x32xf32>
    %29 = tpu.matmul %27, %28, %cst_25 {dimension_numbers = #tpu.dot_dimension_numbers<[1], [0], [0], [1], [0, 0, 1, 1], [], []>} : vector<32x128xbf16>, vector<128x32xbf16>, vector<32x32xf32> -> vector<32x32xf32>
    %cst_26 = arith.constant 0.000000e+00 : f32
    %30 = vector.broadcast %cst_26 : f32 to vector<32x32xf32>
    %31 = arith.maximumf %29, %30 : vector<32x32xf32>
    %32 = arith.truncf %31 : vector<32x32xf32> to vector<32x32xbf16>
    %c0_27 = arith.constant 0 : index
    %c0_28 = arith.constant 0 : index
    %33 = vector.load %arg7[%c0_27, %c0_28] : memref<32x32xbf16, #tpu.memory_space<vmem>>, vector<32x32xbf16>
    tpu.vector_store %arg7[%c0_27, %c0_28], %32 {strides = array<i32>} : memref<32x32xbf16, #tpu.memory_space<vmem>>, vector<32x32xbf16>,
    return
  }
  func.func @transform_0(%arg0: i32) -> (i32, i32) {
    %c0_i32 = arith.constant 0 : i32
    %c0_i32_0 = arith.constant 0 : i32
    return %arg0, %c0_i32 : i32, i32
  }
  func.func @transform_1(%arg0: i32) -> (i32, i32) {
    %c0_i32 = arith.constant 0 : i32
    %c0_i32_0 = arith.constant 0 : i32
    %c0_i32_1 = arith.constant 0 : i32
    return %c0_i32, %c0_i32_0 : i32, i32
  }
  func.func @transform_2(%arg0: i32) -> (i32, i32) {
    %c0_i32 = arith.constant 0 : i32
    %c0_i32_0 = arith.constant 0 : i32
    %c0_i32_1 = arith.constant 0 : i32
    return %c0_i32, %c0_i32_0 : i32, i32
  }
  func.func @transform_3(%arg0: i32) -> (i32, i32) {
    %c0_i32 = arith.constant 0 : i32
    %c0_i32_0 = arith.constant 0 : i32
    %c0_i32_1 = arith.constant 0 : i32
    return %c0_i32, %c0_i32_0 : i32, i32
  }
  func.func @transform_4(%arg0: i32) -> (i32, i32) {
    %c0_i32 = arith.constant 0 : i32
    %c0_i32_0 = arith.constant 0 : i32
    %c0_i32_1 = arith.constant 0 : i32
    return %c0_i32, %c0_i32_0 : i32, i32
  }
  func.func @transform_5(%arg0: i32) -> (i32, i32) {
    %c0_i32 = arith.constant 0 : i32
    %c0_i32_0 = arith.constant 0 : i32
    %c0_i32_1 = arith.constant 0 : i32
    return %c0_i32, %c0_i32_0 : i32, i32
  }
  func.func @transform_6(%arg0: i32) -> (i32, i32) {
    %c0_i32 = arith.constant 0 : i32
    %c0_i32_0 = arith.constant 0 : i32
    return %arg0, %c0_i32 : i32, i32
  }
}

</mosaic_0001>

<bundles_post_ra>
// kernel: repsurf_forward.8
= control target key start
LH: loop header
LB: loop body
LE: loop exit
PB: predicated region body
PF: predicated region fallthrough
CT: control target
= control target key end

     0   :  { %vm47_vm0 = vcmask 1044480   ;;  %vm40_vm1 = vcmask 80896   ;;  %vm78_vm2 = vcmask 519168   ;;  %s153_s1 = inlined_call_operand.vmem [shape: bf16[10,64], index: 1, kind: input, shape index: {}]   ;;  %s154_s0 = inlined_call_operand.vmem [shape: bf16[32,10], index: 0, kind: input, shape index: {}]   ;;  %s155_s2 = inlined_call_operand.vmem [shape: f32[1,64], index: 2, kind: input, shape index: {}]   ;;  %s156_s3 = inlined_call_operand.vmem [shape: bf16[32,64], index: 3, kind: output, shape index: {}]  }
   0x1   :  { %v97_v0 = vld [vmem:[%s153_s1] sm:$0xf]  ;;  %v101_v1 = vld [vmem:[%s153_s1] sm:$0x10]  ;;  %v103_v5 = vld [vmem:[%s154_s0 + $0x8] sm:$0xff] }
   0x2   :  { %v98_v2 = vor.u32 %v101_v1, %v97_v0  ;;  %v102_v4 = vld [vmem:[%s154_s0] sm:$0xff] }
   0x3   :  { %v105_v6 = vld [vmem:[%s155_s2] ss:$0 sm:$0xff] }
   0x4   :  { %v49_v3 = vsel %vm47_vm0, %v98_v2, 0 }
   0x5   :  { %58 = vmatpush.bf16.msra.mxu0 %v49_v3  ;;  %104 = vmatpush.bf16.msra.mxu1 %v49_v3 }
   0x8   :  { %99 = vmatmul.msk.bf16.vlgmr.msra.gmra.mxu0 %vm40_vm1, %v102_v4  ;;  %100 = vmatmul.msk.bf16.vlgmr.msra.gmra.mxu1 %vm40_vm1, %v103_v5 }
  0x85   :  { %v60_v7 = vpop.f32.mrf.mxu0  ;;  %v65_v8 = vpop.f32.mrf.mxu1 }
  0x86   :  { %v61_v9 = vadd.f32 %v105_v6, %v60_v7  ;;  %v66_v10 = vadd.f32 %v105_v6, %v65_v8 }
  0x88   :  { %v70_v11 = vmax.f32 %v61_v9, 0.0  ;;  %v72_v12 = vmax.f32 %v66_v10, 0.0 }
  0x8a   :  { %v74_v13 = vpack.c.bf16 %v70_v11, %v70_v11  ;;  %v76_v14 = vpack.c.bf16 %v72_v12, %v72_v12 }
  0x8c   :  { %79 = vst.msk [vmem:[%s156_s3] sm:$0xf] %vm78_vm2, %v74_v13 }
  0x8d   :  { %81 = vst.msk [vmem:[%s156_s3 + $0x8] sm:$0xf] %vm78_vm2, %v76_v14  ;;  %v62_v15 = vpop.f32.mrf.mxu0  ;;  %v67_v16 = vpop.f32.mrf.mxu1 }
  0x8e   :  { %v63_v17 = vadd.f32 %v105_v6, %v62_v15  ;;  %v68_v18 = vadd.f32 %v105_v6, %v67_v16 }
  0x90   :  { %v71_v19 = vmax.f32 %v63_v17, 0.0  ;;  %v73_v20 = vmax.f32 %v68_v18, 0.0 }
  0x92   :  { %v75_v21 = vpack.c.bf16 %v71_v19, %v71_v19  ;;  %v77_v22 = vpack.c.bf16 %v73_v20, %v73_v20 }
  0x94   :  { %80 = vst.msk [vmem:[%s156_s3 + $0x4] sm:$0xf] %vm78_vm2, %v75_v21 }
  0x95   :  { %82 = vst.msk [vmem:[%s156_s3 + $0xc] sm:$0xf] %vm78_vm2, %v77_v22 }

// kernel: repsurf_forward.7
= control target key start
LH: loop header
LB: loop body
LE: loop exit
PB: predicated region body
PF: predicated region fallthrough
CT: control target
= control target key end

     0   :  { %vm163_vm0 = vcmask 1046528   ;;  %vm92_vm1 = vcmask 1041409   ;;  %vm95_vm2 = vcmask 1042434   ;;  %vm98_vm3 = vcmask 1043459   ;;  %s3466_s1 = inlined_call_operand.vmem [shape: f32[7,10], index: 1, kind: input, shape index: {}]   ;;  %s3467_s0 = inlined_call_operand.vmem [shape: f32[32,9,7], index: 0, kind: input, shape index: {}]   ;;  %s3468_s3 = inlined_call_operand.vmem [shape: f32[10,10], index: 3, kind: input, shape index: {}]   ;;  %s3469_s2 = inlined_call_operand.vmem [shape: f32[1,10], index: 2, kind: input, shape index: {}]   ;;  %s3470_s4 = inlined_call_operand.vmem [shape: f32[1,10], index: 4, kind: input, shape index: {}]   ;;  %s3471_s5 = inlined_call_operand.vmem [shape: bf16[32,10], index: 5, kind: output, shape index: {}]  }
   0x1   :  { %v2049_v0 = vld [vmem:[%s3466_s1] sm:$0x7f]  ;;  %v25_v1 = vld [vmem:[%s3467_s0 + $0x10] sm:$0x1]  ;;  %vm101_vm4 = vcmask 1044484   ;;  %vm104_vm5 = vcmask 1045509  }
   0x2   :  { %1919 = vmatpush.msk.msra.mxu0 %vm163_vm0, %v2049_v0  ;;  %1929 = vmatpush.msk.msra.mxu2 %vm163_vm0, %v2049_v0  ;;  %v26_v2 = vld [vmem:[%s3467_s0 + $0x20] sm:$0x1]  ;;  %v27_v3 = vld [vmem:[%s3467_s0 + $0x30] sm:$0x1]  ;;  %v91_v9 = vrot.slane %v25_v1, 7  ;;  %vm107_vm6 = vcmask 1046534  }
   0x3   :  { %v28_v4 = vld [vmem:[%s3467_s0 + $0x40] sm:$0x1]  ;;  %v29_v6 = vld [vmem:[%s3467_s0 + $0x50] sm:$0x1]  ;;  %2009 = vmatpush.msk.msra.mxu1 %vm163_vm0, %v2049_v0  ;;  %2010 = vmatpush.msk.msra.mxu3 %vm163_vm0, %v2049_v0  ;;  %v94_v10 = vrot.slane %v26_v2, 6  ;;  %v97_v11 = vrot.slane %v27_v3, 5 }
   0x4   :  { %v24_v5 = vld [vmem:[%s3467_s0] sm:$0x1]  ;;  %v31_v8 = vld [vmem:[%s3467_s0 + $0x70] sm:$0x1]  ;;  %v100_v12 = vrot.slane %v28_v4, 4  ;;  %1939 = vmatpush.msk.msrb.mxu0 %vm163_vm0, %v2049_v0  ;;  %v103_v13 = vrot.slane %v29_v6, 3 }
   0x5   :  { %v30_v7 = vld [vmem:[%s3467_s0 + $0x60] sm:$0x1]  ;;  %v246_v14 = vld [vmem:[%s3467_s0 + $0x1] sm:$0x1]  ;;  %v247_v15 = vld [vmem:[%s3467_s0 + $0x11] sm:$0x1]  ;;  %v93_v16 = vsel %vm92_vm1, %v91_v9, %v24_v5 }
   0x6   :  { %v106_v17 = vrot.slane %v30_v7, 2  ;;  %v248_v18 = vld [vmem:[%s3467_s0 + $0x21] sm:$0x1]  ;;  %v96_v19 = vsel %vm95_vm2, %v94_v10, %v93_v16  ;;  %v109_v20 = vrot.slane %v31_v8, 1  ;;  %v249_v21 = vld [vmem:[%s3467_s0 + $0x31] sm:$0x1] }
   0x7   :  { %v250_v22 = vld [vmem:[%s3467_s0 + $0x41] sm:$0x1]  ;;  %v310_v23 = vrot.slane %v247_v15, 7  ;;  %v99_v24 = vsel %vm98_vm3, %v97_v11, %v96_v19  ;;  %vm110_vm7 = vcmask 1047559   ;;  %vm154_vm8 = vcmask 56320  }
   0x8   :  { %v251_v25 = vld [vmem:[%s3467_s0 + $0x51] sm:$0x1]  ;;  %v252_v26 = vld [vmem:[%s3467_s0 + $0x61] sm:$0x1]  ;;  %v102_v27 = vsel %vm101_vm4, %v100_v12, %v99_v24  ;;  %v312_v30 = vrot.slane %v248_v18, 6  ;;  %v314_v31 = vrot.slane %v249_v21, 5 }
   0x9   :  { %v253_v28 = vld [vmem:[%s3467_s0 + $0x71] sm:$0x1]  ;;  %v311_v29 = vsel %vm92_vm1, %v310_v23, %v246_v14  ;;  %v33_v32 = vld [vmem:[%s3467_s0 + $0x90] sm:$0x1]  ;;  %v105_v33 = vsel %vm104_vm5, %v103_v13, %v102_v27  ;;  %v316_v34 = vrot.slane %v250_v22, 4  ;;  %v318_v35 = vrot.slane %v251_v25, 3 }
   0xa   :  { %v32_v36 = vld [vmem:[%s3467_s0 + $0x80] sm:$0x1]  ;;  %v108_v38 = vsel %vm107_vm6, %v106_v17, %v105_v33  ;;  %v313_v39 = vsel %vm95_vm2, %v312_v30, %v311_v29  ;;  %v320_v40 = vrot.slane %v252_v26, 2  ;;  %v35_v41 = vld [vmem:[%s3467_s0 + $0xb0] sm:$0x1]  ;;  %v112_v43 = vrot.slane %v33_v32, 7 }
   0xb   :  { %v34_v37 = vld [vmem:[%s3467_s0 + $0xa0] sm:$0x1]  ;;  %v111_v44 = vsel %vm110_vm7, %v109_v20, %v108_v38  ;;  %v315_v45 = vsel %vm98_vm3, %v314_v31, %v313_v39  ;;  %v322_v46 = vrot.slane %v253_v28, 1  ;;  %v37_v47 = vld [vmem:[%s3467_s0 + $0xd0] sm:$0x1]  ;;  %v116_v53 = vrot.slane %v35_v41, 5 }
   0xc   :  { %v36_v42 = vld [vmem:[%s3467_s0 + $0xc0] sm:$0x1]  ;;  %1920 = vmatmul.msk.f32.vlgmr.msra.gmra.mxu0 %vm154_vm8, %v111_v44  ;;  %v317_v49 = vsel %vm101_vm4, %v316_v34, %v315_v45  ;;  %v39_v50 = vld [vmem:[%s3467_s0 + $0xf0] sm:$0x1]  ;;  %v113_v51 = vsel %vm92_vm1, %v112_v43, %v32_v36  ;;  %v114_v52 = vrot.slane %v34_v37, 6  ;;  %v120_v57 = vrot.slane %v37_v47, 3 }
   0xd   :  { %v38_v48 = vld [vmem:[%s3467_s0 + $0xe0] sm:$0x1]  ;;  %v255_v54 = vld [vmem:[%s3467_s0 + $0x91] sm:$0x1]  ;;  %v319_v55 = vsel %vm104_vm5, %v318_v35, %v317_v49  ;;  %v118_v56 = vrot.slane %v36_v42, 4  ;;  %1959 = vmatpush.msk.msra.mxu0 %vm163_vm0, %v2049_v0  ;;  %v124_v5 = vrot.slane %v39_v50, 1 }
   0xe   :  { %v254_v58 = vld [vmem:[%s3467_s0 + $0x81] sm:$0x1]  ;;  %v321_v60 = vsel %vm107_vm6, %v320_v40, %v319_v55  ;;  %v115_v61 = vsel %vm95_vm2, %v114_v52, %v113_v51  ;;  %v122_v62 = vrot.slane %v38_v48, 2  ;;  %v257_v63 = vld [vmem:[%s3467_s0 + $0xb1] sm:$0x1]  ;;  %v324_v2 = vrot.slane %v255_v54, 7 }
   0xf   :  { %v256_v59 = vld [vmem:[%s3467_s0 + $0xa1] sm:$0x1]  ;;  %v323_v3 = vsel %vm110_vm7, %v322_v46, %v321_v60  ;;  %v117_v4 = vsel %vm98_vm3, %v116_v53, %v115_v61  ;;  %v259_v6 = vld [vmem:[%s3467_s0 + $0xd1] sm:$0x1]  ;;  %v328_v12 = vrot.slane %v257_v63, 5  ;;  %vm213_vm9 = vcmask 1041408  }
  0x10   :  { %v258_v1 = vld [vmem:[%s3467_s0 + $0xc1] sm:$0x1]  ;;  %1930 = vmatmul.msk.f32.vlgmr.msra.gmra.mxu2 %vm154_vm8, %v323_v3  ;;  %v119_v8 = vsel %vm101_vm4, %v118_v56, %v117_v4  ;;  %v261_v9 = vld [vmem:[%s3467_s0 + $0xf1] sm:$0x1]  ;;  %v325_v10 = vsel %vm92_vm1, %v324_v2, %v254_v58  ;;  %v326_v11 = vrot.slane %v256_v59, 6  ;;  %v332_v16 = vrot.slane %v259_v6, 3 }
  0x11   :  { %v260_v7 = vld [vmem:[%s3467_s0 + $0xe1] sm:$0x1]  ;;  %v41_v13 = vld [vmem:[%s3467_s0 + $0x110] sm:$0x1]  ;;  %v121_v14 = vsel %vm104_vm5, %v120_v57, %v119_v8  ;;  %v330_v15 = vrot.slane %v258_v1, 4  ;;  %v336_v27 = vrot.slane %v261_v9, 1 }
  0x12   :  { %v40_v17 = vld [vmem:[%s3467_s0 + $0x100] sm:$0x1]  ;;  %v123_v19 = vsel %vm107_vm6, %v122_v62, %v121_v14  ;;  %v327_v20 = vsel %vm95_vm2, %v326_v11, %v325_v10  ;;  %v334_v21 = vrot.slane %v260_v7, 2  ;;  %v43_v22 = vld [vmem:[%s3467_s0 + $0x130] sm:$0x1]  ;;  %v126_v24 = vrot.slane %v41_v13, 7 }
  0x13   :  { %v42_v18 = vld [vmem:[%s3467_s0 + $0x120] sm:$0x1]  ;;  %v125_v25 = vsel %vm110_vm7, %v124_v5, %v123_v19  ;;  %v329_v26 = vsel %vm98_vm3, %v328_v12, %v327_v20  ;;  %v45_v28 = vld [vmem:[%s3467_s0 + $0x150] sm:$0x1]  ;;  %v130_v34 = vrot.slane %v43_v22, 5  ;;  %vm200_vm10 = vcmask 80896  }
  0x14   :  { %v44_v23 = vld [vmem:[%s3467_s0 + $0x140] sm:$0x1]  ;;  %1921 = vmatmul.msk.f32.gmra.mxu0 %vm154_vm8, %v125_v25  ;;  %v331_v30 = vsel %vm101_vm4, %v330_v15, %v329_v26  ;;  %v47_v31 = vld [vmem:[%s3467_s0 + $0x170] sm:$0x1]  ;;  %v127_v32 = vsel %vm92_vm1, %v126_v24, %v40_v17  ;;  %v128_v33 = vrot.slane %v42_v18, 6  ;;  %v134_v38 = vrot.slane %v45_v28, 3 }
  0x15   :  { %v46_v29 = vld [vmem:[%s3467_s0 + $0x160] sm:$0x1]  ;;  %v263_v35 = vld [vmem:[%s3467_s0 + $0x111] sm:$0x1]  ;;  %v333_v36 = vsel %vm104_vm5, %v332_v16, %v331_v30  ;;  %v132_v37 = vrot.slane %v44_v23, 4  ;;  %v138_v49 = vrot.slane %v47_v31, 1 }
  0x16   :  { %v262_v39 = vld [vmem:[%s3467_s0 + $0x101] sm:$0x1]  ;;  %v335_v41 = vsel %vm107_vm6, %v334_v21, %v333_v36  ;;  %v129_v42 = vsel %vm95_vm2, %v128_v33, %v127_v32  ;;  %v136_v43 = vrot.slane %v46_v29, 2  ;;  %v265_v44 = vld [vmem:[%s3467_s0 + $0x131] sm:$0x1]  ;;  %v338_v46 = vrot.slane %v263_v35, 7 }
  0x17   :  { %v264_v40 = vld [vmem:[%s3467_s0 + $0x121] sm:$0x1]  ;;  %v337_v47 = vsel %vm110_vm7, %v336_v27, %v335_v41  ;;  %v131_v48 = vsel %vm98_vm3, %v130_v34, %v129_v42  ;;  %v267_v50 = vld [vmem:[%s3467_s0 + $0x151] sm:$0x1]  ;;  %v342_v56 = vrot.slane %v265_v44, 5  ;;  %vm1910_vm11 = vcmask 76800  }
  0x18   :  { %v266_v45 = vld [vmem:[%s3467_s0 + $0x141] sm:$0x1]  ;;  %1931 = vmatmul.msk.f32.gmra.mxu2 %vm154_vm8, %v337_v47  ;;  %v133_v52 = vsel %vm101_vm4, %v132_v37, %v131_v48  ;;  %v269_v53 = vld [vmem:[%s3467_s0 + $0x171] sm:$0x1]  ;;  %v339_v54 = vsel %vm92_vm1, %v338_v46, %v262_v39  ;;  %v340_v55 = vrot.slane %v264_v40, 6  ;;  %v346_v60 = vrot.slane %v267_v50, 3 }
  0x19   :  { %v268_v51 = vld [vmem:[%s3467_s0 + $0x161] sm:$0x1]  ;;  %v453_v57 = vld [vmem:[%s3467_s0 + $0x12] sm:$0x1]  ;;  %v135_v58 = vsel %vm104_vm5, %v134_v38, %v133_v52  ;;  %v344_v59 = vrot.slane %v266_v45, 4  ;;  %v350_v8 = vrot.slane %v269_v53, 1 }
  0x1a   :  { %v452_v61 = vld [vmem:[%s3467_s0 + $0x2] sm:$0x1]  ;;  %v137_v63 = vsel %vm107_vm6, %v136_v43, %v135_v58  ;;  %v341_v1 = vsel %vm95_vm2, %v340_v55, %v339_v54  ;;  %v348_v2 = vrot.slane %v268_v51, 2  ;;  %v455_v3 = vld [vmem:[%s3467_s0 + $0x32] sm:$0x1]  ;;  %v516_v5 = vrot.slane %v453_v57, 7 }
  0x1b   :  { %v454_v62 = vld [vmem:[%s3467_s0 + $0x22] sm:$0x1]  ;;  %v139_v6 = vsel %vm110_vm7, %v138_v49, %v137_v63  ;;  %v343_v7 = vsel %vm98_vm3, %v342_v56, %v341_v1  ;;  %v457_v9 = vld [vmem:[%s3467_s0 + $0x52] sm:$0x1]  ;;  %v520_v15 = vrot.slane %v455_v3, 5 }
  0x1c   :  { %v456_v4 = vld [vmem:[%s3467_s0 + $0x42] sm:$0x1]  ;;  %1922 = vmatmul.msk.f32.vlgmr.msra.gmra.mxu1 %vm154_vm8, %v139_v6  ;;  %v345_v11 = vsel %vm101_vm4, %v344_v59, %v343_v7  ;;  %v459_v12 = vld [vmem:[%s3467_s0 + $0x72] sm:$0x1]  ;;  %v517_v13 = vsel %vm92_vm1, %v516_v5, %v452_v61  ;;  %v518_v14 = vrot.slane %v454_v62, 6  ;;  %v524_v19 = vrot.slane %v457_v9, 3 }
  0x1d   :  { %v458_v10 = vld [vmem:[%s3467_s0 + $0x62] sm:$0x1]  ;;  %v49_v16 = vld [vmem:[%s3467_s0 + $0x190] sm:$0x1]  ;;  %v347_v17 = vsel %vm104_vm5, %v346_v60, %v345_v11  ;;  %v522_v18 = vrot.slane %v456_v4, 4  ;;  %v528_v30 = vrot.slane %v459_v12, 1 }
  0x1e   :  { %v48_v20 = vld [vmem:[%s3467_s0 + $0x180] sm:$0x1]  ;;  %v349_v22 = vsel %vm107_vm6, %v348_v2, %v347_v17  ;;  %v519_v23 = vsel %vm95_vm2, %v518_v14, %v517_v13  ;;  %v526_v24 = vrot.slane %v458_v10, 2  ;;  %v51_v25 = vld [vmem:[%s3467_s0 + $0x1b0] sm:$0x1]  ;;  %v140_v27 = vrot.slane %v49_v16, 7 }
  0x1f   :  { %v50_v21 = vld [vmem:[%s3467_s0 + $0x1a0] sm:$0x1]  ;;  %v351_v28 = vsel %vm110_vm7, %v350_v8, %v349_v22  ;;  %v521_v29 = vsel %vm98_vm3, %v520_v15, %v519_v23  ;;  %v53_v31 = vld [vmem:[%s3467_s0 + $0x1d0] sm:$0x1]  ;;  %v144_v37 = vrot.slane %v51_v25, 5 }
  0x20   :  { %v52_v26 = vld [vmem:[%s3467_s0 + $0x1c0] sm:$0x1]  ;;  %1932 = vmatmul.msk.f32.vlgmr.msra.gmra.mxu3 %vm154_vm8, %v351_v28  ;;  %v523_v33 = vsel %vm101_vm4, %v522_v18, %v521_v29  ;;  %v55_v34 = vld [vmem:[%s3467_s0 + $0x1f0] sm:$0x1]  ;;  %v141_v35 = vsel %vm92_vm1, %v140_v27, %v48_v20  ;;  %v142_v36 = vrot.slane %v50_v21, 6  ;;  %v148_v41 = vrot.slane %v53_v31, 3 }
  0x21   :  { %v54_v32 = vld [vmem:[%s3467_s0 + $0x1e0] sm:$0x1]  ;;  %v271_v38 = vld [vmem:[%s3467_s0 + $0x191] sm:$0x1]  ;;  %v525_v39 = vsel %vm104_vm5, %v524_v19, %v523_v33  ;;  %v146_v40 = vrot.slane %v52_v26, 4  ;;  %v152_v52 = vrot.slane %v55_v34, 1 }
  0x22   :  { %v270_v42 = vld [vmem:[%s3467_s0 + $0x181] sm:$0x1]  ;;  %v527_v44 = vsel %vm107_vm6, %v526_v24, %v525_v39  ;;  %v143_v45 = vsel %vm95_vm2, %v142_v36, %v141_v35  ;;  %v150_v46 = vrot.slane %v54_v32, 2  ;;  %v273_v47 = vld [vmem:[%s3467_s0 + $0x1b1] sm:$0x1]  ;;  %v352_v49 = vrot.slane %v271_v38, 7 }
  0x23   :  { %v272_v43 = vld [vmem:[%s3467_s0 + $0x1a1] sm:$0x1]  ;;  %v529_v50 = vsel %vm110_vm7, %v528_v30, %v527_v44  ;;  %v145_v51 = vsel %vm98_vm3, %v144_v37, %v143_v45  ;;  %v275_v53 = vld [vmem:[%s3467_s0 + $0x1d1] sm:$0x1]  ;;  %v356_v59 = vrot.slane %v273_v47, 5 }
  0x24   :  { %v274_v48 = vld [vmem:[%s3467_s0 + $0x1c1] sm:$0x1]  ;;  %1940 = vmatmul.msk.f32.vlgmr.msrb.gmra.mxu0 %vm154_vm8, %v529_v50  ;;  %v147_v55 = vsel %vm101_vm4, %v146_v40, %v145_v51  ;;  %v277_v56 = vld [vmem:[%s3467_s0 + $0x1f1] sm:$0x1]  ;;  %v353_v57 = vsel %vm92_vm1, %v352_v49, %v270_v42  ;;  %v354_v58 = vrot.slane %v272_v43, 6  ;;  %v360_v63 = vrot.slane %v275_v53, 3 }
  0x25   :  { %v276_v54 = vld [vmem:[%s3467_s0 + $0x1e1] sm:$0x1]  ;;  %v461_v60 = vld [vmem:[%s3467_s0 + $0x92] sm:$0x1]  ;;  %v149_v61 = vsel %vm104_vm5, %v148_v41, %v147_v55  ;;  %v358_v62 = vrot.slane %v274_v48, 4  ;;  %1979 = vmatpush.msk.msrb.mxu0 %vm163_vm0, %v2049_v0  ;;  %v364_v11 = vrot.slane %v277_v56, 1 }
  0x26   :  { %v460_v1 = vld [vmem:[%s3467_s0 + $0x82] sm:$0x1]  ;;  %v151_v3 = vsel %vm107_vm6, %v150_v46, %v149_v61  ;;  %v355_v4 = vsel %vm95_vm2, %v354_v58, %v353_v57  ;;  %v362_v5 = vrot.slane %v276_v54, 2  ;;  %v463_v6 = vld [vmem:[%s3467_s0 + $0xb2] sm:$0x1]  ;;  %v530_v8 = vrot.slane %v461_v60, 7 }
  0x27   :  { %v462_v2 = vld [vmem:[%s3467_s0 + $0xa2] sm:$0x1]  ;;  %v153_v9 = vsel %vm110_vm7, %v152_v52, %v151_v3  ;;  %v357_v10 = vsel %vm98_vm3, %v356_v59, %v355_v4  ;;  %v465_v12 = vld [vmem:[%s3467_s0 + $0xd2] sm:$0x1]  ;;  %v534_v18 = vrot.slane %v463_v6, 5 }
  0x28   :  { %v464_v7 = vld [vmem:[%s3467_s0 + $0xc2] sm:$0x1]  ;;  %1923 = vmatmul.msk.f32.gmra.mxu1 %vm154_vm8, %v153_v9  ;;  %v359_v14 = vsel %vm101_vm4, %v358_v62, %v357_v10  ;;  %v467_v15 = vld [vmem:[%s3467_s0 + $0xf2] sm:$0x1]  ;;  %v531_v16 = vsel %vm92_vm1, %v530_v8, %v460_v1  ;;  %v532_v17 = vrot.slane %v462_v2, 6  ;;  %v538_v22 = vrot.slane %v465_v12, 3 }
  0x29   :  { %v466_v13 = vld [vmem:[%s3467_s0 + $0xe2] sm:$0x1]  ;;  %v469_v19 = vld [vmem:[%s3467_s0 + $0x112] sm:$0x1]  ;;  %v361_v20 = vsel %vm104_vm5, %v360_v63, %v359_v14  ;;  %v536_v21 = vrot.slane %v464_v7, 4  ;;  %v542_v33 = vrot.slane %v467_v15, 1 }
  0x2a   :  { %v468_v23 = vld [vmem:[%s3467_s0 + $0x102] sm:$0x1]  ;;  %v363_v25 = vsel %vm107_vm6, %v362_v5, %v361_v20  ;;  %v533_v26 = vsel %vm95_vm2, %v532_v17, %v531_v16  ;;  %v540_v27 = vrot.slane %v466_v13, 2  ;;  %v471_v28 = vld [vmem:[%s3467_s0 + $0x132] sm:$0x1]  ;;  %v544_v30 = vrot.slane %v469_v19, 7 }
  0x2b   :  { %v470_v24 = vld [vmem:[%s3467_s0 + $0x122] sm:$0x1]  ;;  %v365_v31 = vsel %vm110_vm7, %v364_v11, %v363_v25  ;;  %v535_v32 = vsel %vm98_vm3, %v534_v18, %v533_v26  ;;  %v473_v34 = vld [vmem:[%s3467_s0 + $0x152] sm:$0x1]  ;;  %v548_v40 = vrot.slane %v471_v28, 5 }
  0x2c   :  { %v472_v29 = vld [vmem:[%s3467_s0 + $0x142] sm:$0x1]  ;;  %1933 = vmatmul.msk.f32.gmra.mxu3 %vm154_vm8, %v365_v31  ;;  %v537_v36 = vsel %vm101_vm4, %v536_v21, %v535_v32  ;;  %v475_v37 = vld [vmem:[%s3467_s0 + $0x172] sm:$0x1]  ;;  %v545_v38 = vsel %vm92_vm1, %v544_v30, %v468_v23  ;;  %v546_v39 = vrot.slane %v470_v24, 6  ;;  %v552_v44 = vrot.slane %v473_v34, 3 }
  0x2d   :  { %v474_v35 = vld [vmem:[%s3467_s0 + $0x162] sm:$0x1]  ;;  %v477_v41 = vld [vmem:[%s3467_s0 + $0x192] sm:$0x1]  ;;  %v539_v42 = vsel %vm104_vm5, %v538_v22, %v537_v36  ;;  %v550_v43 = vrot.slane %v472_v29, 4  ;;  %v556_v62 = vrot.slane %v475_v37, 1 }
  0x2e   :  { %v476_v45 = vld [vmem:[%s3467_s0 + $0x182] sm:$0x1]  ;;  %v541_v47 = vsel %vm107_vm6, %v540_v27, %v539_v42  ;;  %v547_v48 = vsel %vm95_vm2, %v546_v39, %v545_v38  ;;  %v554_v49 = vrot.slane %v474_v35, 2  ;;  %v479_v50 = vld [vmem:[%s3467_s0 + $0x1b2] sm:$0x1]  ;;  %v558_v52 = vrot.slane %v477_v41, 7 }
  0x2f   :  { %v478_v46 = vld [vmem:[%s3467_s0 + $0x1a2] sm:$0x1]  ;;  %v543_v53 = vsel %vm110_vm7, %v542_v33, %v541_v47  ;;  %v549_v54 = vsel %vm98_vm3, %v548_v40, %v547_v48  ;;  %v481_v55 = vld [vmem:[%s3467_s0 + $0x1d2] sm:$0x1]  ;;  %v562_v59 = vrot.slane %v479_v50, 5 }
  0x30   :  { %v480_v51 = vld [vmem:[%s3467_s0 + $0x1c2] sm:$0x1]  ;;  %1941 = vmatmul.msk.f32.gmra.mxu0 %vm154_vm8, %v543_v53  ;;  %v551_v56 = vsel %vm101_vm4, %v550_v43, %v549_v54  ;;  %v559_v57 = vsel %vm92_vm1, %v558_v52, %v476_v45  ;;  %v560_v58 = vrot.slane %v478_v46, 6  ;;  %v2435_v60 = vld [vmem:[%s3468_s3 + $0x8] sm:$0x3]  ;;  %v566_v6 = vrot.slane %v481_v55, 3 }
  0x31   :  { %v553_v61 = vsel %vm104_vm5, %v552_v44, %v551_v56  ;;  %v564_v63 = vrot.slane %v480_v51, 4  ;;  %v2443_v3 = vld [vmem:[%s3468_s3] sm:$0xff]  ;;  %1924 = vmatpush.msk.msrb.mxu1 %vm213_vm9, %v2435_v60  ;;  %1934 = vmatpush.msk.msrb.mxu3 %vm213_vm9, %v2435_v60  ;;  %v483_v9 = vld [vmem:[%s3467_s0 + $0x1f2] sm:$0x1]  ;;  %v659_v22 = vld [vmem:[%s3467_s0 + $0x13] sm:$0x1] }
  0x32   :  { %v555_v1 = vsel %vm107_vm6, %v554_v49, %v553_v61  ;;  %v561_v2 = vsel %vm95_vm2, %v560_v58, %v559_v57  ;;  %v482_v4 = vld [vmem:[%s3467_s0 + $0x1e2] sm:$0x1]  ;;  %1944 = vmatpush.msk.msrb.mxu2 %vm213_vm9, %v2435_v60  ;;  %v570_v12 = vrot.slane %v483_v9, 1  ;;  %v2479_v15 = vld [vmem:[%s3469_s2] ss:$0 sm:$0xff]  ;;  %v722_v32 = vrot.slane %v659_v22, 7 }
  0x33   :  { %v563_v5 = vsel %vm98_vm3, %v562_v59, %v561_v2  ;;  %v557_v8 = vsel %vm110_vm7, %v556_v62, %v555_v1  ;;  %232 = vmatpush.msrb.mxu1 %v2443_v3  ;;  %434 = vmatpush.msrb.mxu3 %v2443_v3  ;;  %v568_v10 = vrot.slane %v482_v4, 2  ;;  %v865_v23 = vld [vmem:[%s3467_s0 + $0x14] sm:$0x1]  ;;  %v864_v26 = vld [vmem:[%s3467_s0 + $0x4] sm:$0x1] }
  0x34   :  { %v565_v7 = vsel %vm101_vm4, %v564_v63, %v563_v5  ;;  %640 = vmatpush.msrb.mxu2 %v2443_v3  ;;  %v660_v27 = vld [vmem:[%s3467_s0 + $0x23] sm:$0x1]  ;;  %v866_v28 = vld [vmem:[%s3467_s0 + $0x24] sm:$0x1]  ;;  %v928_v29 = vrot.slane %v865_v23, 7 }
  0x35   :  { %1949 = vmatpush.msk.msra.mxu1 %vm163_vm0, %v2049_v0  ;;  %v567_v11 = vsel %vm104_vm5, %v566_v6, %v565_v7  ;;  %1954 = vmatpush.msk.msra.mxu3 %vm213_vm9, %v2435_v60  ;;  %v658_v31 = vld [vmem:[%s3467_s0 + $0x3] sm:$0x1]  ;;  %v867_v33 = vld [vmem:[%s3467_s0 + $0x34] sm:$0x1]  ;;  %v868_v34 = vld [vmem:[%s3467_s0 + $0x44] sm:$0x1] }
  0x36   :  { %1964 = vmatpush.msk.msra.mxu2 %vm213_vm9, %v2435_v60  ;;  %v569_v13 = vsel %vm107_vm6, %v568_v10, %v567_v11  ;;  %v869_v35 = vld [vmem:[%s3467_s0 + $0x54] sm:$0x1]  ;;  %v929_v36 = vsel %vm92_vm1, %v928_v29, %v864_v26  ;;  %v930_v37 = vrot.slane %v866_v28, 6  ;;  %v870_v38 = vld [vmem:[%s3467_s0 + $0x64] sm:$0x1]  ;;  %v932_v40 = vrot.slane %v867_v33, 5 }
  0x37   :  { %846 = vmatpush.msra.mxu3 %v2443_v3  ;;  %v571_v14 = vsel %vm110_vm7, %v570_v12, %v569_v13  ;;  %v871_v39 = vld [vmem:[%s3467_s0 + $0x74] sm:$0x1]  ;;  %v934_v41 = vrot.slane %v868_v34, 4  ;;  %v661_v43 = vld [vmem:[%s3467_s0 + $0x33] sm:$0x1]  ;;  %v724_v44 = vrot.slane %v660_v27, 6  ;;  %v723_v49 = vsel %vm92_vm1, %v722_v32, %v658_v31 }
  0x38   :  { %1942 = vmatmul.msk.f32.gmra.mxu0 %vm154_vm8, %v557_v8  ;;  %1052 = vmatpush.msra.mxu2 %v2443_v3  ;;  %v931_v45 = vsel %vm95_vm2, %v930_v37, %v929_v36  ;;  %v936_v46 = vrot.slane %v869_v35, 3  ;;  %v938_v47 = vrot.slane %v870_v38, 2  ;;  %v940_v51 = vrot.slane %v871_v39, 1  ;;  %v667_v54 = vld [vmem:[%s3467_s0 + $0x93] sm:$0x1] }
  0x39   :  { %v933_v50 = vsel %vm98_vm3, %v932_v40, %v931_v45  ;;  %v662_v57 = vld [vmem:[%s3467_s0 + $0x43] sm:$0x1]  ;;  %v726_v58 = vrot.slane %v661_v43, 5  ;;  %v873_v61 = vld [vmem:[%s3467_s0 + $0x94] sm:$0x1]  ;;  %v725_v62 = vsel %vm95_vm2, %v724_v44, %v723_v49  ;;  %v736_v8 = vrot.slane %v667_v54, 7 }
  0x3a   :  { %v935_v53 = vsel %vm101_vm4, %v934_v41, %v933_v50  ;;  %v666_v1 = vld [vmem:[%s3467_s0 + $0x83] sm:$0x1]  ;;  %v874_v4 = vld [vmem:[%s3467_s0 + $0xa4] sm:$0x1]  ;;  %v663_v6 = vld [vmem:[%s3467_s0 + $0x53] sm:$0x1] }
  0x3b   :  { %v937_v59 = vsel %vm104_vm5, %v936_v46, %v935_v53  ;;  %v668_v2 = vld [vmem:[%s3467_s0 + $0xa3] sm:$0x1]  ;;  %v872_v9 = vld [vmem:[%s3467_s0 + $0x84] sm:$0x1]  ;;  %v875_v10 = vld [vmem:[%s3467_s0 + $0xb4] sm:$0x1]  ;;  %v737_v29 = vsel %vm92_vm1, %v736_v8, %v666_v1 }
  0x3c   :  { %v939_v63 = vsel %vm107_vm6, %v938_v47, %v937_v59  ;;  %v728_v11 = vrot.slane %v662_v57, 4  ;;  %v876_v12 = vld [vmem:[%s3467_s0 + $0xc4] sm:$0x1]  ;;  %v877_v13 = vld [vmem:[%s3467_s0 + $0xd4] sm:$0x1]  ;;  %v738_v23 = vrot.slane %v668_v2, 6 }
  0x3d   :  { %v941_v7 = vsel %vm110_vm7, %v940_v51, %v939_v63  ;;  %v669_v22 = vld [vmem:[%s3467_s0 + $0xb3] sm:$0x1]  ;;  %v950_v26 = vrot.slane %v877_v13, 3  ;;  %v664_v28 = vld [vmem:[%s3467_s0 + $0x63] sm:$0x1]  ;;  %v730_v36 = vrot.slane %v663_v6, 3 }
  0x3e   :  { %v675_v32 = vld [vmem:[%s3467_s0 + $0x113] sm:$0x1]  ;;  %v670_v37 = vld [vmem:[%s3467_s0 + $0xc3] sm:$0x1]  ;;  %v740_v43 = vrot.slane %v669_v22, 5  ;;  %v732_v47 = vrot.slane %v664_v28, 2  ;;  %v739_v49 = vsel %vm95_vm2, %v738_v23, %v737_v29 }
  0x3f   :  { %v2600_v34 = vld [vmem:[%s3467_s0 + $0x73] sm:$0x1]  ;;  %v676_v45 = vld [vmem:[%s3467_s0 + $0x123] sm:$0x1]  ;;  %v881_v53 = vld [vmem:[%s3467_s0 + $0x114] sm:$0x1] }
  0x40   :  { %1943 = vmatmul.msk.f32.gmra.mxu0 %vm154_vm8, %v571_v14  ;;  %v942_v14 = vrot.slane %v873_v61, 7  ;;  %v674_v51 = vld [vmem:[%s3467_s0 + $0x103] sm:$0x1]  ;;  %v883_v59 = vld [vmem:[%s3467_s0 + $0x134] sm:$0x1]  ;;  %v752_v8 = vrot.slane %v676_v45, 6 }
  0x41   :  { %v677_v2 = vld [vmem:[%s3467_s0 + $0x133] sm:$0x1]  ;;  %v956_v13 = vrot.slane %v881_v53, 7 }
  0x42   :  { %v2655_v6 = vld [vmem:[%s3467_s0 + $0xf3] sm:$0x1]  ;;  %v754_v22 = vrot.slane %v677_v2, 5 }
  0x48   :  { %1960 = vmatmul.msk.f32.vlgmr.msra.gmra.mxu0 %vm154_vm8, %v941_v7  ;;  %v741_v7 = vsel %vm98_vm3, %v740_v43, %v739_v49  ;;  %v889_v43 = vld [vmem:[%s3467_s0 + $0x194] sm:$0x1]  ;;  %v686_v49 = vld [vmem:[%s3467_s0 + $0x1c3] sm:$0x1] }
  0x49   :  { %1999 = vmatpush.msk.msra.mxu0 %vm163_vm0, %v2049_v0 }
  0x89   :  { %v184_v16 = vpop.f32.mrf.mxu0 }
  0x8a   :  { %v185_v17 = vadd.f32 %v2479_v15, %v184_v16  ;;  %v727_v16 = vsel %vm98_vm3, %v726_v58, %v725_v62  ;;  %v882_v58 = vld [vmem:[%s3467_s0 + $0x124] sm:$0x1]  ;;  %v742_v62 = vrot.slane %v670_v37, 4  ;;  %v685_v37 = vld [vmem:[%s3467_s0 + $0x1b3] sm:$0x1] }
  0x8b   :  { %v729_v35 = vsel %vm101_vm4, %v728_v11, %v727_v16  ;;  %v960_v16 = vrot.slane %v883_v59, 5  ;;  %v893_v59 = vld [vmem:[%s3467_s0 + $0x1d4] sm:$0x1] }
  0x8c   :  { %v196_v18 = vmax.f32 %v185_v17, 0.0  ;;  %v878_v17 = vld [vmem:[%s3467_s0 + $0xe4] sm:$0x1]  ;;  %v731_v61 = vsel %vm104_vm5, %v730_v36, %v729_v35 }
  0x8d   :  { %v952_v31 = vrot.slane %v878_v17, 2  ;;  %v733_v17 = vsel %vm107_vm6, %v732_v47, %v731_v61 }
  0x8e   :  { %1925 = vmatmul.msk.f32.vlgmr.msrb.gmra.mxu1 %vm200_vm10, %v196_v18  ;;  %v879_v18 = vld [vmem:[%s3467_s0 + $0xf4] sm:$0x1] }
  0x8f   :  { %1969 = vmatpush.msk.msrb.mxu1 %vm163_vm0, %v2049_v0  ;;  %v954_v39 = vrot.slane %v879_v18, 1 }
  0x91   :  { %v187_v19 = vpop.f32.mrf.mxu0 }
  0x92   :  { %v188_v20 = vadd.f32 %v2479_v15, %v187_v19  ;;  %v944_v19 = vrot.slane %v874_v4, 6  ;;  %v884_v4 = vld [vmem:[%s3467_s0 + $0x144] sm:$0x1] }
  0x93   :  { %v391_v21 = vpop.f32.mrf.mxu2 }
  0x94   :  { %v392_v24 = vadd.f32 %v2479_v15, %v391_v21  ;;  %v197_v25 = vmax.f32 %v188_v20, 0.0  ;;  %v946_v20 = vrot.slane %v875_v10, 5  ;;  %v2668_v10 = vld [vmem:[%s3467_s0 + $0x143] sm:$0x1] }
  0x96   :  { %v403_v30 = vmax.f32 %v392_v24, 0.0  ;;  %1926 = vmatmul.msk.f32.gmra.mxu1 %vm200_vm10, %v197_v25  ;;  %v943_v24 = vsel %vm92_vm1, %v942_v14, %v872_v9  ;;  %v948_v25 = vrot.slane %v876_v12, 4  ;;  %v880_v9 = vld [vmem:[%s3467_s0 + $0x104] sm:$0x1]  ;;  %v958_v14 = vrot.slane %v882_v58, 6 }
  0x97   :  { %v886_v12 = vld [vmem:[%s3467_s0 + $0x164] sm:$0x1]  ;;  %v957_v23 = vsel %vm92_vm1, %v956_v13, %v880_v9  ;;  %v978_v13 = vrot.slane %v893_v59, 3 }
  0x98   :  { %1935 = vmatmul.msk.f32.vlgmr.msrb.gmra.mxu3 %vm200_vm10, %v403_v30  ;;  %v945_v30 = vsel %vm95_vm2, %v944_v19, %v943_v24  ;;  %v887_v19 = vld [vmem:[%s3467_s0 + $0x174] sm:$0x1]  ;;  %v959_v28 = vsel %vm95_vm2, %v958_v14, %v957_v23  ;;  %v966_v29 = vrot.slane %v886_v12, 2  ;;  %v888_v58 = vld [vmem:[%s3467_s0 + $0x184] sm:$0x1] }
  0x99   :  { %v190_v42 = vpop.f32.mrf.mxu1  ;;  %1974 = vmatpush.msk.msrb.mxu3 %vm213_vm9, %v2435_v60  ;;  %v947_v38 = vsel %vm98_vm3, %v946_v20, %v945_v30  ;;  %v962_v20 = vrot.slane %v884_v4, 4  ;;  %v682_v30 = vld [vmem:[%s3467_s0 + $0x183] sm:$0x1]  ;;  %v961_v35 = vsel %vm98_vm3, %v960_v16, %v959_v28  ;;  %v968_v36 = vrot.slane %v887_v19, 1  ;;  %v1071_v14 = vld [vmem:[%s3467_s0 + $0x15] sm:$0x1] }
  0x9a   :  { %v191_v48 = vadd.f32 %v2479_v15, %v190_v42  ;;  %v2611_v42 = vld [vmem:[%s3467_s0 + $0xd3] sm:$0x1]  ;;  %v949_v44 = vsel %vm101_vm4, %v948_v25, %v947_v38 }
  0x9b   :  { %v394_v52 = vpop.f32.mrf.mxu2  ;;  %1258 = vmatpush.msrb.mxu3 %v2443_v3  ;;  %v951_v50 = vsel %vm104_vm5, %v950_v26, %v949_v44  ;;  %v744_v63 = vrot.slane %v2611_v42, 3  ;;  %v743_v26 = vsel %vm101_vm4, %v742_v62, %v741_v7  ;;  %v890_v44 = vld [vmem:[%s3467_s0 + $0x1a4] sm:$0x1]  ;;  %v768_v62 = vrot.slane %v685_v37, 5  ;;  %v895_v7 = vld [vmem:[%s3467_s0 + $0x1f4] sm:$0x1] }
  0x9c   :  { %v395_v55 = vadd.f32 %v2479_v15, %v394_v52  ;;  %v198_v56 = vmax.f32 %v191_v48, 0.0  ;;  %v2620_v48 = vld [vmem:[%s3467_s0 + $0xe3] sm:$0x1]  ;;  %v750_v52 = vrot.slane %v675_v32, 7  ;;  %v953_v57 = vsel %vm107_vm6, %v952_v31, %v951_v50  ;;  %v1276_v37 = vld [vmem:[%s3467_s0 + $0x6] sm:$0x1] }
  0x9d   :  { %v955_v1 = vsel %vm110_vm7, %v954_v39, %v953_v57  ;;  %v746_v18 = vrot.slane %v2620_v48, 2  ;;  %v2709_v39 = vld [vmem:[%s3467_s0 + $0x163] sm:$0x1]  ;;  %v972_v2 = vrot.slane %v890_v44, 6 }
  0x9e   :  { %v404_v5 = vmax.f32 %v395_v55, 0.0  ;;  %1927 = vmatmul.msk.f32.gmra.mxu1 %vm200_vm10, %v198_v56  ;;  %v734_v56 = vrot.slane %v2600_v34, 1  ;;  %1961 = vmatmul.msk.f32.gmra.mxu0 %vm154_vm8, %v955_v1  ;;  %v751_v11 = vsel %vm92_vm1, %v750_v52, %v674_v51  ;;  %v2699_v34 = vld [vmem:[%s3467_s0 + $0x153] sm:$0x1]  ;;  %v891_v51 = vld [vmem:[%s3467_s0 + $0x1b4] sm:$0x1] }
  0x9f   :  { %v892_v52 = vld [vmem:[%s3467_s0 + $0x1c4] sm:$0x1]  ;;  %v970_v1 = vrot.slane %v889_v43, 7  ;;  %v1281_v43 = vld [vmem:[%s3467_s0 + $0x56] sm:$0x1] }
  0xa0   :  { %1936 = vmatmul.msk.f32.gmra.mxu3 %vm200_vm10, %v404_v5  ;;  %v735_v32 = vsel %vm110_vm7, %v734_v56, %v733_v17  ;;  %v758_v56 = vrot.slane %v2699_v34, 3  ;;  %v976_v9 = vrot.slane %v892_v52, 4  ;;  %v770_v17 = vrot.slane %v686_v49, 4  ;;  %v1074_v49 = vld [vmem:[%s3467_s0 + $0x45] sm:$0x1] }
  0xa1   :  { %v597_v21 = vpop.f32.mrf.mxu0  ;;  %v971_v12 = vsel %vm92_vm1, %v970_v1, %v888_v58  ;;  %v1348_v59 = vrot.slane %v1281_v43, 3 }
  0xa2   :  { %v598_v27 = vadd.f32 %v2479_v15, %v597_v21  ;;  %v683_v21 = vld [vmem:[%s3467_s0 + $0x193] sm:$0x1] }
  0xa3   :  { %v397_v33 = vpop.f32.mrf.mxu3  ;;  %v764_v25 = vrot.slane %v683_v21, 7 }
  0xa4   :  { %v609_v40 = vmax.f32 %v598_v27, 0.0  ;;  %v398_v41 = vadd.f32 %v2479_v15, %v397_v33  ;;  %v753_v27 = vsel %vm95_vm2, %v752_v8, %v751_v11  ;;  %v748_v33 = vrot.slane %v2655_v6, 1  ;;  %v687_v11 = vld [vmem:[%s3467_s0 + $0x1d3] sm:$0x1]  ;;  %v1279_v6 = vld [vmem:[%s3467_s0 + $0x36] sm:$0x1] }
  0xa5   :  { %v193_v46 = vpop.f32.mrf.mxu1  ;;  %v755_v47 = vsel %vm98_vm3, %v754_v22, %v753_v27  ;;  %v765_v50 = vsel %vm92_vm1, %v764_v25, %v682_v30  ;;  %v974_v8 = vrot.slane %v891_v51, 5  ;;  %v2775_v22 = vld [vmem:[%s3467_s0 + $0x1e3] sm:$0x1]  ;;  %v772_v27 = vrot.slane %v687_v11, 3  ;;  %v1283_v51 = vld [vmem:[%s3467_s0 + $0x76] sm:$0x1] }
  0xa6   :  { %1945 = vmatmul.msk.f32.vlgmr.msrb.gmra.mxu2 %vm200_vm10, %v609_v40  ;;  %v405_v54 = vmax.f32 %v398_v41, 0.0  ;;  %v194_v55 = vadd.f32 %v2479_v15, %v193_v46  ;;  %v756_v40 = vrot.slane %v2668_v10, 4  ;;  %v963_v41 = vsel %vm101_vm4, %v962_v20, %v961_v35 }
  0xa7   :  { %1984 = vmatpush.msk.msrb.mxu2 %vm213_vm9, %v2435_v60  ;;  %v885_v60 = vld [vmem:[%s3467_s0 + $0x154] sm:$0x1]  ;;  %v745_v46 = vsel %vm104_vm5, %v744_v63, %v743_v26  ;;  %v894_v63 = vld [vmem:[%s3467_s0 + $0x1e4] sm:$0x1]  ;;  %v760_v10 = vrot.slane %v2709_v39, 2  ;;  %v1134_v30 = vrot.slane %v1071_v14, 7 }
  0xa8   :  { %v199_v5 = vmax.f32 %v194_v55, 0.0  ;;  %1937 = vmatmul.msk.f32.gmra.mxu3 %vm200_vm10, %v405_v54  ;;  %v964_v24 = vrot.slane %v885_v60, 3  ;;  %v2736_v55 = vld [vmem:[%s3467_s0 + $0x173] sm:$0x1]  ;;  %v747_v60 = vsel %vm107_vm6, %v746_v18, %v745_v46  ;;  %v757_v16 = vsel %vm101_vm4, %v756_v40, %v755_v47  ;;  %v1282_v46 = vld [vmem:[%s3467_s0 + $0x66] sm:$0x1] }
  0xa9   :  { %1464 = vmatpush.msrb.mxu2 %v2443_v3  ;;  %v684_v3 = vld [vmem:[%s3467_s0 + $0x1a3] sm:$0x1]  ;;  %v973_v18 = vsel %vm95_vm2, %v972_v2, %v971_v12  ;;  %v980_v19 = vrot.slane %v894_v63, 2  ;;  %v762_v21 = vrot.slane %v2736_v55, 1  ;;  %v2786_v26 = vld [vmem:[%s3467_s0 + $0x1f3] sm:$0x1]  ;;  %v759_v34 = vsel %vm104_vm5, %v758_v56, %v757_v16 }
  0xaa   :  { %1928 = vmatmul.msk.f32.gmra.mxu1 %vm200_vm10, %v199_v5  ;;  %v766_v42 = vrot.slane %v684_v3, 6  ;;  %v965_v48 = vsel %vm104_vm5, %v964_v24, %v963_v41  ;;  %v982_v24 = vrot.slane %v895_v7, 1  ;;  %v1070_v3 = vld [vmem:[%s3467_s0 + $0x5] sm:$0x1]  ;;  %v774_v40 = vrot.slane %v2775_v22, 2 }
  0xab   :  { %v967_v57 = vsel %vm107_vm6, %v966_v29, %v965_v48  ;;  %v1072_v29 = vld [vmem:[%s3467_s0 + $0x25] sm:$0x1]  ;;  %v1344_v52 = vrot.slane %v1279_v6, 5  ;;  %v776_v56 = vrot.slane %v2786_v26, 1  ;;  %v1350_v2 = vrot.slane %v1282_v46, 2 }
  0xac   :  { %v969_v61 = vsel %vm110_vm7, %v968_v36, %v967_v57  ;;  %v767_v5 = vsel %vm95_vm2, %v766_v42, %v765_v50  ;;  %v1073_v36 = vld [vmem:[%s3467_s0 + $0x35] sm:$0x1]  ;;  %v1280_v42 = vld [vmem:[%s3467_s0 + $0x46] sm:$0x1]  ;;  %v1135_v50 = vsel %vm92_vm1, %v1134_v30, %v1070_v3  ;;  %v1078_v14 = vld [vmem:[%s3467_s0 + $0x85] sm:$0x1] }
  0xad   :  { %v600_v31 = vpop.f32.mrf.mxu0  ;;  %1962 = vmatmul.msk.f32.gmra.mxu0 %vm154_vm8, %v969_v61  ;;  %v769_v23 = vsel %vm98_vm3, %v768_v62, %v767_v5  ;;  %v2840_v57 = vld [vmem:[%s3467_s0 + $0x55] sm:$0x1]  ;;  %v1138_v63 = vrot.slane %v1073_v36, 5  ;;  %v2851_v5 = vld [vmem:[%s3467_s0 + $0x65] sm:$0x1] }
  0xae   :  { %v601_v38 = vadd.f32 %v2479_v15, %v600_v31  ;;  %v1277_v31 = vld [vmem:[%s3467_s0 + $0x16] sm:$0x1]  ;;  %v771_v39 = vsel %vm101_vm4, %v770_v17, %v769_v23  ;;  %v1079_v61 = vld [vmem:[%s3467_s0 + $0x95] sm:$0x1]  ;;  %v1142_v12 = vrot.slane %v2840_v57, 3  ;;  %v1144_v3 = vrot.slane %v2851_v5, 2 }
  0xaf   :  { %v400_v45 = vpop.f32.mrf.mxu3  ;;  %v1340_v47 = vrot.slane %v1277_v31, 7  ;;  %v773_v62 = vsel %vm104_vm5, %v772_v27, %v771_v39  ;;  %v2856_v7 = vld [vmem:[%s3467_s0 + $0x75] sm:$0x1]  ;;  %v1080_v16 = vld [vmem:[%s3467_s0 + $0xa5] sm:$0x1]  ;;  %v1148_v17 = vrot.slane %v1079_v61, 7 }
  0xb0   :  { %v610_v53 = vmax.f32 %v601_v38, 0.0  ;;  %v401_v54 = vadd.f32 %v2479_v15, %v400_v45  ;;  %v1278_v38 = vld [vmem:[%s3467_s0 + $0x26] sm:$0x1]  ;;  %v1136_v45 = vrot.slane %v1072_v29, 6  ;;  %v2882_v22 = vld [vmem:[%s3467_s0 + $0xc5] sm:$0x1]  ;;  %v775_v30 = vsel %vm107_vm6, %v774_v40, %v773_v62 }
  0xb1   :  { %v1342_v48 = vrot.slane %v1278_v38, 6  ;;  %v1341_v58 = vsel %vm92_vm1, %v1340_v47, %v1276_v37  ;;  %v1284_v23 = vld [vmem:[%s3467_s0 + $0x86] sm:$0x1]  ;;  %v2899_v27 = vld [vmem:[%s3467_s0 + $0xd5] sm:$0x1]  ;;  %v1146_v37 = vrot.slane %v2856_v7, 1  ;;  %v777_v62 = vsel %vm110_vm7, %v776_v56, %v775_v30 }
  0xb2   :  { %1946 = vmatmul.msk.f32.gmra.mxu2 %vm200_vm10, %v610_v53  ;;  %v406_v4 = vmax.f32 %v401_v54, 0.0  ;;  %1950 = vmatmul.msk.f32.vlgmr.msra.gmra.mxu1 %vm154_vm8, %v735_v32  ;;  %v749_v32 = vsel %vm110_vm7, %v748_v33, %v747_v60  ;;  %v1346_v53 = vrot.slane %v1280_v42, 4  ;;  %v761_v54 = vsel %vm107_vm6, %v760_v10, %v759_v34  ;;  %v1286_v55 = vld [vmem:[%s3467_s0 + $0xa6] sm:$0x1]  ;;  %v1289_v29 = vld [vmem:[%s3467_s0 + $0xd6] sm:$0x1] }
  0xb3   :  { %1989 = vmatpush.msk.msra.mxu1 %vm163_vm0, %v2049_v0  ;;  %v975_v0 = vsel %vm98_vm3, %v974_v8, %v973_v18  ;;  %v1343_v1 = vsel %vm95_vm2, %v1342_v48, %v1341_v58  ;;  %v1137_v8 = vsel %vm95_vm2, %v1136_v45, %v1135_v50  ;;  %v1352_v10 = vrot.slane %v1283_v51, 1  ;;  %v1285_v18 = vld [vmem:[%s3467_s0 + $0x96] sm:$0x1]  ;;  %v1290_v34 = vld [vmem:[%s3467_s0 + $0xe6] sm:$0x1] }
  0xb4   :  { %1938 = vmatmul.msk.f32.gmra.mxu3 %vm200_vm10, %v406_v4  ;;  %v977_v28 = vsel %vm101_vm4, %v976_v9, %v975_v0  ;;  %v1140_v9 = vrot.slane %v1074_v49, 4  ;;  %v1345_v60 = vsel %vm98_vm3, %v1344_v52, %v1343_v1  ;;  %v1356_v36 = vrot.slane %v1286_v55, 6  ;;  %v1291_v6 = vld [vmem:[%s3467_s0 + $0xf6] sm:$0x1]  ;;  %v1087_v45 = vld [vmem:[%s3467_s0 + $0x115] sm:$0x1] }
  0xb5   :  { %v603_v20 = vpop.f32.mrf.mxu0  ;;  %v979_v35 = vsel %vm104_vm5, %v978_v13, %v977_v28  ;;  %v1347_v13 = vsel %vm101_vm4, %v1346_v53, %v1345_v60  ;;  %v1288_v28 = vld [vmem:[%s3467_s0 + $0xc6] sm:$0x1]  ;;  %v1150_v38 = vrot.slane %v1080_v16, 6  ;;  %v1149_v42 = vsel %vm92_vm1, %v1148_v17, %v1078_v14  ;;  %v1086_v1 = vld [vmem:[%s3467_s0 + $0x105] sm:$0x1] }
  0xb6   :  { %v604_v25 = vadd.f32 %v2479_v15, %v603_v20  ;;  %v981_v41 = vsel %vm107_vm6, %v980_v19, %v979_v35  ;;  %v1349_v19 = vsel %vm104_vm5, %v1348_v59, %v1347_v13  ;;  %v1081_v20 = vld [vmem:[%s3467_s0 + $0xb5] sm:$0x1]  ;;  %v1354_v35 = vrot.slane %v1285_v18, 7  ;;  %v1088_v59 = vld [vmem:[%s3467_s0 + $0x125] sm:$0x1] }
  0xb7   :  { %v983_v44 = vsel %vm110_vm7, %v982_v24, %v981_v41  ;;  %v1139_v24 = vsel %vm98_vm3, %v1138_v63, %v1137_v8  ;;  %v1360_v39 = vrot.slane %v1288_v28, 4  ;;  %v2928_v41 = vld [vmem:[%s3467_s0 + $0xf5] sm:$0x1]  ;;  %v1152_v46 = vrot.slane %v1081_v20, 5  ;;  %v1294_v26 = vld [vmem:[%s3467_s0 + $0x126] sm:$0x1] }
  0xb8   :  { %v611_v33 = vmax.f32 %v604_v25, 0.0  ;;  %1963 = vmatmul.msk.f32.gmra.mxu0 %vm154_vm8, %v983_v44  ;;  %v1351_v25 = vsel %vm107_vm6, %v1350_v2, %v1349_v19  ;;  %v1141_v40 = vsel %vm101_vm4, %v1140_v9, %v1139_v24  ;;  %v1355_v43 = vsel %vm92_vm1, %v1354_v35, %v1284_v23  ;;  %v1292_v2 = vld [vmem:[%s3467_s0 + $0x106] sm:$0x1]  ;;  %v1089_v8 = vld [vmem:[%s3467_s0 + $0x135] sm:$0x1] }
  0xb9   :  { %v1353_v31 = vsel %vm110_vm7, %v1352_v10, %v1351_v25  ;;  %v1362_v44 = vrot.slane %v1289_v29, 3  ;;  %v1154_v47 = vrot.slane %v2882_v22, 4  ;;  %v1357_v48 = vsel %vm95_vm2, %v1356_v36, %v1355_v43  ;;  %v1295_v9 = vld [vmem:[%s3467_s0 + $0x136] sm:$0x1]  ;;  %v1296_v60 = vld [vmem:[%s3467_s0 + $0x146] sm:$0x1] }
  0xba   :  { %1947 = vmatmul.msk.f32.gmra.mxu2 %vm200_vm10, %v611_v33  ;;  %1951 = vmatmul.msk.f32.gmra.mxu1 %vm154_vm8, %v749_v32  ;;  %v2912_v32 = vld [vmem:[%s3467_s0 + $0xe5] sm:$0x1]  ;;  %v1364_v49 = vrot.slane %v1290_v34, 2  ;;  %v1156_v50 = vrot.slane %v2899_v27, 3  ;;  %v1366_v53 = vrot.slane %v1291_v6, 1  ;;  %v1160_v57 = vrot.slane %v2928_v41, 1 }
  0xbb   :  { %v1158_v51 = vrot.slane %v2912_v32, 2  ;;  %v1162_v61 = vrot.slane %v1087_v45, 7  ;;  %v1143_v56 = vsel %vm104_vm5, %v1142_v12, %v1141_v40  ;;  %v1297_v10 = vld [vmem:[%s3467_s0 + $0x156] sm:$0x1]  ;;  %v2981_v13 = vld [vmem:[%s3467_s0 + $0x145] sm:$0x1] }
  0xbc   :  { %v1298_v14 = vld [vmem:[%s3467_s0 + $0x166] sm:$0x1]  ;;  %v1370_v17 = vrot.slane %v1294_v26, 6  ;;  %v2990_v18 = vld [vmem:[%s3467_s0 + $0x155] sm:$0x1]  ;;  %v1372_v19 = vrot.slane %v1295_v9, 5  ;;  %v1145_v22 = vsel %vm107_vm6, %v1144_v3, %v1143_v56 }
  0xbd   :  { %v606_v4 = vpop.f32.mrf.mxu0  ;;  %v1374_v20 = vrot.slane %v1296_v60, 4  ;;  %v3000_v23 = vld [vmem:[%s3467_s0 + $0x165] sm:$0x1]  ;;  %v1164_v55 = vrot.slane %v1088_v59, 6  ;;  %v1095_v24 = vld [vmem:[%s3467_s0 + $0x195] sm:$0x1]  ;;  %v1163_v27 = vsel %vm92_vm1, %v1162_v61, %v1086_v1 }
  0xbe   :  { %v607_v11 = vadd.f32 %v2479_v15, %v606_v4  ;;  %v763_v15 = vsel %vm110_vm7, %v762_v21, %v761_v54  ;;  %v1287_v21 = vld [vmem:[%s3467_s0 + $0xb6] sm:$0x1]  ;;  %v1151_v54 = vsel %vm95_vm2, %v1150_v38, %v1149_v42  ;;  %v1378_v28 = vrot.slane %v1298_v14, 2  ;;  %v1096_v6 = vld [vmem:[%s3467_s0 + $0x1a5] sm:$0x1] }
  0xbf   :  { %v1358_v33 = vrot.slane %v1287_v21, 5  ;;  %v1293_v4 = vld [vmem:[%s3467_s0 + $0x116] sm:$0x1]  ;;  %v1166_v29 = vrot.slane %v1089_v8, 5  ;;  %v1168_v30 = vrot.slane %v2981_v13, 4  ;;  %v1170_v35 = vrot.slane %v2990_v18, 3 }
  0xc0   :  { %v612_v0 = vmax.f32 %v607_v11, 0.0  ;;  %1980 = vmatmul.msk.f32.vlgmr.msrb.gmra.mxu0 %vm154_vm8, %v1353_v31  ;;  %v1153_v11 = vsel %vm98_vm3, %v1152_v46, %v1151_v54  ;;  %v1368_v16 = vrot.slane %v1293_v4, 7  ;;  %v1172_v36 = vrot.slane %v3000_v23, 2  ;;  %v3023_v40 = vld [vmem:[%s3467_s0 + $0x175] sm:$0x1] }
  0xc1   :  { %v1359_v52 = vsel %vm98_vm3, %v1358_v33, %v1357_v48  ;;  %v1155_v25 = vsel %vm101_vm4, %v1154_v47, %v1153_v11  ;;  %v1176_v33 = vrot.slane %v1095_v24, 7  ;;  %v1165_v42 = vsel %vm95_vm2, %v1164_v55, %v1163_v27  ;;  %v1300_v45 = vld [vmem:[%s3467_s0 + $0x186] sm:$0x1]  ;;  %v1301_v7 = vld [vmem:[%s3467_s0 + $0x196] sm:$0x1] }
  0xc2   :  { %1948 = vmatmul.msk.f32.gmra.mxu2 %vm200_vm10, %v612_v0  ;;  %1952 = vmatmul.msk.f32.gmra.mxu1 %vm154_vm8, %v763_v15  ;;  %v1361_v58 = vsel %vm101_vm4, %v1360_v39, %v1359_v52  ;;  %v1299_v15 = vld [vmem:[%s3467_s0 + $0x176] sm:$0x1]  ;;  %v1369_v21 = vsel %vm92_vm1, %v1368_v16, %v1292_v2  ;;  %v1376_v0 = vrot.slane %v1297_v10, 3  ;;  %v1147_v39 = vsel %vm110_vm7, %v1146_v37, %v1145_v22  ;;  %v1302_v37 = vld [vmem:[%s3467_s0 + $0x1a6] sm:$0x1] }
  0xc3   :  { %v1363_v63 = vsel %vm104_vm5, %v1362_v44, %v1361_v58  ;;  %v1371_v3 = vsel %vm95_vm2, %v1370_v17, %v1369_v21  ;;  %v1380_v34 = vrot.slane %v1299_v15, 1  ;;  %v1094_v44 = vld [vmem:[%s3467_s0 + $0x185] sm:$0x1]  ;;  %v1157_v46 = vsel %vm104_vm5, %v1156_v50, %v1155_v25  ;;  %v1303_v48 = vld [vmem:[%s3467_s0 + $0x1b6] sm:$0x1] }
  0xc4   :  { %v1365_v5 = vsel %vm107_vm6, %v1364_v49, %v1363_v63  ;;  %v1373_v31 = vsel %vm98_vm3, %v1372_v19, %v1371_v3  ;;  %v1304_v49 = vld [vmem:[%s3467_s0 + $0x1c6] sm:$0x1]  ;;  %v1305_v52 = vld [vmem:[%s3467_s0 + $0x1d6] sm:$0x1]  ;;  %v1097_v50 = vld [vmem:[%s3467_s0 + $0x1b5] sm:$0x1]  ;;  %v1167_v61 = vsel %vm98_vm3, %v1166_v29, %v1165_v42  ;;  %v1159_v4 = vsel %vm107_vm6, %v1158_v51, %v1157_v46 }
  0xc5   :  { %v1367_v12 = vsel %vm110_vm7, %v1366_v53, %v1365_v5  ;;  %v1375_v38 = vsel %vm101_vm4, %v1374_v20, %v1373_v31  ;;  %v1306_v54 = vld [vmem:[%s3467_s0 + $0x1e6] sm:$0x1]  ;;  %v1382_v58 = vrot.slane %v1301_v7, 7  ;;  %v1384_v59 = vrot.slane %v1302_v37, 6  ;;  %v1307_v63 = vld [vmem:[%s3467_s0 + $0x1f6] sm:$0x1] }
  0xc6   :  { %v1377_v43 = vsel %vm104_vm5, %v1376_v0, %v1375_v38  ;;  %v1386_v1 = vrot.slane %v1303_v48, 5  ;;  %v1388_v2 = vrot.slane %v1304_v49, 4  ;;  %v3072_v26 = vld [vmem:[%s3467_s0 + $0x1d5] sm:$0x1]  ;;  %v1178_v56 = vrot.slane %v1096_v6, 6 }
  0xc7   :  { %v1379_v47 = vsel %vm107_vm6, %v1378_v28, %v1377_v43  ;;  %v1383_v5 = vsel %vm92_vm1, %v1382_v58, %v1300_v45  ;;  %v1390_v8 = vrot.slane %v1305_v52, 3  ;;  %v1483_v9 = vld [vmem:[%s3467_s0 + $0x17] sm:$0x1]  ;;  %v1174_v60 = vrot.slane %v3023_v40, 1  ;;  %v1484_v15 = vld [vmem:[%s3467_s0 + $0x27] sm:$0x1] }
  0xc8   :  { %1981 = vmatmul.msk.f32.gmra.mxu0 %vm154_vm8, %v1367_v12  ;;  %v1381_v53 = vsel %vm110_vm7, %v1380_v34, %v1379_v47  ;;  %v1177_v32 = vsel %vm92_vm1, %v1176_v33, %v1094_v44  ;;  %v1385_v51 = vsel %vm95_vm2, %v1384_v59, %v1383_v5  ;;  %v1392_v10 = vrot.slane %v1306_v54, 2  ;;  %v3094_v22 = vld [vmem:[%s3467_s0 + $0x1e5] sm:$0x1]  ;;  %v1688_v0 = vld [vmem:[%s3467_s0 + $0x8] sm:$0x1] }
  0xc9   :  { %v1169_v11 = vsel %vm101_vm4, %v1168_v30, %v1167_v61  ;;  %v1180_v12 = vrot.slane %v1097_v50, 5  ;;  %v1387_v13 = vsel %vm98_vm3, %v1386_v1, %v1385_v51  ;;  %v1394_v14 = vrot.slane %v1307_v63, 1  ;;  %v1689_v24 = vld [vmem:[%s3467_s0 + $0x18] sm:$0x1]  ;;  %v1690_v41 = vld [vmem:[%s3467_s0 + $0x28] sm:$0x1] }
  0xca   :  { %1953 = vmatmul.msk.f32.gmra.mxu1 %vm154_vm8, %v777_v62  ;;  %v1098_v62 = vld [vmem:[%s3467_s0 + $0x1c5] sm:$0x1]  ;;  %v1184_v17 = vrot.slane %v3072_v26, 3  ;;  %v1389_v18 = vsel %vm101_vm4, %v1388_v2, %v1387_v13  ;;  %v1546_v19 = vrot.slane %v1483_v9, 7  ;;  %v1161_v20 = vsel %vm110_vm7, %v1160_v57, %v1159_v4  ;;  %v3111_v25 = vld [vmem:[%s3467_s0 + $0x1f5] sm:$0x1] }
  0xcb   :  { %v1182_v16 = vrot.slane %v1098_v62, 4  ;;  %v1179_v55 = vsel %vm95_vm2, %v1178_v56, %v1177_v32  ;;  %v1391_v21 = vsel %vm104_vm5, %v1390_v8, %v1389_v18  ;;  %v1171_v57 = vsel %vm104_vm5, %v1170_v35, %v1169_v11  ;;  %v1691_v3 = vld [vmem:[%s3467_s0 + $0x38] sm:$0x1]  ;;  %v1692_v28 = vld [vmem:[%s3467_s0 + $0x48] sm:$0x1] }
  0xcc   :  { %v1393_v27 = vsel %vm107_vm6, %v1392_v10, %v1391_v21  ;;  %v1693_v29 = vld [vmem:[%s3467_s0 + $0x58] sm:$0x1]  ;;  %v1482_v31 = vld [vmem:[%s3467_s0 + $0x7] sm:$0x1]  ;;  %v1694_v34 = vld [vmem:[%s3467_s0 + $0x68] sm:$0x1]  ;;  %v1181_v6 = vsel %vm98_vm3, %v1180_v12, %v1179_v55  ;;  %v1173_v43 = vsel %vm107_vm6, %v1172_v36, %v1171_v57 }
  0xcd   :  { %v1395_v30 = vsel %vm110_vm7, %v1394_v14, %v1393_v27  ;;  %v1752_v35 = vrot.slane %v1689_v24, 7  ;;  %v1754_v38 = vrot.slane %v1690_v41, 6  ;;  %v1485_v33 = vld [vmem:[%s3467_s0 + $0x37] sm:$0x1]  ;;  %v1756_v40 = vrot.slane %v1691_v3, 5 }
  0xce   :  { %v1758_v42 = vrot.slane %v1692_v28, 4  ;;  %v1486_v44 = vld [vmem:[%s3467_s0 + $0x47] sm:$0x1]  ;;  %v1548_v45 = vrot.slane %v1484_v15, 6  ;;  %v1760_v37 = vrot.slane %v1693_v29, 3  ;;  %v1186_v47 = vrot.slane %v3094_v22, 2 }
  0xcf   :  { %v1753_v7 = vsel %vm92_vm1, %v1752_v35, %v1688_v0  ;;  %v1491_v46 = vld [vmem:[%s3467_s0 + $0x97] sm:$0x1]  ;;  %v1547_v23 = vsel %vm92_vm1, %v1546_v19, %v1482_v31  ;;  %v1762_v48 = vrot.slane %v1694_v34, 2  ;;  %v1183_v49 = vsel %vm101_vm4, %v1182_v16, %v1181_v6  ;;  %v1492_v61 = vld [vmem:[%s3467_s0 + $0xa7] sm:$0x1] }
  0xd0   :  { %1982 = vmatmul.msk.f32.gmra.mxu0 %vm154_vm8, %v1381_v53  ;;  %v1755_v36 = vsel %vm95_vm2, %v1754_v38, %v1753_v7  ;;  %v1188_v52 = vrot.slane %v3111_v25, 1  ;;  %v1550_v54 = vrot.slane %v1485_v33, 5  ;;  %v1552_v58 = vrot.slane %v1486_v44, 4  ;;  %v1487_v1 = vld [vmem:[%s3467_s0 + $0x57] sm:$0x1] }
  0xd1   :  { %v1757_v53 = vsel %vm98_vm3, %v1756_v40, %v1755_v36  ;;  %v1560_v62 = vrot.slane %v1491_v46, 7  ;;  %v1175_v63 = vsel %vm110_vm7, %v1174_v60, %v1173_v43  ;;  %v1549_v2 = vsel %vm95_vm2, %v1548_v45, %v1547_v23  ;;  %v1696_v26 = vld [vmem:[%s3467_s0 + $0x88] sm:$0x1]  ;;  %v1697_v56 = vld [vmem:[%s3467_s0 + $0x98] sm:$0x1] }
  0xd2   :  { %1970 = vmatmul.msk.f32.vlgmr.msrb.gmra.mxu1 %vm154_vm8, %v1147_v39  ;;  %v1695_v39 = vld [vmem:[%s3467_s0 + $0x78] sm:$0x1]  ;;  %v1759_v59 = vsel %vm101_vm4, %v1758_v42, %v1757_v53  ;;  %v1698_v5 = vld [vmem:[%s3467_s0 + $0xa8] sm:$0x1]  ;;  %v1185_v8 = vsel %vm104_vm5, %v1184_v17, %v1183_v49  ;;  %v1490_v11 = vld [vmem:[%s3467_s0 + $0x87] sm:$0x1]  ;;  %v1551_v17 = vsel %vm98_vm3, %v1550_v54, %v1549_v2 }
  0xd3   :  { %v1764_v50 = vrot.slane %v1695_v39, 1  ;;  %v1761_v4 = vsel %vm104_vm5, %v1760_v37, %v1759_v59  ;;  %v1699_v60 = vld [vmem:[%s3467_s0 + $0xb8] sm:$0x1]  ;;  %v1700_v32 = vld [vmem:[%s3467_s0 + $0xc8] sm:$0x1]  ;;  %v1766_v13 = vrot.slane %v1697_v56, 7  ;;  %v1561_v57 = vsel %vm92_vm1, %v1560_v62, %v1490_v11 }
  0xd4   :  { %v1763_v9 = vsel %vm107_vm6, %v1762_v48, %v1761_v4  ;;  %v1701_v51 = vld [vmem:[%s3467_s0 + $0xd8] sm:$0x1]  ;;  %v1702_v12 = vld [vmem:[%s3467_s0 + $0xe8] sm:$0x1]  ;;  %v1768_v14 = vrot.slane %v1698_v5, 6  ;;  %v1770_v15 = vrot.slane %v1699_v60, 5  ;;  %v1553_v3 = vsel %vm101_vm4, %v1552_v58, %v1551_v17 }
  0xd5   :  { %v1765_v10 = vsel %vm110_vm7, %v1764_v50, %v1763_v9  ;;  %v1488_v16 = vld [vmem:[%s3467_s0 + $0x67] sm:$0x1]  ;;  %v1703_v18 = vld [vmem:[%s3467_s0 + $0xf8] sm:$0x1]  ;;  %v1772_v19 = vrot.slane %v1700_v32, 4  ;;  %v1562_v21 = vrot.slane %v1492_v61, 6  ;;  %v1767_v0 = vsel %vm92_vm1, %v1766_v13, %v1696_v26 }
  0xd6   :  { %v1493_v22 = vld [vmem:[%s3467_s0 + $0xb7] sm:$0x1]  ;;  %v1494_v55 = vld [vmem:[%s3467_s0 + $0xc7] sm:$0x1]  ;;  %v1774_v24 = vrot.slane %v1701_v51, 3  ;;  %v1554_v41 = vrot.slane %v1487_v1, 3  ;;  %v1769_v25 = vsel %vm95_vm2, %v1768_v14, %v1767_v0 }
  0xd7   :  { %v1776_v27 = vrot.slane %v1702_v12, 2  ;;  %v1771_v28 = vsel %vm98_vm3, %v1770_v15, %v1769_v25  ;;  %v1778_v29 = vrot.slane %v1703_v18, 1  ;;  %v1556_v31 = vrot.slane %v1488_v16, 2  ;;  %v1499_v6 = vld [vmem:[%s3467_s0 + $0x117] sm:$0x1] }
  0xd8   :  { %1983 = vmatmul.msk.f32.gmra.mxu0 %vm154_vm8, %v1395_v30  ;;  %v1489_v30 = vld [vmem:[%s3467_s0 + $0x77] sm:$0x1]  ;;  %v1564_v34 = vrot.slane %v1493_v22, 5  ;;  %v1566_v35 = vrot.slane %v1494_v55, 4  ;;  %v1773_v38 = vsel %vm101_vm4, %v1772_v19, %v1771_v28  ;;  %v1563_v40 = vsel %vm95_vm2, %v1562_v21, %v1561_v57  ;;  %v1500_v43 = vld [vmem:[%s3467_s0 + $0x127] sm:$0x1] }
  0xd9   :  { %v1495_v39 = vld [vmem:[%s3467_s0 + $0xd7] sm:$0x1]  ;;  %v1775_v42 = vsel %vm104_vm5, %v1774_v24, %v1773_v38  ;;  %v1704_v44 = vld [vmem:[%s3467_s0 + $0x108] sm:$0x1]  ;;  %v1705_v45 = vld [vmem:[%s3467_s0 + $0x118] sm:$0x1]  ;;  %v1555_v37 = vsel %vm104_vm5, %v1554_v41, %v1553_v3 }
  0xda   :  { %1971 = vmatmul.msk.f32.gmra.mxu1 %vm154_vm8, %v1161_v20  ;;  %v1187_v20 = vsel %vm107_vm6, %v1186_v47, %v1185_v8  ;;  %v1706_v7 = vld [vmem:[%s3467_s0 + $0x128] sm:$0x1]  ;;  %v1777_v46 = vsel %vm107_vm6, %v1776_v27, %v1775_v42  ;;  %v1707_v47 = vld [vmem:[%s3467_s0 + $0x138] sm:$0x1]  ;;  %v3252_v48 = vld [vmem:[%s3467_s0 + $0xe7] sm:$0x1]  ;;  %v1565_v58 = vsel %vm98_vm3, %v1564_v34, %v1563_v40  ;;  %v1557_v1 = vsel %vm107_vm6, %v1556_v31, %v1555_v37 }
  0xdb   :  { %v1189_v33 = vsel %vm110_vm7, %v1188_v52, %v1187_v20  ;;  %v1708_v23 = vld [vmem:[%s3467_s0 + $0x148] sm:$0x1]  ;;  %v1709_v36 = vld [vmem:[%s3467_s0 + $0x158] sm:$0x1]  ;;  %v1779_v49 = vsel %vm110_vm7, %v1778_v29, %v1777_v46  ;;  %v1574_v52 = vrot.slane %v1499_v6, 7  ;;  %v1780_v50 = vrot.slane %v1705_v45, 7 }
  0xdc   :  { %v1710_v53 = vld [vmem:[%s3467_s0 + $0x168] sm:$0x1]  ;;  %v1782_v54 = vrot.slane %v1706_v7, 6  ;;  %v1498_v59 = vld [vmem:[%s3467_s0 + $0x107] sm:$0x1]  ;;  %v1784_v62 = vrot.slane %v1707_v47, 5  ;;  %v1567_v51 = vsel %vm101_vm4, %v1566_v35, %v1565_v58 }
  0xdd   :  { %v1711_v61 = vld [vmem:[%s3467_s0 + $0x178] sm:$0x1]  ;;  %v1558_v2 = vrot.slane %v1489_v30, 1  ;;  %v1501_v4 = vld [vmem:[%s3467_s0 + $0x137] sm:$0x1]  ;;  %v1781_v56 = vsel %vm92_vm1, %v1780_v50, %v1704_v44  ;;  %v1788_v5 = vrot.slane %v1709_v36, 3 }
  0xde   :  { %v1502_v26 = vld [vmem:[%s3467_s0 + $0x147] sm:$0x1]  ;;  %v1568_v8 = vrot.slane %v1495_v39, 3  ;;  %v1576_v9 = vrot.slane %v1500_v43, 6  ;;  %v1783_v60 = vsel %vm95_vm2, %v1782_v54, %v1781_v56  ;;  %v1790_v32 = vrot.slane %v1710_v53, 2 }
  0xdf   :  { %v1785_v11 = vsel %vm98_vm3, %v1784_v62, %v1783_v60  ;;  %v1792_v12 = vrot.slane %v1711_v61, 1  ;;  %v1497_v13 = vld [vmem:[%s3467_s0 + $0xf7] sm:$0x1]  ;;  %v1570_v14 = vrot.slane %v3252_v48, 2  ;;  %v1578_v16 = vrot.slane %v1501_v4, 5 }
  0xe0   :  { %2000 = vmatmul.msk.f32.vlgmr.msra.gmra.mxu0 %vm154_vm8, %v1765_v10  ;;  %v1575_v10 = vsel %vm92_vm1, %v1574_v52, %v1498_v59  ;;  %v1580_v17 = vrot.slane %v1502_v26, 4  ;;  %v1507_v15 = vld [vmem:[%s3467_s0 + $0x197] sm:$0x1]  ;;  %v1559_v19 = vsel %vm110_vm7, %v1558_v2, %v1557_v1  ;;  %v1508_v22 = vld [vmem:[%s3467_s0 + $0x1a7] sm:$0x1]  ;;  %v1569_v24 = vsel %vm104_vm5, %v1568_v8, %v1567_v51 }
  0xe1   :  { %v1712_v55 = vld [vmem:[%s3467_s0 + $0x188] sm:$0x1]  ;;  %v1713_v21 = vld [vmem:[%s3467_s0 + $0x198] sm:$0x1]  ;;  %v1503_v41 = vld [vmem:[%s3467_s0 + $0x157] sm:$0x1]  ;;  %v1577_v57 = vsel %vm95_vm2, %v1576_v9, %v1575_v10  ;;  %v1571_v45 = vsel %vm107_vm6, %v1570_v14, %v1569_v24 }
  0xe2   :  { %1972 = vmatmul.msk.f32.gmra.mxu1 %vm154_vm8, %v1175_v63  ;;  %v1786_v63 = vrot.slane %v1708_v23, 4  ;;  %v1714_v0 = vld [vmem:[%s3467_s0 + $0x1a8] sm:$0x1]  ;;  %v1715_v27 = vld [vmem:[%s3467_s0 + $0x1b8] sm:$0x1]  ;;  %v1588_v30 = vrot.slane %v1507_v15, 7  ;;  %v1579_v42 = vsel %vm98_vm3, %v1578_v16, %v1577_v57 }
  0xe3   :  { %v1716_v3 = vld [vmem:[%s3467_s0 + $0x1c8] sm:$0x1]  ;;  %v1717_v28 = vld [vmem:[%s3467_s0 + $0x1d8] sm:$0x1]  ;;  %v1794_v34 = vrot.slane %v1713_v21, 7  ;;  %v1796_v35 = vrot.slane %v1714_v0, 6  ;;  %v1581_v53 = vsel %vm101_vm4, %v1580_v17, %v1579_v42 }
  0xe4   :  { %v1787_v18 = vsel %vm101_vm4, %v1786_v63, %v1785_v11  ;;  %v1718_v31 = vld [vmem:[%s3467_s0 + $0x1e8] sm:$0x1]  ;;  %v1506_v38 = vld [vmem:[%s3467_s0 + $0x187] sm:$0x1]  ;;  %v1719_v6 = vld [vmem:[%s3467_s0 + $0x1f8] sm:$0x1] }
  0xe5   :  { %v1789_v20 = vsel %vm104_vm5, %v1788_v5, %v1787_v18  ;;  %v1800_v39 = vrot.slane %v1716_v3, 4  ;;  %v1572_v40 = vrot.slane %v1497_v13, 1  ;;  %v1795_v43 = vsel %vm92_vm1, %v1794_v34, %v1712_v55  ;;  %v1509_v7 = vld [vmem:[%s3467_s0 + $0x1b7] sm:$0x1]  ;;  %v1504_v23 = vld [vmem:[%s3467_s0 + $0x167] sm:$0x1]  ;;  %v1009_v55 = vpop.f32.mrf.mxu0 }
  0xe6   :  { %v1791_v25 = vsel %vm107_vm6, %v1790_v32, %v1789_v20  ;;  %v1802_v44 = vrot.slane %v1717_v28, 3  ;;  %v1590_v37 = vrot.slane %v1508_v22, 6  ;;  %v1797_v46 = vsel %vm95_vm2, %v1796_v35, %v1795_v43  ;;  %v1510_v58 = vld [vmem:[%s3467_s0 + $0x1c7] sm:$0x1]  ;;  %v1505_v62 = vld [vmem:[%s3467_s0 + $0x177] sm:$0x1] }
  0xe7   :  { %v1793_v29 = vsel %vm110_vm7, %v1792_v12, %v1791_v25  ;;  %v1804_v47 = vrot.slane %v1718_v31, 2  ;;  %v1582_v36 = vrot.slane %v1503_v41, 3  ;;  %v1589_v48 = vsel %vm92_vm1, %v1588_v30, %v1506_v38  ;;  %v1511_v56 = vld [vmem:[%s3467_s0 + $0x1d7] sm:$0x1]  ;;  %v1512_v32 = vld [vmem:[%s3467_s0 + $0x1e7] sm:$0x1] }
  0xe8   :  { %2001 = vmatmul.msk.f32.gmra.mxu0 %vm154_vm8, %v1779_v49  ;;  %v1806_v52 = vrot.slane %v1719_v6, 1  ;;  %v1573_v54 = vsel %vm110_vm7, %v1572_v40, %v1571_v45  ;;  %v1592_v59 = vrot.slane %v1509_v7, 5  ;;  %v1584_v63 = vrot.slane %v1504_v23, 2  ;;  %v1513_v12 = vld [vmem:[%s3467_s0 + $0x1f7] sm:$0x1]  ;;  %v2015_v3 = vld [vmem:[%s3468_s3] sm:$0xff] }
  0xe9   :  { %v1591_v1 = vsel %vm95_vm2, %v1590_v37, %v1589_v48  ;;  %v1583_v4 = vsel %vm104_vm5, %v1582_v36, %v1581_v53  ;;  %v1594_v5 = vrot.slane %v1510_v58, 4  ;;  %v1586_v8 = vrot.slane %v1505_v62, 1  ;;  %v3377_v0 = vld [vmem:[%s3469_s2] ss:$0 sm:$0xff]  ;;  %v2014_v57 = vld [vmem:[%s3468_s3 + $0x8] sm:$0x3] }
  0xea   :  { %1973 = vmatmul.msk.f32.gmra.mxu1 %vm154_vm8, %v1189_v33  ;;  %v1798_v33 = vrot.slane %v1715_v27, 5  ;;  %v1593_v9 = vsel %vm98_vm3, %v1592_v59, %v1591_v1  ;;  %v1585_v60 = vsel %vm107_vm6, %v1584_v63, %v1583_v4  ;;  %v1596_v51 = vrot.slane %v1511_v56, 3 }
  0xeb   :  { %v1595_v10 = vsel %vm101_vm4, %v1594_v5, %v1593_v9  ;;  %v1587_v11 = vsel %vm110_vm7, %v1586_v8, %v1585_v60  ;;  %v1598_v13 = vrot.slane %v1512_v32, 2  ;;  %v1600_v16 = vrot.slane %v1513_v12, 1 }
  0xec   :  { %v1799_v49 = vsel %vm98_vm3, %v1798_v33, %v1797_v46  ;;  %v1597_v14 = vsel %vm104_vm5, %v1596_v51, %v1595_v10  ;;  %v1010_v24 = vadd.f32 %v3377_v0, %v1009_v55 }
  0xed   :  { %v1801_v50 = vsel %vm101_vm4, %v1800_v39, %v1799_v49  ;;  %v1599_v17 = vsel %vm107_vm6, %v1598_v13, %v1597_v14 }
  0xee   :  { %v1803_v61 = vsel %vm104_vm5, %v1802_v44, %v1801_v50  ;;  %v1601_v18 = vsel %vm110_vm7, %v1600_v16, %v1599_v17  ;;  %v1021_v41 = vmax.f32 %v1010_v24, 0.0 }
  0xef   :  { %v1805_v2 = vsel %vm107_vm6, %v1804_v47, %v1803_v61 }
  0xf0   :  { %2002 = vmatmul.msk.f32.gmra.mxu0 %vm154_vm8, %v1793_v29  ;;  %v1807_v26 = vsel %vm110_vm7, %v1806_v52, %v1805_v2  ;;  %1965 = vmatmul.msk.f32.vlgmr.msra.gmra.mxu2 %vm200_vm10, %v1021_v41 }
  0xf1   :  { %2004 = vmatpush.msk.msra.mxu2 %vm213_vm9, %v2014_v57 }
  0xf2   :  { %1990 = vmatmul.msk.f32.vlgmr.msra.gmra.mxu1 %vm154_vm8, %v1559_v19 }
  0xf3   :  { %1876 = vmatpush.msra.mxu2 %v2015_v3 }
  0xf8   :  { %2003 = vmatmul.msk.f32.gmra.mxu0 %vm154_vm8, %v1807_v26 }
  0xfa   :  { %1991 = vmatmul.msk.f32.gmra.mxu1 %vm154_vm8, %v1573_v54 }
 0x102   :  { %1992 = vmatmul.msk.f32.gmra.mxu1 %vm154_vm8, %v1587_v11 }
 0x10a   :  { %1993 = vmatmul.msk.f32.gmra.mxu1 %vm154_vm8, %v1601_v18 }
 0x10b   :  { %v234_v15 = vpop.f32.mrf.mxu1 }
 0x113   :  { %v237_v19 = vpop.f32.mrf.mxu1 }
 0x11b   :  { %v436_v20 = vpop.f32.mrf.mxu3  ;;  %v240_v21 = vpop.f32.mrf.mxu1 }
 0x11c   :  { %v448_v22 = vmax.f32 %v234_v15, %v436_v20  ;;  %v1012_v28 = vpop.f32.mrf.mxu0 }
 0x11d   :  { %v1013_v29 = vadd.f32 %v3377_v0, %v1012_v28 }
 0x11f   :  { %v1022_v31 = vmax.f32 %v1013_v29, 0.0 }
 0x121   :  { %1966 = vmatmul.msk.f32.gmra.mxu2 %vm200_vm10, %v1022_v31 }
 0x123   :  { %v439_v25 = vpop.f32.mrf.mxu3 }
 0x124   :  { %v449_v27 = vmax.f32 %v237_v19, %v439_v25 }
 0x127   :  { %v3389_v30 = vpop.f32.mrf.mxu1 }
 0x129   :  { %v642_v34 = vpop.f32.mrf.mxu2 }
 0x12a   :  { %v3391_v35 = vmax.f32 %v448_v22, %v642_v34  ;;  %v1015_v40 = vpop.f32.mrf.mxu0 }
 0x12b   :  { %v442_v38 = vpop.f32.mrf.mxu3  ;;  %v1016_v42 = vadd.f32 %v3377_v0, %v1015_v40 }
 0x12c   :  { %v450_v6 = vmax.f32 %v240_v21, %v442_v38 }
 0x12d   :  { %v1023_v44 = vmax.f32 %v1016_v42, 0.0 }
 0x12f   :  { %v803_v33 = vpop.f32.mrf.mxu1  ;;  %1967 = vmatmul.msk.f32.gmra.mxu2 %vm200_vm10, %v1023_v44 }
 0x130   :  { %v804_v39 = vadd.f32 %v3377_v0, %v803_v33 }
 0x132   :  { %v815_v43 = vmax.f32 %v804_v39, 0.0 }
 0x134   :  { %1955 = vmatmul.msk.f32.vlgmr.msra.gmra.mxu3 %vm200_vm10, %v815_v43 }
 0x135   :  { %v645_v45 = vpop.f32.mrf.mxu2  ;;  %1994 = vmatpush.msk.msra.mxu3 %vm213_vm9, %v2014_v57  ;;  %v1018_v47 = vpop.f32.mrf.mxu0 }
 0x136   :  { %v3399_v7 = vmax.f32 %v449_v27, %v645_v45  ;;  %v1019_v23 = vadd.f32 %v3377_v0, %v1018_v47 }
 0x137   :  { %v806_v37 = vpop.f32.mrf.mxu1  ;;  %1670 = vmatpush.msra.mxu3 %v2015_v3 }
 0x138   :  { %v807_v46 = vadd.f32 %v3377_v0, %v806_v37  ;;  %v1024_v48 = vmax.f32 %v1019_v23, 0.0 }
 0x13a   :  { %v816_v36 = vmax.f32 %v807_v46, 0.0  ;;  %1968 = vmatmul.msk.f32.gmra.mxu2 %vm200_vm10, %v1024_v48  ;;  %v445_v48 = vpop.f32.mrf.mxu3 }
 0x13c   :  { %1956 = vmatmul.msk.f32.gmra.mxu3 %vm200_vm10, %v816_v36 }
 0x13d   :  { %v648_v49 = vpop.f32.mrf.mxu2  ;;  %v1421_v54 = vpop.f32.mrf.mxu0 }
 0x13e   :  { %v3405_v52 = vmax.f32 %v450_v6, %v648_v49  ;;  %v1422_v58 = vadd.f32 %v3377_v0, %v1421_v54 }
 0x13f   :  { %v809_v53 = vpop.f32.mrf.mxu1 }
 0x140   :  { %v810_v50 = vadd.f32 %v3377_v0, %v809_v53  ;;  %v1433_v61 = vmax.f32 %v1422_v58, 0.0 }
 0x142   :  { %v817_v59 = vmax.f32 %v810_v50, 0.0  ;;  %1985 = vmatmul.msk.f32.vlgmr.msrb.gmra.mxu2 %vm200_vm10, %v1433_v61 }
 0x144   :  { %1957 = vmatmul.msk.f32.gmra.mxu3 %vm200_vm10, %v817_v59 }
 0x145   :  { %v1424_v1 = vpop.f32.mrf.mxu0  ;;  %v651_v47 = vpop.f32.mrf.mxu2 }
 0x146   :  { %v1425_v2 = vadd.f32 %v3377_v0, %v1424_v1 }
 0x147   :  { %v812_v62 = vpop.f32.mrf.mxu1 }
 0x148   :  { %v813_v63 = vadd.f32 %v3377_v0, %v812_v62  ;;  %v1434_v26 = vmax.f32 %v1425_v2, 0.0 }
 0x14a   :  { %v818_v4 = vmax.f32 %v813_v63, 0.0  ;;  %1986 = vmatmul.msk.f32.gmra.mxu2 %vm200_vm10, %v1434_v26 }
 0x14c   :  { %1958 = vmatmul.msk.f32.gmra.mxu3 %vm200_vm10, %v818_v4 }
 0x14d   :  { %v1427_v8 = vpop.f32.mrf.mxu0 }
 0x14e   :  { %v1428_v9 = vadd.f32 %v3377_v0, %v1427_v8 }
 0x14f   :  { %v1215_v56 = vpop.f32.mrf.mxu1 }
 0x150   :  { %v1216_v5 = vadd.f32 %v3377_v0, %v1215_v56  ;;  %v1435_v32 = vmax.f32 %v1428_v9, 0.0 }
 0x152   :  { %v1227_v60 = vmax.f32 %v1216_v5, 0.0  ;;  %1987 = vmatmul.msk.f32.gmra.mxu2 %vm200_vm10, %v1435_v32 }
 0x154   :  { %1975 = vmatmul.msk.f32.vlgmr.msrb.gmra.mxu3 %vm200_vm10, %v1227_v60 }
 0x155   :  { %v1430_v11 = vpop.f32.mrf.mxu0 }
 0x156   :  { %v1431_v12 = vadd.f32 %v3377_v0, %v1430_v11 }
 0x157   :  { %v1218_v51 = vpop.f32.mrf.mxu1 }
 0x158   :  { %v1219_v10 = vadd.f32 %v3377_v0, %v1218_v51  ;;  %v1436_v14 = vmax.f32 %v1431_v12, 0.0  ;;  %v2012_v12 = vld [vmem:[%s3470_s4] ss:$0 sm:$0xff] }
 0x15a   :  { %v1228_v13 = vmax.f32 %v1219_v10, 0.0  ;;  %1988 = vmatmul.msk.f32.gmra.mxu2 %vm200_vm10, %v1436_v14 }
 0x15c   :  { %1976 = vmatmul.msk.f32.gmra.mxu3 %vm200_vm10, %v1228_v13 }
 0x15d   :  { %v1833_v18 = vpop.f32.mrf.mxu0 }
 0x15e   :  { %v1834_v15 = vadd.f32 %v3377_v0, %v1833_v18 }
 0x15f   :  { %v1221_v16 = vpop.f32.mrf.mxu1 }
 0x160   :  { %v1222_v17 = vadd.f32 %v3377_v0, %v1221_v16  ;;  %v1845_v20 = vmax.f32 %v1834_v15, 0.0 }
 0x162   :  { %v1229_v19 = vmax.f32 %v1222_v17, 0.0  ;;  %2005 = vmatmul.msk.f32.vlgmr.msra.gmra.mxu2 %vm200_vm10, %v1845_v20 }
 0x164   :  { %1977 = vmatmul.msk.f32.gmra.mxu3 %vm200_vm10, %v1229_v19 }
 0x165   :  { %v1836_v21 = vpop.f32.mrf.mxu0 }
 0x166   :  { %v1837_v24 = vadd.f32 %v3377_v0, %v1836_v21 }
 0x167   :  { %v1224_v22 = vpop.f32.mrf.mxu1 }
 0x168   :  { %v1225_v55 = vadd.f32 %v3377_v0, %v1224_v22  ;;  %v1846_v57 = vmax.f32 %v1837_v24, 0.0 }
 0x16a   :  { %v1230_v41 = vmax.f32 %v1225_v55, 0.0  ;;  %2006 = vmatmul.msk.f32.gmra.mxu2 %vm200_vm10, %v1846_v57 }
 0x16c   :  { %1978 = vmatmul.msk.f32.gmra.mxu3 %vm200_vm10, %v1230_v41 }
 0x16d   :  { %v1839_v3 = vpop.f32.mrf.mxu0 }
 0x16e   :  { %v1840_v28 = vadd.f32 %v3377_v0, %v1839_v3 }
 0x16f   :  { %v1627_v25 = vpop.f32.mrf.mxu1 }
 0x170   :  { %v1628_v27 = vadd.f32 %v3377_v0, %v1627_v25  ;;  %v1847_v31 = vmax.f32 %v1840_v28, 0.0 }
 0x172   :  { %v1639_v29 = vmax.f32 %v1628_v27, 0.0  ;;  %2007 = vmatmul.msk.f32.gmra.mxu2 %vm200_vm10, %v1847_v31 }
 0x173   :  { %v1054_v23 = vpop.f32.mrf.mxu2 }
 0x174   :  { %1995 = vmatmul.msk.f32.vlgmr.msra.gmra.mxu3 %vm200_vm10, %v1639_v29 }
 0x175   :  { %v1842_v6 = vpop.f32.mrf.mxu0 }
 0x176   :  { %v1843_v33 = vadd.f32 %v3377_v0, %v1842_v6 }
 0x177   :  { %v1630_v34 = vpop.f32.mrf.mxu1 }
 0x178   :  { %v1631_v38 = vadd.f32 %v3377_v0, %v1630_v34  ;;  %v1848_v40 = vmax.f32 %v1843_v33, 0.0 }
 0x17a   :  { %v1640_v39 = vmax.f32 %v1631_v38, 0.0  ;;  %2008 = vmatmul.msk.f32.gmra.mxu2 %vm200_vm10, %v1848_v40 }
 0x17c   :  { %1996 = vmatmul.msk.f32.gmra.mxu3 %vm200_vm10, %v1640_v39 }
 0x17f   :  { %v1633_v42 = vpop.f32.mrf.mxu1 }
 0x180   :  { %v1634_v43 = vadd.f32 %v3377_v0, %v1633_v42 }
 0x182   :  { %v1641_v44 = vmax.f32 %v1634_v43, 0.0 }
 0x184   :  { %1997 = vmatmul.msk.f32.gmra.mxu3 %vm200_vm10, %v1641_v44 }
 0x187   :  { %v1636_v45 = vpop.f32.mrf.mxu1 }
 0x188   :  { %v1637_v37 = vadd.f32 %v3377_v0, %v1636_v45 }
 0x18a   :  { %v1642_v46 = vmax.f32 %v1637_v37, 0.0 }
 0x18c   :  { %1998 = vmatmul.msk.f32.gmra.mxu3 %vm200_vm10, %v1642_v46 }
 0x1a4   :  { %v1057_v36 = vpop.f32.mrf.mxu2 }
 0x1b2   :  { %v1060_v53 = vpop.f32.mrf.mxu2 }
 0x1b7   :  { %v848_v49 = vpop.f32.mrf.mxu3 }
 0x1b8   :  { %v860_v26 = vmax.f32 %v3391_v35, %v848_v49 }
 0x1ba   :  { %v1066_v5 = vmax.f32 %v860_v26, %v1054_v23 }
 0x1bd   :  { %v1063_v54 = vpop.f32.mrf.mxu2 }
 0x1bf   :  { %v851_v50 = vpop.f32.mrf.mxu3 }
 0x1c0   :  { %v861_v60 = vmax.f32 %v3399_v7, %v851_v50  ;;  %v451_v7 = vmax.f32 %v3389_v30, %v445_v48 }
 0x1c2   :  { %v1067_v10 = vmax.f32 %v861_v60, %v1057_v36  ;;  %v657_v21 = vmax.f32 %v451_v7, %v651_v47 }
 0x1c5   :  { %v1466_v59 = vpop.f32.mrf.mxu2 }
 0x1c7   :  { %v854_v58 = vpop.f32.mrf.mxu3 }
 0x1c8   :  { %v862_v17 = vmax.f32 %v3405_v52, %v854_v58 }
 0x1ca   :  { %v1068_v20 = vmax.f32 %v862_v17, %v1060_v53 }
 0x1cd   :  { %v1469_v62 = vpop.f32.mrf.mxu2 }
 0x1cf   :  { %v857_v61 = vpop.f32.mrf.mxu3 }
 0x1d0   :  { %v863_v57 = vmax.f32 %v657_v21, %v857_v61 }
 0x1d2   :  { %v1069_v29 = vmax.f32 %v863_v57, %v1063_v54 }
 0x1d5   :  { %v1472_v1 = vpop.f32.mrf.mxu2 }
 0x1d7   :  { %v1260_v63 = vpop.f32.mrf.mxu3 }
 0x1d8   :  { %v1272_v9 = vmax.f32 %v1066_v5, %v1260_v63 }
 0x1da   :  { %v1478_v32 = vmax.f32 %v1272_v9, %v1466_v59 }
 0x1dd   :  { %v1475_v0 = vpop.f32.mrf.mxu2 }
 0x1df   :  { %v1263_v2 = vpop.f32.mrf.mxu3 }
 0x1e0   :  { %v1273_v13 = vmax.f32 %v1067_v10, %v1263_v2 }
 0x1e2   :  { %v1479_v18 = vmax.f32 %v1273_v13, %v1469_v62 }
 0x1e5   :  { %v1878_v8 = vpop.f32.mrf.mxu2 }
 0x1e7   :  { %v1266_v4 = vpop.f32.mrf.mxu3 }
 0x1e8   :  { %v1274_v24 = vmax.f32 %v1068_v20, %v1266_v4 }
 0x1ea   :  { %v1480_v27 = vmax.f32 %v1274_v24, %v1472_v1 }
 0x1ed   :  { %v1881_v16 = vpop.f32.mrf.mxu2 }
 0x1ef   :  { %v1269_v56 = vpop.f32.mrf.mxu3 }
 0x1f0   :  { %v1275_v34 = vmax.f32 %v1069_v29, %v1269_v56 }
 0x1f2   :  { %v1481_v33 = vmax.f32 %v1275_v34, %v1475_v0 }
 0x1f5   :  { %v1884_v25 = vpop.f32.mrf.mxu2 }
 0x1f7   :  { %v1672_v51 = vpop.f32.mrf.mxu3 }
 0x1f8   :  { %v1684_v11 = vmax.f32 %v1478_v32, %v1672_v51 }
 0x1fa   :  { %v1890_v14 = vmax.f32 %v1684_v11, %v1878_v8 }
 0x1fc   :  { %v1898_v35 = vadd.f32 %v2012_v12, %v1890_v14 }
 0x1fd   :  { %v1887_v42 = vpop.f32.mrf.mxu2 }
 0x1fe   :  { %v1902_v15 = vmax.f32 %v1898_v35, 0.0 }
 0x1ff   :  { %v1675_v19 = vpop.f32.mrf.mxu3 }
 0x200   :  { %v1906_v22 = vpack.c.bf16 %v1902_v15, %v1902_v15  ;;  %v1685_v55 = vmax.f32 %v1479_v18, %v1675_v19 }
 0x202   :  { %1911 = vst.msk [vmem:[%s3471_s5] sm:$0xf] %vm1910_vm11, %v1906_v22  ;;  %v1891_v41 = vmax.f32 %v1685_v55, %v1881_v16 }
 0x204   :  { %v1899_v52 = vadd.f32 %v2012_v12, %v1891_v41 }
 0x206   :  { %v1903_v3 = vmax.f32 %v1899_v52, 0.0 }
 0x207   :  { %v1678_v28 = vpop.f32.mrf.mxu3 }
 0x208   :  { %v1907_v31 = vpack.c.bf16 %v1903_v3, %v1903_v3  ;;  %v1686_v30 = vmax.f32 %v1480_v27, %v1678_v28 }
 0x20a   :  { %1912 = vst.msk [vmem:[%s3471_s5 + $0x4] sm:$0xf] %vm1910_vm11, %v1907_v31  ;;  %v1892_v38 = vmax.f32 %v1686_v30, %v1884_v25 }
 0x20c   :  { %v1900_v6 = vadd.f32 %v2012_v12, %v1892_v38 }
 0x20e   :  { %v1904_v39 = vmax.f32 %v1900_v6, 0.0 }
 0x20f   :  { %v1681_v40 = vpop.f32.mrf.mxu3 }
 0x210   :  { %v1908_v43 = vpack.c.bf16 %v1904_v39, %v1904_v39  ;;  %v1687_v44 = vmax.f32 %v1481_v33, %v1681_v40 }
 0x212   :  { %1913 = vst.msk [vmem:[%s3471_s5 + $0x8] sm:$0xf] %vm1910_vm11, %v1908_v43  ;;  %v1893_v45 = vmax.f32 %v1687_v44, %v1887_v42 }
 0x214   :  { %v1901_v37 = vadd.f32 %v2012_v12, %v1893_v45 }
 0x216   :  { %v1905_v46 = vmax.f32 %v1901_v37, 0.0 }
 0x218   :  { %v1909_v47 = vpack.c.bf16 %v1905_v46, %v1905_v46 }
 0x21a   :  { %1914 = vst.msk [vmem:[%s3471_s5 + $0xc] sm:$0xf] %vm1910_vm11, %v1909_v47 }

// kernel: repsurf_forward.9
= control target key start
LH: loop header
LB: loop body
LE: loop exit
PB: predicated region body
PF: predicated region fallthrough
CT: control target
= control target key end

     0   :  { %vm65_vm0 = vcmask 523264   ;;  %vm99_vm1 = vcmask 519168   ;;  %s198_s1 = inlined_call_operand.vmem [shape: bf16[64,64], index: 1, kind: input, shape index: {}]   ;;  %s199_s2 = inlined_call_operand.vmem [shape: f32[1,64], index: 2, kind: input, shape index: {}]   ;;  %s200_s0 = inlined_call_operand.vmem [shape: bf16[32,64], index: 0, kind: input, shape index: {}]   ;;  %s201_s3 = inlined_call_operand.vmem [shape: bf16[32,64], index: 3, kind: output, shape index: {}]  }
   0x1   :  { %v137_v0 = vld [vmem:[%s198_s1 + $0x18] sm:$0xff]  ;;  %v136_v1 = vld [vmem:[%s198_s1 + $0x10] sm:$0xff]  ;;  %v135_v2 = vld [vmem:[%s198_s1 + $0x8] sm:$0xff] }
   0x2   :  { %76 = vmatpush.bf16.msra.mxu0 %v137_v0  ;;  %140 = vmatpush.bf16.msra.mxu1 %v137_v0  ;;  %v134_v3 = vld [vmem:[%s198_s1] sm:$0xff]  ;;  %v139_v5 = vld [vmem:[%s200_s0 + $0x8] sm:$0xff] }
   0x3   :  { %v138_v4 = vld [vmem:[%s200_s0] sm:$0xff] }
   0x4   :  { %v144_v6 = vld [vmem:[%s199_s2] ss:$0 sm:$0xff] }
   0x6   :  { %77 = vmatpush.bf16.msra.mxu0 %v136_v1  ;;  %141 = vmatpush.bf16.msra.mxu1 %v136_v1 }
   0xa   :  { %78 = vmatpush.bf16.msra.mxu0 %v135_v2  ;;  %142 = vmatpush.bf16.msra.mxu1 %v135_v2 }
   0xe   :  { %79 = vmatpush.bf16.msra.mxu0 %v134_v3  ;;  %143 = vmatpush.bf16.msra.mxu1 %v134_v3 }
  0x11   :  { %132 = vmatmul.msk.bf16.vlgmr.msra.gmra.mxu0 %vm65_vm0, %v138_v4  ;;  %133 = vmatmul.msk.bf16.vlgmr.msra.gmra.mxu1 %vm65_vm0, %v139_v5 }
  0x8e   :  { %v81_v7 = vpop.f32.mrf.mxu0  ;;  %v86_v8 = vpop.f32.mrf.mxu1 }
  0x8f   :  { %v82_v9 = vadd.f32 %v144_v6, %v81_v7  ;;  %v87_v10 = vadd.f32 %v144_v6, %v86_v8 }
  0x91   :  { %v91_v11 = vmax.f32 %v82_v9, 0.0  ;;  %v93_v12 = vmax.f32 %v87_v10, 0.0 }
  0x93   :  { %v95_v13 = vpack.c.bf16 %v91_v11, %v91_v11  ;;  %v97_v14 = vpack.c.bf16 %v93_v12, %v93_v12 }
  0x95   :  { %100 = vst.msk [vmem:[%s201_s3] sm:$0xf] %vm99_vm1, %v95_v13 }
  0x96   :  { %102 = vst.msk [vmem:[%s201_s3 + $0x8] sm:$0xf] %vm99_vm1, %v97_v14  ;;  %v83_v15 = vpop.f32.mrf.mxu0  ;;  %v88_v16 = vpop.f32.mrf.mxu1 }
  0x97   :  { %v84_v17 = vadd.f32 %v144_v6, %v83_v15  ;;  %v89_v18 = vadd.f32 %v144_v6, %v88_v16 }
  0x99   :  { %v92_v19 = vmax.f32 %v84_v17, 0.0  ;;  %v94_v20 = vmax.f32 %v89_v18, 0.0 }
  0x9b   :  { %v96_v21 = vpack.c.bf16 %v92_v19, %v92_v19  ;;  %v98_v22 = vpack.c.bf16 %v94_v20, %v94_v20 }
  0x9d   :  { %101 = vst.msk [vmem:[%s201_s3 + $0x4] sm:$0xf] %vm99_vm1, %v96_v21 }
  0x9e   :  { %103 = vst.msk [vmem:[%s201_s3 + $0xc] sm:$0xf] %vm99_vm1, %v98_v22 }

// kernel: repsurf_forward.12
= control target key start
LH: loop header
LB: loop body
LE: loop exit
PB: predicated region body
PF: predicated region fallthrough
CT: control target
= control target key end

     0   :  { %s785_s12 = smov 0   ;;  %s787_s13 = smov 0   ;;  %s898_s0 = inlined_call_operand.vmem [shape: bf16[2,16,64], index: 0, kind: input, shape index: {}]   ;;  %s899_s1 = inlined_call_operand.vmem [shape: bf16[64,1024], index: 1, kind: input, shape index: {}]   ;;  %s900_s2 = inlined_call_operand.vmem [shape: f32[1,1024], index: 2, kind: input, shape index: {}]   ;;  %s901_s3 = inlined_call_operand.vmem [shape: bf16[2,1,1024], index: 3, kind: output, shape index: {}]  }
   0x1   :  { %s789_s14 = smov 0   ;;  %s791_s15 = smov 0  }
   0x2   :  { %s793_s16 = smov 0   ;;  %s795_s17 = smov 0  }
   0x3   :  { %s797_s18 = smov 0  }
   0x4 LB: > { %s28_s19 = sadd.s32 1, %s754_s16  ;;  %s32_s20 = sadd.s32 1, %s758_s17  ;;  %s762_s18 = sphi %s797_s18, %s13_s18   ;;  %s758_s17 = sphi %s795_s17, %s909_s17   ;;  %s754_s16 = sphi %s793_s16, %s908_s16   ;;  %s750_s15 = sphi %s791_s15, %s907_s15   ;;  %s746_s14 = sphi %s789_s14, %s906_s14   ;;  %s742_s13 = sphi %s787_s13, %s905_s13   ;;  %s738_s12 = sphi %s785_s12, %s904_s12  }
   0x5   : > { %p30_p0 = scmp.ge.s32.totalorder %s28_s19, 4  ;;  %s67_s21 = sadd.s32 1, %s742_s13 }
   0x6   : > { %p74_p1 = scmp.ne.s32.totalorder %s742_s13, %s738_s12  ;;  %p75_p2 = scmp.eq.s32.totalorder %s762_s18, 0 }
   0x7   : > { %s911_s19 = smov (%p30_p0, %s28_s19), 0  ;;  %s913_s20 = smov (!%p30_p0, %s32_s20), %s758_s17 }
   0x8   : > { %s64_s22 = ssub.s32 %s754_s16, %s911_s19  ;;  %p76_p3 = por %p75_p2, %p74_p1 }
   0x9   : > { %p34_p4 = scmp.ge.s32.totalorder %s913_s20, 2  ;;  %p65_p5 = scmp.eq.s32.totalorder %s64_s22, 0 }
   0xa   : > { %p589_p6 = scmp.ge.s32.totalorder %s762_s18, 8 }
   0xb   : > { %s915_s20 = smov (%p34_p4, %s913_s20), 0 }
   0xc   : > { %s834_s23 = scalar_select %p65_p5, %s742_s13, %s67_s21  }
   0xd   : > { %154 = sbr.rel (%p589_p6) target bundleno = 30 (0x1e), region = 16 }
  0x12   : > { %170 = sbr.rel (!%p76_p3) target bundleno = 30 (0x1e), region = 24  ;;  %s172_s24 = sand.u32 (%p76_p3), 1, %s742_s13  }
  0x13   : > { %s640_s25 = sshll.u32 (%p76_p3), %s754_s16, 3  ;;  %s590_s26 = sshll.u32 (%p76_p3), %s172_s24, 6 }
  0x14   : > { %s177_s29 = scalar_lea.vmem (%p76_p3), %s899_s1, %s640_s25  ;;  %s174_s30 = scalar_lea.vmem (%p76_p3), [#allocation3], %s590_s26 }
  0x15   : > { %v220_v0 = vld [vmem:[%s177_s29] sm:$0xff] (%p76_p3) }
  0x16   : > { %v222_v1 = vld [vmem:[%s177_s29 + $0x20] sm:$0xff] (%p76_p3)  ;;  %221 = vst [vmem:[%s174_s30] sm:$0xff] (%p76_p3), %v220_v0 }
  0x17   : > { %v224_v2 = vld [vmem:[%s177_s29 + $0x40] sm:$0xff]  ;;  %223 = vst [vmem:[%s174_s30 + $0x8] sm:$0xff] %v222_v1 }
  0x18   : > { %v226_v3 = vld [vmem:[%s177_s29 + $0x60] sm:$0xff]  ;;  %225 = vst [vmem:[%s174_s30 + $0x10] sm:$0xff] %v224_v2 }
  0x19   : > { %v228_v4 = vld [vmem:[%s177_s29 + $0x80] sm:$0xff]  ;;  %227 = vst [vmem:[%s174_s30 + $0x18] sm:$0xff] %v226_v3 }
  0x1a   : > { %v230_v5 = vld [vmem:[%s177_s29 + $0xa0] sm:$0xff]  ;;  %229 = vst [vmem:[%s174_s30 + $0x20] sm:$0xff] %v228_v4 }
  0x1b   : > { %v232_v6 = vld [vmem:[%s177_s29 + $0xc0] sm:$0xff]  ;;  %231 = vst [vmem:[%s174_s30 + $0x28] sm:$0xff] %v230_v5 }
  0x1c   : > { %v234_v7 = vld [vmem:[%s177_s29 + $0xe0] sm:$0xff]  ;;  %233 = vst [vmem:[%s174_s30 + $0x30] sm:$0xff] %v232_v6 }
  0x1d   : > { %235 = vst [vmem:[%s174_s30 + $0x38] sm:$0xff] %v234_v7 }
  0x1e PF: > { %p593_p7 = scmp.ge.s32.totalorder %s762_s18, 1  ;;  %p248_p8 = scmp.lt.s32.totalorder %s762_s18, 9 }
  0x20   : > { %p249_p9 = pnand %p593_p7, %p248_p8 }
  0x21   : > { %s255_s4 = sand.u32 (!%p249_p9), 1, %s738_s12   ;;  %p295_p10 = scmp.lt.s32.totalorder (!%p249_p9), %s750_s15, 1 }
  0x22   : > { %252 = sbr.rel (%p249_p9) target bundleno = 232 (0xe8), region = 66  ;;  %s594_s5 = sshll.u32 (!%p249_p9), %s255_s4, 6 }
  0x23   : > { %s257_s6 = scalar_lea.vmem (!%p249_p9), [#allocation3], %s594_s5  ;;  %s597_s11 = sshll.u32 (!%p249_p9), %s746_s14, 1 }
  0x24   : > { %p306_p11 = scmp.lt.s32.totalorder (!%p249_p9), %s597_s11, 7 }
  0x27   : > { %v630_v8 = vld [vmem:[%s257_s6 + $0x30] sm:$0xf]  ;;  %v650_v9 = vld [vmem:[%s257_s6 + $0x34] sm:$0xf0]  ;;  %v649_v10 = vld [vmem:[%s257_s6 + $0x34] sm:$0xf]  ;;  %v324_v33 = vlaneseq }
  0x28   : > { %v631_v11 = vor.u32 %v650_v9, %v630_v8  ;;  %v632_v12 = vld [vmem:[%s257_s6 + $0x38] sm:$0xf0]  ;;  %v622_v13 = vld [vmem:[%s257_s6 + $0x20] sm:$0xf]  ;;  %v648_v14 = vld [vmem:[%s257_s6 + $0x24] sm:$0xf0] }
  0x29   : > { %v635_v15 = vor.u32 %v649_v10, %v632_v12  ;;  %v647_v16 = vld [vmem:[%s257_s6 + $0x24] sm:$0xf]  ;;  %v624_v17 = vld [vmem:[%s257_s6 + $0x28] sm:$0xf0]  ;;  %v623_v18 = vor.u32 %v648_v14, %v622_v13  ;;  %v614_v20 = vld [vmem:[%s257_s6 + $0x10] sm:$0xf] }
  0x2a   : > { %392 = vmatpush.bf16.msra.mxu0 %v631_v11  ;;  %v627_v19 = vor.u32 %v647_v16, %v624_v17  ;;  %v646_v21 = vld [vmem:[%s257_s6 + $0x14] sm:$0xf0]  ;;  %v645_v22 = vld [vmem:[%s257_s6 + $0x14] sm:$0xf]  ;;  %v616_v23 = vld [vmem:[%s257_s6 + $0x18] sm:$0xf0] }
  0x2b   : > { %406 = vmatpush.bf16.msra.mxu1 %v635_v15  ;;  %s917_s15 = smov (!%p295_p10, %s750_s15), 1  ;;  %v615_v24 = vor.u32 %v646_v21, %v614_v20  ;;  %v619_v25 = vor.u32 %v645_v22, %v616_v23  ;;  %v606_v26 = vld [vmem:[%s257_s6] sm:$0xf]  ;;  %v644_v27 = vld [vmem:[%s257_s6 + $0x4] sm:$0xf0]  ;;  %vm384_vm0 = vcmask 523264  }
  0x2c   : > { %s641_s7 = sshll.u32 %s917_s15, 3  ;;  %v643_v28 = vld [vmem:[%s257_s6 + $0x4] sm:$0xf]  ;;  %v608_v29 = vld [vmem:[%s257_s6 + $0x8] sm:$0xf0]  ;;  %v607_v30 = vor.u32 %v644_v27, %v606_v26  ;;  %vm857_vm1 = vcmp.lt.s32.totalorder %v324_v33, 256 }
  0x2d   : > { %s302_s10 = scalar_lea.vmem %s898_s0, %s641_s7  ;;  %v611_v31 = vor.u32 %v643_v28, %v608_v29  ;;  %v764_v35 = vmov -inf   ;;  %vm434_vm2 = vcmask 1040384   ;;  %s919_s11 = smov (!%p306_p11, %s597_s11), 7  ;;  %vm463_vm3 = vsmask.f32 256 }
  0x2e   : > { %393 = vmatpush.bf16.msra.mxu0 %v623_v18  ;;  %v642_v32 = vld [vmem:[%s302_s10] sm:$0xff]  ;;  %328 = vst.msk [vmem:[#allocation2] sm:$0x3] %vm857_vm1, %v764_v35  ;;  %s308_s14 = scalar_lea.vmem %s900_s2, %s919_s11  ;;  %s316_s22 = sadd.s32 %s641_s7, %s919_s11  ;;  %vm465_vm4 = vcmask 1041409   ;;  %vm466_vm5 = vsmask.f32 1280  ;;  %vm464_vm6 = vmand %vm434_vm2, %vm463_vm3 }
  0x2f   : > { %407 = vmatpush.bf16.msra.mxu1 %v627_v19  ;;  %v447_v58 = vld [vmem:[%s308_s14] sm:$0x3]  ;;  %s317_s26 = scalar_lea.vmem %s901_s3, %s316_s22  ;;  %vm467_vm7 = vmand %vm465_vm4, %vm466_vm5 }
  0x30   : > { %v469_v1 = vld [vmem:[%s317_s26] sm:$0x3]  ;;  %vm468_vm8 = vmor %vm467_vm7, %vm464_vm6 }
  0x32   : > { %394 = vmatpush.bf16.msra.mxu0 %v615_v24 }
  0x33   : > { %408 = vmatpush.bf16.msra.mxu1 %v619_v25 }
  0x35   : > { %v416_v54 = vld [vmem:[#allocation2] sm:$0x3] }
  0x36   : > { %395 = vmatpush.bf16.msra.mxu0 %v607_v30 }
  0x37   : > { %409 = vmatpush.bf16.msra.mxu1 %v611_v31 }
  0x39   : > { %636 = vmatmul.msk.bf16.vlgmr.msra.gmra.mxu0 %vm384_vm0, %v642_v32 }
  0x3a   : > { %637 = vmatmul.msk.bf16.vlgmr.msra.gmra.mxu1 %vm384_vm0, %v642_v32 }
  0xb6   : > { %v397_v36 = vpop.f32.mrf.mxu0 }
  0xb7   : > { %v411_v37 = vpop.f32.mrf.mxu1 }
  0xbe   : > { %v399_v38 = vpop.f32.mrf.mxu0 }
  0xbf   : > { %v417_v39 = vmax.f32 %v397_v36, %v399_v38  ;;  %v413_v40 = vpop.f32.mrf.mxu1 }
  0xc0   : > { %v424_v41 = vmax.f32 %v411_v37, %v413_v40 }
  0xc1   : > { %v418_v42 = vrot.slane %v417_v39, 4 }
  0xc2   : > { %v425_v43 = vrot.slane %v424_v41, 4 }
  0xc3   : > { %v419_v44 = vmax.f32 %v417_v39, %v418_v42 }
  0xc4   : > { %v426_v45 = vmax.f32 %v424_v41, %v425_v43 }
  0xc5   : > { %v420_v46 = vrot.slane %v419_v44, 2 }
  0xc6   : > { %v427_v47 = vrot.slane %v426_v45, 2 }
  0xc7   : > { %v421_v48 = vmax.f32 %v419_v44, %v420_v46 }
  0xc8   : > { %v428_v49 = vmax.f32 %v426_v45, %v427_v47 }
  0xc9   : > { %v422_v50 = vrot.slane %v421_v48, 1 }
  0xca   : > { %v429_v51 = vrot.slane %v428_v49, 1 }
  0xcb   : > { %v423_v53 = vmax.f32 %v421_v48, %v422_v50 }
  0xcc   : > { %v430_v52 = vmax.f32 %v428_v49, %v429_v51 }
  0xce   : > { %v433_v55 = vrot.slane %v430_v52, 7 }
  0xd0   : > { %v435_v56 = vsel %vm434_vm2, %v423_v53, %v433_v55 }
  0xd1   : > { %v437_v57 = vmax.f32 %v416_v54, %v435_v56 }
  0xd3   : > { %442 = vst.msk [vmem:[#allocation2] sm:$0x3] %vm857_vm1, %v437_v57 }
  0xda   : > { %v446_v59 = vld [vmem:[#allocation2] sm:$0x3] }
  0xdb   : > { %v448_v60 = vadd.f32 %v447_v58, %v446_v59 }
  0xdd   : > { %v449_v61 = vmax.f32 %v448_v60, 0.0 }
  0xdf   : > { %v451_v62 = vperm.slane %v449_v61, 0  ;;  %v452_v63 = vperm.slane %v449_v61, 1 }
  0xe1   : > { %v455_v0 = vpack.c.bf16 %v452_v63, %v451_v62 }
  0xe3   : > { %v457_v2 = vrot.slane %v455_v0, 3 }
  0xe5   : > { %v460_v3 = vsel %vm434_vm2, %v455_v0, %v457_v2 }
  0xe6   : > { %v470_v4 = vsel %vm468_vm8, %v460_v3, %v469_v1 }
  0xe7   : > { %471 = vst [vmem:[%s317_s26] sm:$0x3] %v470_v4 }
  0xe8 PF: > { %s13_s18 = sadd.s32 1, %s762_s18   ;;  %s904_s12 = smov %s742_s13 }
  0xe9   : > { %p10_p12 = scmp.ge.s32.totalorder %s13_s18, 10   ;;  %s905_s13 = smov %s834_s23 }
  0xea   : > { %s906_s14 = smov %s754_s16  ;;  %s907_s15 = smov %s758_s17 }
  0xeb   : > { %s908_s16 = smov %s911_s19  ;;  %s909_s17 = smov %s915_s20 }
  0xec   :  { %12 = sbr.rel (!%p10_p12) target bundleno = 4 (0x4), region = 119 }

// kernel: repsurf_forward.13
= control target key start
LH: loop header
LB: loop body
LE: loop exit
PB: predicated region body
PF: predicated region fallthrough
CT: control target
= control target key end

     0   :  { %vm956_vm0 = vcmask 523264   ;;  %vm2982_vm1 = vcmask 257024   ;;  %s6867_s1 = inlined_call_operand.vmem [shape: bf16[1088,512], index: 1, kind: input, shape index: {}]   ;;  %s6868_s0 = inlined_call_operand.vmem [shape: bf16[32,1088], index: 0, kind: input, shape index: {}]   ;;  %s6869_s2 = inlined_call_operand.vmem [shape: f32[1,512], index: 2, kind: input, shape index: {}]   ;;  %s6870_s3 = inlined_call_operand.vmem [shape: bf16[512,128], index: 3, kind: input, shape index: {}]   ;;  %s6871_s4 = inlined_call_operand.vmem [shape: f32[1,128], index: 4, kind: input, shape index: {}]   ;;  %s6872_s5 = inlined_call_operand.vmem [shape: bf16[128,32], index: 5, kind: input, shape index: {}]   ;;  %s6873_s6 = inlined_call_operand.vmem [shape: bf16[32,32], index: 6, kind: output, shape index: {}]  }
   0x1   :  { %v3121_v0 = vld [vmem:[%s6867_s1 + $0xe0] sm:$0xf]  ;;  %v4384_v1 = vld [vmem:[%s6867_s1 + $0xec] sm:$0xf0] }
   0x2   :  { %v3185_v2 = vld [vmem:[%s6867_s1 + $0x1e0] sm:$0xf]  ;;  %v3122_v3 = vor.u32 %v4384_v1, %v3121_v0  ;;  %v4400_v4 = vld [vmem:[%s6867_s1 + $0x1ec] sm:$0xf0] }
   0x3   :  { %v3249_v5 = vld [vmem:[%s6867_s1 + $0x2e0] sm:$0xf]  ;;  %v4416_v6 = vld [vmem:[%s6867_s1 + $0x2ec] sm:$0xf0]  ;;  %v3186_v7 = vor.u32 %v4400_v4, %v3185_v2 }
   0x4   :  { %v3250_v8 = vor.u32 %v4416_v6, %v3249_v5  ;;  %v3313_v9 = vld [vmem:[%s6867_s1 + $0x3e0] sm:$0xf]  ;;  %v4432_v10 = vld [vmem:[%s6867_s1 + $0x3ec] sm:$0xf0]  ;;  %963 = vmatpush.bf16.msra.mxu0 %v3122_v3 }
   0x5   :  { %v3113_v11 = vld [vmem:[%s6867_s1 + $0xc0] sm:$0xf]  ;;  %v3314_v12 = vor.u32 %v4432_v10, %v3313_v9  ;;  %v4382_v13 = vld [vmem:[%s6867_s1 + $0xcc] sm:$0xf0]  ;;  %982 = vmatpush.bf16.msra.mxu1 %v3186_v7 }
   0x6   :  { %v3177_v14 = vld [vmem:[%s6867_s1 + $0x1c0] sm:$0xf]  ;;  %v4398_v15 = vld [vmem:[%s6867_s1 + $0x1cc] sm:$0xf0]  ;;  %1001 = vmatpush.bf16.msra.mxu2 %v3250_v8  ;;  %v3114_v16 = vor.u32 %v4382_v13, %v3113_v11 }
   0x7   :  { %v3178_v17 = vor.u32 %v4398_v15, %v3177_v14  ;;  %v3241_v18 = vld [vmem:[%s6867_s1 + $0x2c0] sm:$0xf]  ;;  %v4414_v19 = vld [vmem:[%s6867_s1 + $0x2cc] sm:$0xf0]  ;;  %1020 = vmatpush.bf16.msra.mxu3 %v3314_v12 }
   0x8   :  { %v3305_v20 = vld [vmem:[%s6867_s1 + $0x3c0] sm:$0xf]  ;;  %v3242_v21 = vor.u32 %v4414_v19, %v3241_v18  ;;  %v4430_v22 = vld [vmem:[%s6867_s1 + $0x3cc] sm:$0xf0]  ;;  %964 = vmatpush.bf16.msra.mxu0 %v3114_v16 }
   0x9   :  { %v3105_v23 = vld [vmem:[%s6867_s1 + $0xa0] sm:$0xf]  ;;  %v4380_v24 = vld [vmem:[%s6867_s1 + $0xac] sm:$0xf0]  ;;  %v3306_v25 = vor.u32 %v4430_v22, %v3305_v20  ;;  %983 = vmatpush.bf16.msra.mxu1 %v3178_v17 }
   0xa   :  { %v3169_v26 = vld [vmem:[%s6867_s1 + $0x1a0] sm:$0xf]  ;;  %v4396_v27 = vld [vmem:[%s6867_s1 + $0x1ac] sm:$0xf0]  ;;  %v3106_v29 = vor.u32 %v4380_v24, %v3105_v23  ;;  %1002 = vmatpush.bf16.msra.mxu2 %v3242_v21 }
   0xb   :  { %v3233_v28 = vld [vmem:[%s6867_s1 + $0x2a0] sm:$0xf]  ;;  %v4412_v30 = vld [vmem:[%s6867_s1 + $0x2ac] sm:$0xf0]  ;;  %v3170_v33 = vor.u32 %v4396_v27, %v3169_v26  ;;  %1021 = vmatpush.bf16.msra.mxu3 %v3306_v25 }
   0xc   :  { %v3297_v31 = vld [vmem:[%s6867_s1 + $0x3a0] sm:$0xf]  ;;  %v4428_v32 = vld [vmem:[%s6867_s1 + $0x3ac] sm:$0xf0]  ;;  %v3234_v34 = vor.u32 %v4412_v30, %v3233_v28  ;;  %965 = vmatpush.bf16.msra.mxu0 %v3106_v29  ;;  %v4355_v29 = vld [vmem:[%s6868_s0 + $0x20] sm:$0xf0] }
   0xd   :  { %v3097_v35 = vld [vmem:[%s6867_s1 + $0x80] sm:$0xf]  ;;  %v4378_v36 = vld [vmem:[%s6867_s1 + $0x8c] sm:$0xf0]  ;;  %v3298_v38 = vor.u32 %v4428_v32, %v3297_v31  ;;  %984 = vmatpush.bf16.msra.mxu1 %v3170_v33  ;;  %v4351_v30 = vld [vmem:[%s6868_s0 + $0x4] sm:$0xf] }
   0xe   :  { %v3161_v37 = vld [vmem:[%s6867_s1 + $0x180] sm:$0xf]  ;;  %v4394_v39 = vld [vmem:[%s6867_s1 + $0x18c] sm:$0xf0]  ;;  %v3098_v44 = vor.u32 %v4378_v36, %v3097_v35  ;;  %1003 = vmatpush.bf16.msra.mxu2 %v3234_v34  ;;  %v2995_v31 = vld [vmem:[%s6868_s0 + $0x24] sm:$0xf0] }
   0xf   :  { %v3225_v40 = vld [vmem:[%s6867_s1 + $0x280] sm:$0xf]  ;;  %v4410_v41 = vld [vmem:[%s6867_s1 + $0x28c] sm:$0xf0]  ;;  %v3162_v45 = vor.u32 %v4394_v39, %v3161_v37  ;;  %1022 = vmatpush.bf16.msra.mxu3 %v3298_v38  ;;  %v3001_v35 = vld [vmem:[%s6868_s0 + $0x8] sm:$0xf] }
  0x10   :  { %v3289_v42 = vld [vmem:[%s6867_s1 + $0x380] sm:$0xf]  ;;  %v4426_v43 = vld [vmem:[%s6867_s1 + $0x38c] sm:$0xf0]  ;;  %v3226_v46 = vor.u32 %v4410_v41, %v3225_v40  ;;  %966 = vmatpush.bf16.msra.mxu0 %v3098_v44  ;;  %v4356_v40 = vld [vmem:[%s6868_s0 + $0x28] sm:$0xf0] }
  0x11   :  { %v3089_v47 = vld [vmem:[%s6867_s1 + $0x60] sm:$0xf]  ;;  %v4376_v48 = vld [vmem:[%s6867_s1 + $0x6c] sm:$0xf0]  ;;  %v3290_v50 = vor.u32 %v4426_v43, %v3289_v42  ;;  %985 = vmatpush.bf16.msra.mxu1 %v3162_v45  ;;  %v4352_v41 = vld [vmem:[%s6868_s0 + $0xc] sm:$0xf] }
  0x12   :  { %v3153_v49 = vld [vmem:[%s6867_s1 + $0x160] sm:$0xf]  ;;  %v4392_v51 = vld [vmem:[%s6867_s1 + $0x16c] sm:$0xf0]  ;;  %v3090_v56 = vor.u32 %v4376_v48, %v3089_v47  ;;  %1004 = vmatpush.bf16.msra.mxu2 %v3226_v46 }
  0x13   :  { %v3217_v52 = vld [vmem:[%s6867_s1 + $0x260] sm:$0xf]  ;;  %v4408_v53 = vld [vmem:[%s6867_s1 + $0x26c] sm:$0xf0]  ;;  %v3154_v57 = vor.u32 %v4392_v51, %v3153_v49  ;;  %1023 = vmatpush.bf16.msra.mxu3 %v3290_v50 }
  0x14   :  { %v3281_v54 = vld [vmem:[%s6867_s1 + $0x360] sm:$0xf]  ;;  %v4424_v55 = vld [vmem:[%s6867_s1 + $0x36c] sm:$0xf0]  ;;  %v3218_v58 = vor.u32 %v4408_v53, %v3217_v52  ;;  %967 = vmatpush.bf16.msra.mxu0 %v3090_v56  ;;  %v4982_v53 = vor.u32 %v4351_v30, %v2995_v31 }
  0x15   :  { %v3081_v59 = vld [vmem:[%s6867_s1 + $0x40] sm:$0xf]  ;;  %v4374_v60 = vld [vmem:[%s6867_s1 + $0x4c] sm:$0xf0]  ;;  %v3282_v62 = vor.u32 %v4424_v55, %v3281_v54  ;;  %986 = vmatpush.bf16.msra.mxu1 %v3154_v57  ;;  %v4984_v54 = vor.u32 %v4356_v40, %v3001_v35 }
  0x16   :  { %v3145_v61 = vld [vmem:[%s6867_s1 + $0x140] sm:$0xf]  ;;  %v4390_v63 = vld [vmem:[%s6867_s1 + $0x14c] sm:$0xf0]  ;;  %v3082_v4 = vor.u32 %v4374_v60, %v3081_v59  ;;  %1005 = vmatpush.bf16.msra.mxu2 %v3218_v58 }
  0x17   :  { %v3209_v0 = vld [vmem:[%s6867_s1 + $0x240] sm:$0xf]  ;;  %v4406_v1 = vld [vmem:[%s6867_s1 + $0x24c] sm:$0xf0]  ;;  %v3146_v5 = vor.u32 %v4390_v63, %v3145_v61  ;;  %1024 = vmatpush.bf16.msra.mxu3 %v3282_v62 }
  0x18   :  { %v3273_v2 = vld [vmem:[%s6867_s1 + $0x340] sm:$0xf]  ;;  %v4422_v3 = vld [vmem:[%s6867_s1 + $0x34c] sm:$0xf0]  ;;  %v3210_v6 = vor.u32 %v4406_v1, %v3209_v0  ;;  %968 = vmatpush.bf16.msra.mxu0 %v3082_v4 }
  0x19   :  { %v3073_v7 = vld [vmem:[%s6867_s1 + $0x20] sm:$0xf]  ;;  %v4372_v8 = vld [vmem:[%s6867_s1 + $0x2c] sm:$0xf0]  ;;  %v3274_v10 = vor.u32 %v4422_v3, %v3273_v2  ;;  %987 = vmatpush.bf16.msra.mxu1 %v3146_v5 }
  0x1a   :  { %v3137_v9 = vld [vmem:[%s6867_s1 + $0x120] sm:$0xf]  ;;  %v4388_v11 = vld [vmem:[%s6867_s1 + $0x12c] sm:$0xf0]  ;;  %v3074_v17 = vor.u32 %v4372_v8, %v3073_v7  ;;  %1006 = vmatpush.bf16.msra.mxu2 %v3210_v6 }
  0x1b   :  { %v3201_v12 = vld [vmem:[%s6867_s1 + $0x220] sm:$0xf]  ;;  %v4404_v13 = vld [vmem:[%s6867_s1 + $0x22c] sm:$0xf0]  ;;  %v3138_v21 = vor.u32 %v4388_v11, %v3137_v9  ;;  %1025 = vmatpush.bf16.msra.mxu3 %v3274_v10 }
  0x1c   :  { %v3265_v14 = vld [vmem:[%s6867_s1 + $0x320] sm:$0xf]  ;;  %v4420_v15 = vld [vmem:[%s6867_s1 + $0x32c] sm:$0xf0]  ;;  %v3202_v22 = vor.u32 %v4404_v13, %v3201_v12  ;;  %969 = vmatpush.bf16.msra.mxu0 %v3074_v17 }
  0x1d   :  { %v3065_v16 = vld [vmem:[%s6867_s1] sm:$0xf]  ;;  %v4370_v18 = vld [vmem:[%s6867_s1 + $0xc] sm:$0xf0]  ;;  %v3266_v26 = vor.u32 %v4420_v15, %v3265_v14  ;;  %988 = vmatpush.bf16.msra.mxu1 %v3138_v21 }
  0x1e   :  { %v3129_v19 = vld [vmem:[%s6867_s1 + $0x100] sm:$0xf]  ;;  %v4386_v20 = vld [vmem:[%s6867_s1 + $0x10c] sm:$0xf0]  ;;  %v3066_v34 = vor.u32 %v4370_v18, %v3065_v16  ;;  %1007 = vmatpush.bf16.msra.mxu2 %v3202_v22 }
  0x1f   :  { %v3193_v23 = vld [vmem:[%s6867_s1 + $0x200] sm:$0xf]  ;;  %v4402_v24 = vld [vmem:[%s6867_s1 + $0x20c] sm:$0xf0]  ;;  %v3130_v38 = vor.u32 %v4386_v20, %v3129_v19  ;;  %1026 = vmatpush.bf16.msra.mxu3 %v3266_v26  ;;  %v4364_v26 = vld [vmem:[%s6868_s0 + $0x68] sm:$0xf0] }
  0x20   :  { %v3257_v25 = vld [vmem:[%s6867_s1 + $0x300] sm:$0xf]  ;;  %v4418_v27 = vld [vmem:[%s6867_s1 + $0x30c] sm:$0xf0]  ;;  %v3194_v39 = vor.u32 %v4402_v24, %v3193_v23  ;;  %970 = vmatpush.bf16.msra.mxu0 %v3066_v34 }
  0x21   :  { %v2993_v28 = vld [vmem:[%s6868_s0] sm:$0xf]  ;;  %v4480_v33 = vld [vmem:[%s6867_s1 + $0x6ec] sm:$0xf0]  ;;  %v3258_v43 = vor.u32 %v4418_v27, %v3257_v25  ;;  %989 = vmatpush.bf16.msra.mxu1 %v3130_v38  ;;  %v3029_v25 = vld [vmem:[%s6868_s0 + $0x48] sm:$0xf] }
  0x22   :  { %v3505_v32 = vld [vmem:[%s6867_s1 + $0x6e0] sm:$0xf]  ;;  %v4464_v37 = vld [vmem:[%s6867_s1 + $0x5ec] sm:$0xf0]  ;;  %v4971_v48 = vor.u32 %v4355_v29, %v2993_v28  ;;  %1008 = vmatpush.bf16.msra.mxu2 %v3194_v39  ;;  %v4360_v28 = vld [vmem:[%s6868_s0 + $0x4c] sm:$0xf] }
  0x23   :  { %v3441_v36 = vld [vmem:[%s6867_s1 + $0x5e0] sm:$0xf]  ;;  %v3003_v42 = vld [vmem:[%s6868_s0 + $0x2c] sm:$0xf0]  ;;  %v3506_v44 = vor.u32 %v4480_v33, %v3505_v32  ;;  %1027 = vmatpush.bf16.msra.mxu3 %v3258_v43  ;;  %v3039_v38 = vld [vmem:[%s6868_s0 + $0x74] sm:$0xf0] }
  0x24   :  { %v3377_v45 = vld [vmem:[%s6867_s1 + $0x4e0] sm:$0xf]  ;;  %v4448_v46 = vld [vmem:[%s6867_s1 + $0x4ec] sm:$0xf0]  ;;  %v3442_v49 = vor.u32 %v4464_v37, %v3441_v36  ;;  %v4992_v57 = vor.u32 %v4352_v41, %v3003_v42  ;;  %971 = vmatmul.bf16.vlgmr.msra.gmra.mxu0 %v4971_v48  ;;  %990 = vmatmul.bf16.vlgmr.msra.gmra.mxu1 %v4982_v53  ;;  %v4365_v36 = vld [vmem:[%s6868_s0 + $0x70] sm:$0xf0] }
  0x25   :  { %v3569_v47 = vld [vmem:[%s6867_s1 + $0x7e0] sm:$0xf]  ;;  %v4496_v50 = vld [vmem:[%s6867_s1 + $0x7ec] sm:$0xf0]  ;;  %v3378_v58 = vor.u32 %v4448_v46, %v3377_v45  ;;  %1009 = vmatmul.bf16.vlgmr.msra.gmra.mxu2 %v4984_v54  ;;  %v4361_v37 = vld [vmem:[%s6868_s0 + $0x54] sm:$0xf] }
  0x26   :  { %v3497_v51 = vld [vmem:[%s6867_s1 + $0x6c0] sm:$0xf]  ;;  %v4478_v52 = vld [vmem:[%s6867_s1 + $0x6cc] sm:$0xf0]  ;;  %1077 = vmatpush.bf16.msrb.mxu2 %v3506_v44  ;;  %v3570_v59 = vor.u32 %v4496_v50, %v3569_v47  ;;  %1058 = vmatpush.bf16.msrb.mxu1 %v3442_v49  ;;  %v5103_v44 = vor.u32 %v4364_v26, %v3029_v25 }
  0x27   :  { %v3433_v55 = vld [vmem:[%s6867_s1 + $0x5c0] sm:$0xf]  ;;  %v4462_v56 = vld [vmem:[%s6867_s1 + $0x5cc] sm:$0xf0]  ;;  %v3498_v60 = vor.u32 %v4478_v52, %v3497_v51  ;;  %1028 = vmatmul.bf16.vlgmr.msra.gmra.mxu3 %v4992_v57  ;;  %1039 = vmatpush.bf16.msrb.mxu0 %v3378_v58 }
  0x28   :  { %v3369_v61 = vld [vmem:[%s6867_s1 + $0x4c0] sm:$0xf]  ;;  %v4446_v62 = vld [vmem:[%s6867_s1 + $0x4cc] sm:$0xf0]  ;;  %v3434_v0 = vor.u32 %v4462_v56, %v3433_v55  ;;  %1096 = vmatpush.bf16.msrb.mxu3 %v3570_v59  ;;  %v5124_v56 = vor.u32 %v4361_v37, %v3039_v38 }
  0x29   :  { %v3561_v63 = vld [vmem:[%s6867_s1 + $0x7c0] sm:$0xf]  ;;  %v4494_v1 = vld [vmem:[%s6867_s1 + $0x7cc] sm:$0xf0]  ;;  %v3370_v6 = vor.u32 %v4446_v62, %v3369_v61 }
  0x2a   :  { %v3489_v2 = vld [vmem:[%s6867_s1 + $0x6a0] sm:$0xf]  ;;  %v4476_v3 = vld [vmem:[%s6867_s1 + $0x6ac] sm:$0xf0]  ;;  %1078 = vmatpush.bf16.msrb.mxu2 %v3498_v60  ;;  %v3562_v7 = vor.u32 %v4494_v1, %v3561_v63  ;;  %1059 = vmatpush.bf16.msrb.mxu1 %v3434_v0 }
  0x2b   :  { %v3425_v4 = vld [vmem:[%s6867_s1 + $0x5a0] sm:$0xf]  ;;  %v4460_v5 = vld [vmem:[%s6867_s1 + $0x5ac] sm:$0xf0]  ;;  %v3490_v8 = vor.u32 %v4476_v3, %v3489_v2  ;;  %1040 = vmatpush.bf16.msrb.mxu0 %v3370_v6 }
  0x2c   :  { %v3361_v9 = vld [vmem:[%s6867_s1 + $0x4a0] sm:$0xf]  ;;  %v4444_v10 = vld [vmem:[%s6867_s1 + $0x4ac] sm:$0xf0]  ;;  %v3426_v12 = vor.u32 %v4460_v5, %v3425_v4  ;;  %1097 = vmatpush.bf16.msrb.mxu3 %v3562_v7 }
  0x2d   :  { %v3553_v11 = vld [vmem:[%s6867_s1 + $0x7a0] sm:$0xf]  ;;  %v4492_v13 = vld [vmem:[%s6867_s1 + $0x7ac] sm:$0xf0]  ;;  %v3362_v18 = vor.u32 %v4444_v10, %v3361_v9 }
  0x2e   :  { %v3481_v14 = vld [vmem:[%s6867_s1 + $0x680] sm:$0xf]  ;;  %v4474_v15 = vld [vmem:[%s6867_s1 + $0x68c] sm:$0xf0]  ;;  %1079 = vmatpush.bf16.msrb.mxu2 %v3490_v8  ;;  %v3554_v22 = vor.u32 %v4492_v13, %v3553_v11  ;;  %1060 = vmatpush.bf16.msrb.mxu1 %v3426_v12 }
  0x2f   :  { %v3417_v16 = vld [vmem:[%s6867_s1 + $0x580] sm:$0xf]  ;;  %v4458_v17 = vld [vmem:[%s6867_s1 + $0x58c] sm:$0xf0]  ;;  %v3482_v23 = vor.u32 %v4474_v15, %v3481_v14  ;;  %1041 = vmatpush.bf16.msrb.mxu0 %v3362_v18  ;;  %v4399_v18 = vld [vmem:[%s6867_s1 + $0x1e4] sm:$0xf] }
  0x30   :  { %v3353_v19 = vld [vmem:[%s6867_s1 + $0x480] sm:$0xf]  ;;  %v4442_v20 = vld [vmem:[%s6867_s1 + $0x48c] sm:$0xf0]  ;;  %v3418_v27 = vor.u32 %v4458_v17, %v3417_v16  ;;  %1098 = vmatpush.bf16.msrb.mxu3 %v3554_v22  ;;  %v4383_v22 = vld [vmem:[%s6867_s1 + $0xe4] sm:$0xf] }
  0x31   :  { %v3545_v21 = vld [vmem:[%s6867_s1 + $0x780] sm:$0xf]  ;;  %v4490_v24 = vld [vmem:[%s6867_s1 + $0x78c] sm:$0xf0]  ;;  %v3354_v35 = vor.u32 %v4442_v20, %v3353_v19  ;;  %v3187_v19 = vld [vmem:[%s6867_s1 + $0x1f0] sm:$0xf0] }
  0x32   :  { %v3031_v29 = vld [vmem:[%s6868_s0 + $0x6c] sm:$0xf0]  ;;  %v3473_v30 = vld [vmem:[%s6867_s1 + $0x660] sm:$0xf]  ;;  %1080 = vmatpush.bf16.msrb.mxu2 %v3482_v23  ;;  %v3546_v39 = vor.u32 %v4490_v24, %v3545_v21  ;;  %1061 = vmatpush.bf16.msrb.mxu1 %v3418_v27  ;;  %v3123_v23 = vld [vmem:[%s6867_s1 + $0xf0] sm:$0xf0] }
  0x33   :  { %v4472_v31 = vld [vmem:[%s6867_s1 + $0x66c] sm:$0xf0]  ;;  %v3409_v33 = vld [vmem:[%s6867_s1 + $0x560] sm:$0xf]  ;;  %v5114_v50 = vor.u32 %v4360_v28, %v3031_v29  ;;  %1042 = vmatpush.bf16.msrb.mxu0 %v3354_v35  ;;  %v4415_v35 = vld [vmem:[%s6867_s1 + $0x2e4] sm:$0xf]  ;;  %v3126_v38 = vor.u32 %v4383_v22, %v3123_v23 }
  0x34   :  { %v3037_v32 = vld [vmem:[%s6868_s0 + $0x50] sm:$0xf]  ;;  %v3474_v40 = vor.u32 %v4472_v31, %v3473_v30  ;;  %v3345_v41 = vld [vmem:[%s6867_s1 + $0x460] sm:$0xf]  ;;  %1099 = vmatpush.bf16.msrb.mxu3 %v3546_v39  ;;  %976 = vmatmul.bf16.gmra.mxu0 %v5103_v44  ;;  %v4357_v31 = vld [vmem:[%s6868_s0 + $0x30] sm:$0xf0] }
  0x35   :  { %v4456_v34 = vld [vmem:[%s6867_s1 + $0x56c] sm:$0xf0]  ;;  %v3537_v43 = vld [vmem:[%s6867_s1 + $0x760] sm:$0xf]  ;;  %v5116_v51 = vor.u32 %v4365_v36, %v3037_v32  ;;  %995 = vmatmul.bf16.gmra.mxu1 %v5114_v50  ;;  %v4353_v32 = vld [vmem:[%s6868_s0 + $0x14] sm:$0xf] }
  0x36   :  { %v4440_v42 = vld [vmem:[%s6867_s1 + $0x46c] sm:$0xf0]  ;;  %v3410_v45 = vor.u32 %v4456_v34, %v3409_v33  ;;  %v3465_v47 = vld [vmem:[%s6867_s1 + $0x640] sm:$0xf]  ;;  %1081 = vmatpush.bf16.msrb.mxu2 %v3474_v40  ;;  %v3011_v33 = vld [vmem:[%s6868_s0 + $0x34] sm:$0xf0]  ;;  %v3190_v34 = vor.u32 %v4399_v18, %v3187_v19 }
  0x37   :  { %v4488_v46 = vld [vmem:[%s6867_s1 + $0x76c] sm:$0xf0]  ;;  %v3401_v52 = vld [vmem:[%s6867_s1 + $0x540] sm:$0xf]  ;;  %v3346_v58 = vor.u32 %v4440_v42, %v3345_v41  ;;  %1014 = vmatmul.bf16.gmra.mxu2 %v5116_v51  ;;  %1033 = vmatmul.bf16.gmra.mxu3 %v5124_v56  ;;  %v3251_v39 = vld [vmem:[%s6867_s1 + $0x2f0] sm:$0xf0] }
  0x38   :  { %v4470_v49 = vld [vmem:[%s6867_s1 + $0x64c] sm:$0xf0]  ;;  %v3538_v59 = vor.u32 %v4488_v46, %v3537_v43  ;;  %v3337_v61 = vld [vmem:[%s6867_s1 + $0x440] sm:$0xf]  ;;  %1062 = vmatpush.bf16.msrb.mxu1 %v3410_v45  ;;  %v4397_v40 = vld [vmem:[%s6867_s1 + $0x1c4] sm:$0xf] }
  0x39   :  { %v4454_v55 = vld [vmem:[%s6867_s1 + $0x54c] sm:$0xf0]  ;;  %v3466_v60 = vor.u32 %v4470_v49, %v3465_v47  ;;  %v3529_v63 = vld [vmem:[%s6867_s1 + $0x740] sm:$0xf]  ;;  %1043 = vmatpush.bf16.msrb.mxu0 %v3346_v58  ;;  %v3179_v41 = vld [vmem:[%s6867_s1 + $0x1d0] sm:$0xf0] }
  0x3a   :  { %v4438_v62 = vld [vmem:[%s6867_s1 + $0x44c] sm:$0xf0]  ;;  %v3402_v0 = vor.u32 %v4454_v55, %v3401_v52  ;;  %v3457_v2 = vld [vmem:[%s6867_s1 + $0x620] sm:$0xf]  ;;  %1100 = vmatpush.bf16.msrb.mxu3 %v3538_v59  ;;  %v3017_v43 = vld [vmem:[%s6868_s0 + $0x18] sm:$0xf]  ;;  %v3254_v59 = vor.u32 %v4415_v35, %v3251_v39 }
  0x3b   :  { %v4486_v1 = vld [vmem:[%s6867_s1 + $0x74c] sm:$0xf0]  ;;  %v3393_v4 = vld [vmem:[%s6867_s1 + $0x520] sm:$0xf]  ;;  %v3338_v6 = vor.u32 %v4438_v62, %v3337_v61  ;;  %1082 = vmatpush.bf16.msrb.mxu2 %v3466_v60  ;;  %v4358_v45 = vld [vmem:[%s6868_s0 + $0x38] sm:$0xf0]  ;;  %v3182_v60 = vor.u32 %v4397_v40, %v3179_v41 }
  0x3c   :  { %v4468_v3 = vld [vmem:[%s6867_s1 + $0x62c] sm:$0xf0]  ;;  %v3329_v7 = vld [vmem:[%s6867_s1 + $0x420] sm:$0xf]  ;;  %v3530_v8 = vor.u32 %v4486_v1, %v3529_v63  ;;  %1063 = vmatpush.bf16.msrb.mxu1 %v3402_v0  ;;  %v4354_v46 = vld [vmem:[%s6868_s0 + $0x1c] sm:$0xf]  ;;  %v5261_v1 = vor.u32 %v4353_v32, %v3011_v33 }
  0x3d   :  { %v4452_v5 = vld [vmem:[%s6867_s1 + $0x52c] sm:$0xf0]  ;;  %v3458_v9 = vor.u32 %v4468_v3, %v3457_v2  ;;  %v3521_v11 = vld [vmem:[%s6867_s1 + $0x720] sm:$0xf]  ;;  %1044 = vmatpush.bf16.msrb.mxu0 %v3338_v6  ;;  %v4381_v55 = vld [vmem:[%s6867_s1 + $0xc4] sm:$0xf] }
  0x3e   :  { %v4436_v10 = vld [vmem:[%s6867_s1 + $0x42c] sm:$0xf0]  ;;  %v3394_v13 = vor.u32 %v4452_v5, %v3393_v4  ;;  %v3449_v14 = vld [vmem:[%s6867_s1 + $0x600] sm:$0xf]  ;;  %1101 = vmatpush.bf16.msrb.mxu3 %v3530_v8  ;;  %v3115_v58 = vld [vmem:[%s6867_s1 + $0xd0] sm:$0xf0]  ;;  %v5272_v5 = vor.u32 %v4358_v45, %v3017_v43 }
  0x3f   :  { %v4484_v12 = vld [vmem:[%s6867_s1 + $0x72c] sm:$0xf0]  ;;  %v3385_v16 = vld [vmem:[%s6867_s1 + $0x500] sm:$0xf]  ;;  %v3330_v20 = vor.u32 %v4436_v10, %v3329_v7  ;;  %1083 = vmatpush.bf16.msrb.mxu2 %v3458_v9  ;;  %v4413_v61 = vld [vmem:[%s6867_s1 + $0x2c4] sm:$0xf]  ;;  %v3118_v7 = vor.u32 %v4381_v55, %v3115_v58 }
  0x40   :  { %v4466_v15 = vld [vmem:[%s6867_s1 + $0x60c] sm:$0xf0]  ;;  %v3321_v21 = vld [vmem:[%s6867_s1 + $0x400] sm:$0xf]  ;;  %v3522_v24 = vor.u32 %v4484_v12, %v3521_v11  ;;  %1064 = vmatpush.bf16.msrb.mxu1 %v3394_v13  ;;  %v3243_v2 = vld [vmem:[%s6867_s1 + $0x2d0] sm:$0xf0] }
  0x41   :  { %v4450_v17 = vld [vmem:[%s6867_s1 + $0x50c] sm:$0xf0]  ;;  %v3450_v25 = vor.u32 %v4466_v15, %v3449_v14  ;;  %v3513_v27 = vld [vmem:[%s6867_s1 + $0x700] sm:$0xf]  ;;  %1045 = vmatpush.bf16.msrb.mxu0 %v3330_v20  ;;  %v4395_v3 = vld [vmem:[%s6867_s1 + $0x1a4] sm:$0xf]  ;;  %v3246_v11 = vor.u32 %v4413_v61, %v3243_v2 }
  0x42   :  { %v4434_v26 = vld [vmem:[%s6867_s1 + $0x40c] sm:$0xf0]  ;;  %v3386_v29 = vor.u32 %v4450_v17, %v3385_v16  ;;  %v3601_v36 = vld [vmem:[%s6867_s1 + $0x860] sm:$0xf]  ;;  %1102 = vmatpush.bf16.msrb.mxu3 %v3522_v24  ;;  %v3171_v4 = vld [vmem:[%s6867_s1 + $0x1b0] sm:$0xf0] }
  0x43   :  { %v4482_v28 = vld [vmem:[%s6867_s1 + $0x70c] sm:$0xf0]  ;;  %v3322_v42 = vor.u32 %v4434_v26, %v3321_v21  ;;  %1084 = vmatpush.bf16.msrb.mxu2 %v3450_v25  ;;  %v3019_v49 = vld [vmem:[%s6868_s0 + $0x3c] sm:$0xf0]  ;;  %v4379_v8 = vld [vmem:[%s6867_s1 + $0xa4] sm:$0xf]  ;;  %v3174_v12 = vor.u32 %v4395_v3, %v3171_v4 }
  0x44   :  { %v3009_v30 = vld [vmem:[%s6868_s0 + $0x10] sm:$0xf]  ;;  %v3514_v47 = vor.u32 %v4482_v28, %v3513_v27  ;;  %1065 = vmatpush.bf16.msrb.mxu1 %v3386_v29  ;;  %v3593_v62 = vld [vmem:[%s6867_s1 + $0x840] sm:$0xf]  ;;  %v5274_v6 = vor.u32 %v4354_v46, %v3019_v49  ;;  %v3107_v9 = vld [vmem:[%s6867_s1 + $0xb0] sm:$0xf0] }
  0x45   :  { %v4504_v37 = vld [vmem:[%s6867_s1 + $0x86c] sm:$0xf0]  ;;  %v5259_v0 = vor.u32 %v4357_v31, %v3009_v30  ;;  %1046 = vmatpush.bf16.msrb.mxu0 %v3322_v42  ;;  %v4411_v13 = vld [vmem:[%s6867_s1 + $0x2a4] sm:$0xf]  ;;  %v3585_v14 = vld [vmem:[%s6867_s1 + $0x820] sm:$0xf]  ;;  %v3110_v19 = vor.u32 %v4379_v8, %v3107_v9 }
  0x46   :  { %v3602_v52 = vor.u32 %v4504_v37, %v3601_v36  ;;  %v4502_v63 = vld [vmem:[%s6867_s1 + $0x84c] sm:$0xf0]  ;;  %1103 = vmatpush.bf16.msrb.mxu3 %v3514_v47  ;;  %v3235_v16 = vld [vmem:[%s6867_s1 + $0x2b0] sm:$0xf0]  ;;  %v4393_v17 = vld [vmem:[%s6867_s1 + $0x184] sm:$0xf] }
  0x47   :  { %1153 = vmatpush.bf16.msra.mxu2 %v3190_v34  ;;  %v3594_v10 = vor.u32 %v4502_v63, %v3593_v62  ;;  %v4500_v15 = vld [vmem:[%s6867_s1 + $0x82c] sm:$0xf0]  ;;  %1066 = vmatmul.bf16.vlgmr.msrb.gmra.mxu1 %v5261_v1  ;;  %v3163_v18 = vld [vmem:[%s6867_s1 + $0x190] sm:$0xf0]  ;;  %v4377_v20 = vld [vmem:[%s6867_s1 + $0x84] sm:$0xf]  ;;  %v3238_v23 = vor.u32 %v4411_v13, %v3235_v16 }
  0x48   :  { %1134 = vmatpush.bf16.msra.mxu1 %v3126_v38  ;;  %1047 = vmatmul.bf16.vlgmr.msrb.gmra.mxu0 %v5259_v0  ;;  %v3099_v21 = vld [vmem:[%s6867_s1 + $0x90] sm:$0xf0]  ;;  %v3586_v22 = vor.u32 %v4500_v15, %v3585_v14  ;;  %v3166_v24 = vor.u32 %v4393_v17, %v3163_v18  ;;  %v4409_v25 = vld [vmem:[%s6867_s1 + $0x284] sm:$0xf]  ;;  %v3577_v26 = vld [vmem:[%s6867_s1 + $0x800] sm:$0xf] }
  0x49   :  { %1119 = vmatpush.bf16.msra.mxu0 %v3602_v52  ;;  %1085 = vmatmul.bf16.vlgmr.msrb.gmra.mxu2 %v5272_v5  ;;  %v4498_v27 = vld [vmem:[%s6867_s1 + $0x80c] sm:$0xf0]  ;;  %v3227_v28 = vld [vmem:[%s6867_s1 + $0x290] sm:$0xf0]  ;;  %v4391_v29 = vld [vmem:[%s6867_s1 + $0x164] sm:$0xf]  ;;  %v3102_v31 = vor.u32 %v4377_v20, %v3099_v21 }
  0x4a   :  { %1172 = vmatpush.bf16.msra.mxu3 %v3254_v59  ;;  %v3155_v30 = vld [vmem:[%s6867_s1 + $0x170] sm:$0xf0]  ;;  %v4375_v32 = vld [vmem:[%s6867_s1 + $0x64] sm:$0xf]  ;;  %v3578_v33 = vor.u32 %v4498_v27, %v3577_v26  ;;  %v3230_v35 = vor.u32 %v4409_v25, %v3227_v28  ;;  %v3045_v36 = vld [vmem:[%s6868_s0 + $0x58] sm:$0xf] }
  0x4b   :  { %1154 = vmatpush.bf16.msra.mxu2 %v3182_v60  ;;  %1104 = vmatmul.bf16.vlgmr.msrb.gmra.mxu3 %v5274_v6  ;;  %v4431_v34 = vld [vmem:[%s6867_s1 + $0x3e4] sm:$0xf]  ;;  %v4366_v37 = vld [vmem:[%s6868_s0 + $0x78] sm:$0xf0]  ;;  %v3047_v39 = vld [vmem:[%s6868_s0 + $0x7c] sm:$0xf0]  ;;  %v3158_v40 = vor.u32 %v4391_v29, %v3155_v30 }
  0x4c   :  { %1135 = vmatpush.bf16.msra.mxu1 %v3118_v7  ;;  %v4362_v38 = vld [vmem:[%s6868_s0 + $0x5c] sm:$0xf]  ;;  %v3091_v41 = vld [vmem:[%s6867_s1 + $0x70] sm:$0xf0]  ;;  %v4407_v42 = vld [vmem:[%s6867_s1 + $0x264] sm:$0xf]  ;;  %v5391_v8 = vor.u32 %v4366_v37, %v3045_v36 }
  0x4d   :  { %1120 = vmatpush.bf16.msra.mxu0 %v3594_v10  ;;  %v3315_v43 = vld [vmem:[%s6867_s1 + $0x3f0] sm:$0xf0]  ;;  %v4389_v46 = vld [vmem:[%s6867_s1 + $0x144] sm:$0xf]  ;;  %v3053_v52 = vld [vmem:[%s6868_s0 + $0x60] sm:$0xf]  ;;  %v3094_v60 = vor.u32 %v4375_v32, %v3091_v41  ;;  %v5393_v9 = vor.u32 %v4362_v38, %v3047_v39 }
  0x4e   :  { %1173 = vmatpush.bf16.msra.mxu3 %v3246_v11  ;;  %v3219_v45 = vld [vmem:[%s6867_s1 + $0x270] sm:$0xf0]  ;;  %v3318_v49 = vor.u32 %v4431_v34, %v3315_v43  ;;  %v4367_v55 = vld [vmem:[%s6868_s0 + $0x80] sm:$0xf0]  ;;  %v3055_v59 = vld [vmem:[%s6868_s0 + $0x84] sm:$0xf0] }
  0x4f   :  { %1155 = vmatpush.bf16.msra.mxu2 %v3174_v12  ;;  %v3147_v47 = vld [vmem:[%s6867_s1 + $0x150] sm:$0xf0]  ;;  %v4363_v58 = vld [vmem:[%s6868_s0 + $0x64] sm:$0xf]  ;;  %v3222_v63 = vor.u32 %v4407_v42, %v3219_v45  ;;  %v5404_v13 = vor.u32 %v4367_v55, %v3053_v52 }
  0x50   :  { %1136 = vmatpush.bf16.msra.mxu1 %v3110_v19  ;;  %v4373_v61 = vld [vmem:[%s6867_s1 + $0x44] sm:$0xf]  ;;  %v3083_v62 = vld [vmem:[%s6867_s1 + $0x50] sm:$0xf0]  ;;  %v3150_v2 = vor.u32 %v4389_v46, %v3147_v47  ;;  %v5406_v14 = vor.u32 %v4363_v58, %v3055_v59 }
  0x51   :  { %1121 = vmatpush.bf16.msra.mxu0 %v3586_v22  ;;  %v4405_v3 = vld [vmem:[%s6867_s1 + $0x244] sm:$0xf]  ;;  %v3307_v7 = vld [vmem:[%s6867_s1 + $0x3d0] sm:$0xf0]  ;;  %v3086_v15 = vor.u32 %v4373_v61, %v3083_v62 }
  0x52   :  { %1174 = vmatpush.bf16.msra.mxu3 %v3238_v23  ;;  %v4429_v4 = vld [vmem:[%s6867_s1 + $0x3c4] sm:$0xf]  ;;  %v3211_v10 = vld [vmem:[%s6867_s1 + $0x250] sm:$0xf0] }
  0x53   :  { %1156 = vmatpush.bf16.msra.mxu2 %v3166_v24  ;;  %v4387_v11 = vld [vmem:[%s6867_s1 + $0x124] sm:$0xf]  ;;  %v3139_v12 = vld [vmem:[%s6867_s1 + $0x130] sm:$0xf0]  ;;  %v3310_v18 = vor.u32 %v4429_v4, %v3307_v7  ;;  %v3214_v19 = vor.u32 %v4405_v3, %v3211_v10 }
  0x54   :  { %1137 = vmatpush.bf16.msra.mxu1 %v3102_v31  ;;  %v4371_v16 = vld [vmem:[%s6867_s1 + $0x24] sm:$0xf]  ;;  %v3075_v17 = vld [vmem:[%s6867_s1 + $0x30] sm:$0xf0]  ;;  %v3142_v20 = vor.u32 %v4387_v11, %v3139_v12 }
  0x55   :  { %1122 = vmatpush.bf16.msra.mxu0 %v3578_v33  ;;  %v4403_v21 = vld [vmem:[%s6867_s1 + $0x224] sm:$0xf]  ;;  %v3299_v23 = vld [vmem:[%s6867_s1 + $0x3b0] sm:$0xf0]  ;;  %v3078_v29 = vor.u32 %v4371_v16, %v3075_v17 }
  0x56   :  { %1175 = vmatpush.bf16.msra.mxu3 %v3230_v35  ;;  %v4427_v22 = vld [vmem:[%s6867_s1 + $0x3a4] sm:$0xf]  ;;  %v3203_v24 = vld [vmem:[%s6867_s1 + $0x230] sm:$0xf0] }
  0x57   :  { %1157 = vmatpush.bf16.msra.mxu2 %v3158_v40  ;;  %1071 = vmatmul.bf16.gmra.mxu1 %v5393_v9  ;;  %v4385_v25 = vld [vmem:[%s6867_s1 + $0x104] sm:$0xf]  ;;  %v3131_v26 = vld [vmem:[%s6867_s1 + $0x110] sm:$0xf0]  ;;  %v3302_v33 = vor.u32 %v4427_v22, %v3299_v23  ;;  %v3206_v34 = vor.u32 %v4403_v21, %v3203_v24 }
  0x58   :  { %1138 = vmatpush.bf16.msra.mxu1 %v3094_v60  ;;  %1052 = vmatmul.bf16.gmra.mxu0 %v5391_v8  ;;  %v4463_v27 = vld [vmem:[%s6867_s1 + $0x5e4] sm:$0xf]  ;;  %v3443_v28 = vld [vmem:[%s6867_s1 + $0x5f0] sm:$0xf0]  ;;  %v3134_v35 = vor.u32 %v4385_v25, %v3131_v26 }
  0x59   :  { %1191 = vmatpush.bf16.msrb.mxu0 %v3318_v49  ;;  %1090 = vmatmul.bf16.gmra.mxu2 %v5404_v13  ;;  %v4369_v30 = vld [vmem:[%s6867_s1 + $0x4] sm:$0xf]  ;;  %v3067_v31 = vld [vmem:[%s6867_s1 + $0x10] sm:$0xf0]  ;;  %v3446_v39 = vor.u32 %v4463_v27, %v3443_v28 }
  0x5a   :  { %1176 = vmatpush.bf16.msra.mxu3 %v3222_v63  ;;  %v4401_v32 = vld [vmem:[%s6867_s1 + $0x204] sm:$0xf]  ;;  %v3195_v36 = vld [vmem:[%s6867_s1 + $0x210] sm:$0xf0]  ;;  %v3070_v47 = vor.u32 %v4369_v30, %v3067_v31 }
  0x5b   :  { %1158 = vmatpush.bf16.msra.mxu2 %v3150_v2  ;;  %1109 = vmatmul.bf16.gmra.mxu3 %v5406_v14  ;;  %v4425_v37 = vld [vmem:[%s6867_s1 + $0x384] sm:$0xf]  ;;  %v3291_v38 = vld [vmem:[%s6867_s1 + $0x390] sm:$0xf0]  ;;  %v3198_v52 = vor.u32 %v4401_v32, %v3195_v36  ;;  %v3025_v2 = vld [vmem:[%s6868_s0 + $0x20] sm:$0xf] }
  0x5c   :  { %1139 = vmatpush.bf16.msra.mxu1 %v3086_v15  ;;  %v4447_v40 = vld [vmem:[%s6867_s1 + $0x4e4] sm:$0xf]  ;;  %v3379_v41 = vld [vmem:[%s6867_s1 + $0x4f0] sm:$0xf0]  ;;  %v3294_v49 = vor.u32 %v4425_v37, %v3291_v38 }
  0x5d   :  { %1192 = vmatpush.bf16.msrb.mxu0 %v3310_v18  ;;  %v4479_v42 = vld [vmem:[%s6867_s1 + $0x6e4] sm:$0xf]  ;;  %v3507_v43 = vld [vmem:[%s6867_s1 + $0x6f0] sm:$0xf0]  ;;  %v3382_v55 = vor.u32 %v4447_v40, %v3379_v41 }
  0x5e   :  { %1177 = vmatpush.bf16.msra.mxu3 %v3214_v19  ;;  %v4461_v45 = vld [vmem:[%s6867_s1 + $0x5c4] sm:$0xf]  ;;  %v3435_v46 = vld [vmem:[%s6867_s1 + $0x5d0] sm:$0xf0]  ;;  %v3510_v60 = vor.u32 %v4479_v42, %v3507_v43 }
  0x5f   :  { %1159 = vmatpush.bf16.msra.mxu2 %v3142_v20  ;;  %v4423_v58 = vld [vmem:[%s6867_s1 + $0x364] sm:$0xf]  ;;  %v3283_v59 = vld [vmem:[%s6867_s1 + $0x370] sm:$0xf0]  ;;  %v3438_v61 = vor.u32 %v4461_v45, %v3435_v46 }
  0x60   :  { %1140 = vmatpush.bf16.msra.mxu1 %v3078_v29  ;;  %v4445_v62 = vld [vmem:[%s6867_s1 + $0x4c4] sm:$0xf]  ;;  %v3371_v63 = vld [vmem:[%s6867_s1 + $0x4d0] sm:$0xf0]  ;;  %v3286_v10 = vor.u32 %v4423_v58, %v3283_v59 }
  0x61   :  { %1193 = vmatpush.bf16.msrb.mxu0 %v3302_v33  ;;  %v4359_v3 = vld [vmem:[%s6868_s0 + $0x40] sm:$0xf0]  ;;  %v3499_v7 = vld [vmem:[%s6867_s1 + $0x6d0] sm:$0xf0]  ;;  %v3374_v11 = vor.u32 %v4445_v62, %v3371_v63 }
  0x62   :  { %1178 = vmatpush.bf16.msra.mxu3 %v3206_v34  ;;  %v4477_v4 = vld [vmem:[%s6867_s1 + $0x6c4] sm:$0xf]  ;;  %v3427_v15 = vld [vmem:[%s6867_s1 + $0x5b0] sm:$0xf0]  ;;  %v5511_v17 = vor.u32 %v4359_v3, %v3025_v2 }
  0x63   :  { %1160 = vmatpush.bf16.msra.mxu2 %v3134_v35  ;;  %v4459_v12 = vld [vmem:[%s6867_s1 + $0x5a4] sm:$0xf]  ;;  %v3363_v18 = vld [vmem:[%s6867_s1 + $0x4b0] sm:$0xf0]  ;;  %v3502_v21 = vor.u32 %v4477_v4, %v3499_v7  ;;  %v3061_v4 = vld [vmem:[%s6868_s0 + $0x68] sm:$0xf] }
  0x64   :  { %1141 = vmatpush.bf16.msra.mxu1 %v3070_v47  ;;  %v4443_v16 = vld [vmem:[%s6867_s1 + $0x4a4] sm:$0xf]  ;;  %v3275_v20 = vld [vmem:[%s6867_s1 + $0x350] sm:$0xf0]  ;;  %v3430_v22 = vor.u32 %v4459_v12, %v3427_v15  ;;  %v4368_v7 = vld [vmem:[%s6868_s0 + $0x88] sm:$0xf0] }
  0x65   :  { %1194 = vmatpush.bf16.msrb.mxu0 %v3294_v49  ;;  %v4421_v19 = vld [vmem:[%s6867_s1 + $0x344] sm:$0xf]  ;;  %v3491_v24 = vld [vmem:[%s6867_s1 + $0x6b0] sm:$0xf0]  ;;  %v3366_v25 = vor.u32 %v4443_v16, %v3363_v18 }
  0x66   :  { %1179 = vmatpush.bf16.msra.mxu3 %v3198_v52  ;;  %v4475_v23 = vld [vmem:[%s6867_s1 + $0x6a4] sm:$0xf]  ;;  %v3419_v27 = vld [vmem:[%s6867_s1 + $0x590] sm:$0xf0]  ;;  %v3278_v29 = vor.u32 %v4421_v19, %v3275_v20 }
  0x67   :  { %1229 = vmatpush.bf16.msrb.mxu2 %v3446_v39  ;;  %v4457_v26 = vld [vmem:[%s6867_s1 + $0x584] sm:$0xf]  ;;  %1142 = vmatmul.bf16.vlgmr.msra.gmra.mxu1 %v4971_v48  ;;  %v3355_v30 = vld [vmem:[%s6867_s1 + $0x490] sm:$0xf0]  ;;  %v3494_v33 = vor.u32 %v4475_v23, %v3491_v24 }
  0x68   :  { %1210 = vmatpush.bf16.msrb.mxu1 %v3382_v55  ;;  %v4441_v28 = vld [vmem:[%s6867_s1 + $0x484] sm:$0xf]  ;;  %3607 = vmatmul.msk.bf16.vlgmr.msra.gmra.mxu0 %vm956_vm0, %v5511_v17  ;;  %v3267_v32 = vld [vmem:[%s6867_s1 + $0x330] sm:$0xf0]  ;;  %v3422_v34 = vor.u32 %v4457_v26, %v3419_v27 }
  0x69   :  { %1195 = vmatpush.bf16.msrb.mxu0 %v3286_v10  ;;  %v4419_v31 = vld [vmem:[%s6867_s1 + $0x324] sm:$0xf]  ;;  %1161 = vmatmul.bf16.vlgmr.msra.gmra.mxu2 %v4982_v53  ;;  %v3483_v36 = vld [vmem:[%s6867_s1 + $0x690] sm:$0xf0]  ;;  %v3358_v37 = vor.u32 %v4441_v28, %v3355_v30 }
  0x6a   :  { %1248 = vmatpush.bf16.msrb.mxu3 %v3510_v60  ;;  %v4473_v35 = vld [vmem:[%s6867_s1 + $0x684] sm:$0xf]  ;;  %v3411_v39 = vld [vmem:[%s6867_s1 + $0x570] sm:$0xf0]  ;;  %v3270_v41 = vor.u32 %v4419_v31, %v3267_v32 }
  0x6b   :  { %1230 = vmatpush.bf16.msrb.mxu2 %v3438_v61  ;;  %1180 = vmatmul.bf16.vlgmr.msra.gmra.mxu3 %v4984_v54  ;;  %v4455_v38 = vld [vmem:[%s6867_s1 + $0x564] sm:$0xf]  ;;  %v3347_v42 = vld [vmem:[%s6867_s1 + $0x470] sm:$0xf0]  ;;  %v3486_v49 = vor.u32 %v4473_v35, %v3483_v36  ;;  %v3669_v35 = vld [vmem:[%s6867_s1 + $0xe8] sm:$0xf] }
  0x6c   :  { %1211 = vmatpush.bf16.msrb.mxu1 %v3374_v11  ;;  %v4439_v40 = vld [vmem:[%s6867_s1 + $0x464] sm:$0xf]  ;;  %v3259_v45 = vld [vmem:[%s6867_s1 + $0x310] sm:$0xf0]  ;;  %v3414_v52 = vor.u32 %v4455_v38, %v3411_v39  ;;  %v4520_v36 = vld [vmem:[%s6867_s1 + $0xf4] sm:$0xf0] }
  0x6d   :  { %1196 = vmatpush.bf16.msrb.mxu0 %v3278_v29  ;;  %v4417_v43 = vld [vmem:[%s6867_s1 + $0x304] sm:$0xf]  ;;  %v3571_v47 = vld [vmem:[%s6867_s1 + $0x7f0] sm:$0xf0]  ;;  %v3350_v58 = vor.u32 %v4439_v40, %v3347_v42 }
  0x6e   :  { %1249 = vmatpush.bf16.msrb.mxu3 %v3502_v21  ;;  %v4495_v46 = vld [vmem:[%s6867_s1 + $0x7e4] sm:$0xf]  ;;  %v3475_v59 = vld [vmem:[%s6867_s1 + $0x670] sm:$0xf0]  ;;  %v3262_v62 = vor.u32 %v4417_v43, %v3259_v45  ;;  %v5620_v21 = vor.u32 %v4368_v7, %v3061_v4 }
  0x6f   :  { %1231 = vmatpush.bf16.msrb.mxu2 %v3430_v22  ;;  %v4471_v55 = vld [vmem:[%s6867_s1 + $0x664] sm:$0xf]  ;;  %v3403_v61 = vld [vmem:[%s6867_s1 + $0x550] sm:$0xf0]  ;;  %v3574_v3 = vor.u32 %v4495_v46, %v3571_v47  ;;  %v3670_v47 = vor.u32 %v4520_v36, %v3669_v35 }
  0x70   :  { %1212 = vmatpush.bf16.msrb.mxu1 %v3366_v25  ;;  %v4453_v60 = vld [vmem:[%s6867_s1 + $0x544] sm:$0xf]  ;;  %v3339_v2 = vld [vmem:[%s6867_s1 + $0x450] sm:$0xf0]  ;;  %v3478_v10 = vor.u32 %v4471_v55, %v3475_v59  ;;  %v4518_v59 = vld [vmem:[%s6867_s1 + $0xd4] sm:$0xf0] }
  0x71   :  { %1197 = vmatpush.bf16.msrb.mxu0 %v3270_v41  ;;  %v4437_v63 = vld [vmem:[%s6867_s1 + $0x444] sm:$0xf]  ;;  %v3406_v11 = vor.u32 %v4453_v60, %v3403_v61  ;;  %v3467_v15 = vld [vmem:[%s6867_s1 + $0x650] sm:$0xf0] }
  0x72   :  { %1250 = vmatpush.bf16.msrb.mxu3 %v3494_v33  ;;  %v4469_v12 = vld [vmem:[%s6867_s1 + $0x644] sm:$0xf]  ;;  %v3342_v16 = vor.u32 %v4437_v63, %v3339_v2  ;;  %v3395_v19 = vld [vmem:[%s6867_s1 + $0x530] sm:$0xf0] }
  0x73   :  { %1232 = vmatpush.bf16.msrb.mxu2 %v3422_v34  ;;  %v4451_v18 = vld [vmem:[%s6867_s1 + $0x524] sm:$0xf]  ;;  %v3331_v22 = vld [vmem:[%s6867_s1 + $0x430] sm:$0xf0]  ;;  %v3470_v25 = vor.u32 %v4469_v12, %v3467_v15  ;;  %v3653_v12 = vld [vmem:[%s6867_s1 + $0xa8] sm:$0xf] }
  0x74   :  { %1213 = vmatpush.bf16.msrb.mxu1 %v3358_v37  ;;  %v4435_v20 = vld [vmem:[%s6867_s1 + $0x424] sm:$0xf]  ;;  %v3563_v24 = vld [vmem:[%s6867_s1 + $0x7d0] sm:$0xf0]  ;;  %v3398_v26 = vor.u32 %v4451_v18, %v3395_v19  ;;  %v4516_v15 = vld [vmem:[%s6867_s1 + $0xb4] sm:$0xf0] }
  0x75   :  { %1198 = vmatpush.bf16.msrb.mxu0 %v3262_v62  ;;  %v4493_v23 = vld [vmem:[%s6867_s1 + $0x7c4] sm:$0xf]  ;;  %v3459_v28 = vld [vmem:[%s6867_s1 + $0x630] sm:$0xf0]  ;;  %v3334_v30 = vor.u32 %v4435_v20, %v3331_v22  ;;  %v3717_v19 = vld [vmem:[%s6867_s1 + $0x1a8] sm:$0xf] }
  0x76   :  { %1251 = vmatpush.bf16.msrb.mxu3 %v3486_v49  ;;  %v4467_v27 = vld [vmem:[%s6867_s1 + $0x624] sm:$0xf]  ;;  %v3387_v31 = vld [vmem:[%s6867_s1 + $0x510] sm:$0xf0]  ;;  %v3566_v34 = vor.u32 %v4493_v23, %v3563_v24  ;;  %v3733_v49 = vld [vmem:[%s6867_s1 + $0x1e8] sm:$0xf]  ;;  %v3654_v23 = vor.u32 %v4516_v15, %v3653_v12 }
  0x77   :  { %1233 = vmatpush.bf16.msrb.mxu2 %v3414_v52  ;;  %v4449_v29 = vld [vmem:[%s6867_s1 + $0x504] sm:$0xf]  ;;  %v3323_v33 = vld [vmem:[%s6867_s1 + $0x410] sm:$0xf0]  ;;  %1147 = vmatmul.bf16.gmra.mxu1 %v5103_v44  ;;  %v3462_v41 = vor.u32 %v4467_v27, %v3459_v28  ;;  %v4536_v52 = vld [vmem:[%s6867_s1 + $0x1f4] sm:$0xf0] }
  0x78   :  { %1214 = vmatpush.bf16.msrb.mxu1 %v3350_v58  ;;  %v4433_v32 = vld [vmem:[%s6867_s1 + $0x404] sm:$0xf]  ;;  %3608 = vmatmul.msk.bf16.gmra.mxu0 %vm956_vm0, %v5620_v21  ;;  %v3603_v38 = vld [vmem:[%s6867_s1 + $0x870] sm:$0xf0]  ;;  %v3390_v42 = vor.u32 %v4449_v29, %v3387_v31  ;;  %v3661_v58 = vld [vmem:[%s6867_s1 + $0xc8] sm:$0xf]  ;;  %v3734_v4 = vor.u32 %v4536_v52, %v3733_v49 }
  0x79   :  { %1267 = vmatpush.bf16.msra.mxu0 %v3574_v3  ;;  %v4503_v37 = vld [vmem:[%s6867_s1 + $0x864] sm:$0xf]  ;;  %1166 = vmatmul.bf16.gmra.mxu2 %v5114_v50  ;;  %v3555_v40 = vld [vmem:[%s6867_s1 + $0x7b0] sm:$0xf0]  ;;  %v3326_v45 = vor.u32 %v4433_v32, %v3323_v33  ;;  %v3662_v7 = vor.u32 %v4518_v59, %v3661_v58  ;;  %v4532_v27 = vld [vmem:[%s6867_s1 + $0x1b4] sm:$0xf0] }
  0x7a   :  { %1252 = vmatpush.bf16.msrb.mxu3 %v3478_v10  ;;  %v4491_v39 = vld [vmem:[%s6867_s1 + $0x7a4] sm:$0xf]  ;;  %v3451_v46 = vld [vmem:[%s6867_s1 + $0x610] sm:$0xf0]  ;;  %v3606_v55 = vor.u32 %v4503_v37, %v3603_v38  ;;  %v3725_v10 = vld [vmem:[%s6867_s1 + $0x1c8] sm:$0xf] }
  0x7b   :  { %1234 = vmatpush.bf16.msrb.mxu2 %v3406_v11  ;;  %1185 = vmatmul.bf16.gmra.mxu3 %v5116_v51  ;;  %v4465_v43 = vld [vmem:[%s6867_s1 + $0x604] sm:$0xf]  ;;  %v3558_v60 = vor.u32 %v4491_v39, %v3555_v40  ;;  %v3595_v62 = vld [vmem:[%s6867_s1 + $0x850] sm:$0xf0]  ;;  %v4534_v11 = vld [vmem:[%s6867_s1 + $0x1d4] sm:$0xf0] }
  0x7c   :  { %1215 = vmatpush.bf16.msrb.mxu1 %v3342_v16  ;;  %v4501_v61 = vld [vmem:[%s6867_s1 + $0x844] sm:$0xf]  ;;  %v3547_v2 = vld [vmem:[%s6867_s1 + $0x790] sm:$0xf0]  ;;  %v3454_v3 = vor.u32 %v4465_v43, %v3451_v46  ;;  %v3726_v22 = vor.u32 %v4534_v11, %v3725_v10  ;;  %v3645_v28 = vld [vmem:[%s6867_s1 + $0x88] sm:$0xf] }
  0x7d   :  { %1268 = vmatpush.bf16.msra.mxu0 %v3566_v34  ;;  %v4489_v63 = vld [vmem:[%s6867_s1 + $0x784] sm:$0xf]  ;;  %v3598_v16 = vor.u32 %v4501_v61, %v3595_v62  ;;  %v3539_v24 = vld [vmem:[%s6867_s1 + $0x770] sm:$0xf0]  ;;  %v4514_v29 = vld [vmem:[%s6867_s1 + $0x94] sm:$0xf0]  ;;  %v3718_v34 = vor.u32 %v4532_v27, %v3717_v19 }
  0x7e   :  { %1253 = vmatpush.bf16.msrb.mxu3 %v3470_v25  ;;  %v3550_v18 = vor.u32 %v4489_v63, %v3547_v2  ;;  %v4487_v20 = vld [vmem:[%s6867_s1 + $0x764] sm:$0xf]  ;;  %v3646_v35 = vor.u32 %v4514_v29, %v3645_v28  ;;  %v3531_v36 = vld [vmem:[%s6867_s1 + $0x750] sm:$0xf0]  ;;  %v4530_v39 = vld [vmem:[%s6867_s1 + $0x194] sm:$0xf0] }
  0x7f   :  { %1235 = vmatpush.bf16.msrb.mxu2 %v3398_v26  ;;  %v4499_v25 = vld [vmem:[%s6867_s1 + $0x824] sm:$0xf]  ;;  %v3587_v26 = vld [vmem:[%s6867_s1 + $0x830] sm:$0xf0]  ;;  %v3542_v31 = vor.u32 %v4487_v20, %v3539_v24  ;;  %v3637_v40 = vld [vmem:[%s6867_s1 + $0x68] sm:$0xf] }
  0x80   :  { %1216 = vmatpush.bf16.msrb.mxu1 %v3334_v30  ;;  %v3709_v30 = vld [vmem:[%s6867_s1 + $0x188] sm:$0xf]  ;;  %v3590_v32 = vor.u32 %v4499_v25, %v3587_v26  ;;  %v4485_v33 = vld [vmem:[%s6867_s1 + $0x744] sm:$0xf]  ;;  %v3579_v38 = vld [vmem:[%s6867_s1 + $0x810] sm:$0xf0] }
  0x81   :  { %1269 = vmatpush.bf16.msra.mxu0 %v3558_v60  ;;  %v4497_v37 = vld [vmem:[%s6867_s1 + $0x804] sm:$0xf]  ;;  %v4568_v43 = vld [vmem:[%s6867_s1 + $0x3f4] sm:$0xf0]  ;;  %v3701_v52 = vld [vmem:[%s6867_s1 + $0x168] sm:$0xf] }
  0x82   :  { %1254 = vmatpush.bf16.msrb.mxu3 %v3462_v41  ;;  %v4512_v41 = vld [vmem:[%s6867_s1 + $0x74] sm:$0xf0]  ;;  %v3582_v46 = vor.u32 %v4497_v37, %v3579_v38  ;;  %v3523_v58 = vld [vmem:[%s6867_s1 + $0x730] sm:$0xf0]  ;;  %v3629_v60 = vld [vmem:[%s6867_s1 + $0x48] sm:$0xf] }
  0x83   :  { %1236 = vmatpush.bf16.msrb.mxu2 %v3390_v42  ;;  %v3861_v42 = vld [vmem:[%s6867_s1 + $0x3e8] sm:$0xf]  ;;  %v3638_v49 = vor.u32 %v4512_v41, %v3637_v40  ;;  %v4528_v59 = vld [vmem:[%s6867_s1 + $0x174] sm:$0xf0]  ;;  %v4481_v11 = vld [vmem:[%s6867_s1 + $0x704] sm:$0xf] }
  0x84   :  { %1217 = vmatpush.bf16.msrb.mxu1 %v3326_v45  ;;  %v3534_v45 = vor.u32 %v4485_v33, %v3531_v36  ;;  %v4510_v61 = vld [vmem:[%s6867_s1 + $0x54] sm:$0xf0]  ;;  %v3862_v62 = vor.u32 %v4568_v43, %v3861_v42  ;;  %v3853_v63 = vld [vmem:[%s6867_s1 + $0x3c8] sm:$0xf]  ;;  %v3515_v12 = vld [vmem:[%s6867_s1 + $0x710] sm:$0xf0] }
  0x85   :  { %1270 = vmatpush.bf16.msra.mxu0 %v3550_v18  ;;  %v4566_v2 = vld [vmem:[%s6867_s1 + $0x3d4] sm:$0xf0]  ;;  %v3693_v10 = vld [vmem:[%s6867_s1 + $0x148] sm:$0xf] }
  0x86   :  { %1255 = vmatpush.bf16.msrb.mxu3 %v3454_v3  ;;  %v4526_v15 = vld [vmem:[%s6867_s1 + $0x154] sm:$0xf0]  ;;  %v3854_v19 = vor.u32 %v4566_v2, %v3853_v63  ;;  %v3685_v20 = vld [vmem:[%s6867_s1 + $0x128] sm:$0xf] }
  0x87   :  { %2143 = vmatpush.bf16.msra.mxu2 %v3670_v47  ;;  %1218 = vmatmul.bf16.vlgmr.msrb.gmra.mxu1 %v5259_v0  ;;  %v3710_v47 = vor.u32 %v4530_v39, %v3709_v30  ;;  %v4508_v18 = vld [vmem:[%s6867_s1 + $0x34] sm:$0xf0]  ;;  %v3694_v24 = vor.u32 %v4526_v15, %v3693_v10  ;;  %v3845_v27 = vld [vmem:[%s6867_s1 + $0x3a8] sm:$0xf] }
  0x88   :  { %1290 = vmatpush.bf16.msra.mxu1 %v3606_v55  ;;  %1199 = vmatmul.bf16.vlgmr.msrb.gmra.mxu0 %v4992_v57  ;;  %v4483_v55 = vld [vmem:[%s6867_s1 + $0x724] sm:$0xf]  ;;  %v4552_v26 = vld [vmem:[%s6867_s1 + $0x2f4] sm:$0xf0]  ;;  %v3613_v30 = vld [vmem:[%s6867_s1 + $0x8] sm:$0xf] }
  0x89   :  { %1237 = vmatmul.bf16.vlgmr.msrb.gmra.mxu2 %v5261_v1  ;;  %1271 = vmatpush.bf16.msra.mxu0 %v3542_v31  ;;  %v3526_v3 = vor.u32 %v4483_v55, %v3523_v58  ;;  %v4564_v28 = vld [vmem:[%s6867_s1 + $0x3b4] sm:$0xf0]  ;;  %v3837_v40 = vld [vmem:[%s6867_s1 + $0x388] sm:$0xf] }
  0x8a   :  { %2162 = vmatpush.bf16.msra.mxu3 %v3734_v4  ;;  %v3702_v4 = vor.u32 %v4528_v59, %v3701_v52  ;;  %v4524_v29 = vld [vmem:[%s6867_s1 + $0x134] sm:$0xf0]  ;;  %v3846_v36 = vor.u32 %v4564_v28, %v3845_v27  ;;  %v3677_v42 = vld [vmem:[%s6867_s1 + $0x108] sm:$0xf] }
  0x8b   :  { %2144 = vmatpush.bf16.msra.mxu2 %v3662_v7  ;;  %1256 = vmatmul.bf16.vlgmr.msrb.gmra.mxu3 %v5272_v5  ;;  %v3630_v7 = vor.u32 %v4510_v61, %v3629_v60  ;;  %v4506_v31 = vld [vmem:[%s6867_s1 + $0x14] sm:$0xf0]  ;;  %v3686_v37 = vor.u32 %v4524_v29, %v3685_v20  ;;  %v3781_v58 = vld [vmem:[%s6867_s1 + $0x2a8] sm:$0xf] }
  0x8c   :  { %1291 = vmatpush.bf16.msra.mxu1 %v3598_v16  ;;  %v3621_v16 = vld [vmem:[%s6867_s1 + $0x28] sm:$0xf]  ;;  %v4584_v33 = vld [vmem:[%s6867_s1 + $0x4f4] sm:$0xf0]  ;;  %v3614_v38 = vor.u32 %v4506_v31, %v3613_v30 }
  0x8d   :  { %1272 = vmatpush.bf16.msra.mxu0 %v3534_v45  ;;  %v3622_v25 = vor.u32 %v4508_v18, %v3621_v16  ;;  %v4550_v39 = vld [vmem:[%s6867_s1 + $0x2d4] sm:$0xf0]  ;;  %v3909_v10 = vld [vmem:[%s6867_s1 + $0x4a8] sm:$0xf] }
  0x8e   :  { %2163 = vmatpush.bf16.msra.mxu3 %v3726_v22  ;;  %v3518_v22 = vor.u32 %v4481_v11, %v3515_v12  ;;  %v4562_v41 = vld [vmem:[%s6867_s1 + $0x394] sm:$0xf0]  ;;  %v180_v12 = vld [vmem:[%s6869_s2] sm:$0x3]  ;;  %v3773_v16 = vld [vmem:[%s6867_s1 + $0x288] sm:$0xf] }
  0x8f   :  { %2145 = vmatpush.bf16.msra.mxu2 %v3654_v23  ;;  %v3797_v23 = vld [vmem:[%s6867_s1 + $0x2e8] sm:$0xf]  ;;  %v4522_v43 = vld [vmem:[%s6867_s1 + $0x114] sm:$0xf0]  ;;  %v3838_v59 = vor.u32 %v4562_v41, %v3837_v40 }
  0x90   :  { %1292 = vmatpush.bf16.msra.mxu1 %v3590_v32  ;;  %v3925_v32 = vld [vmem:[%s6867_s1 + $0x4e8] sm:$0xf]  ;;  %v4582_v52 = vld [vmem:[%s6867_s1 + $0x4d4] sm:$0xf0]  ;;  %v3678_v60 = vor.u32 %v4522_v43, %v3677_v42 }
  0x91   :  { %1273 = vmatpush.bf16.msra.mxu0 %v3526_v3  ;;  %v3926_v45 = vor.u32 %v4584_v33, %v3925_v32  ;;  %v4548_v61 = vld [vmem:[%s6867_s1 + $0x2b4] sm:$0xf0]  ;;  %v3821_v20 = vld [vmem:[%s6867_s1 + $0x348] sm:$0xf] }
  0x92   :  { %2164 = vmatpush.bf16.msra.mxu3 %v3718_v34  ;;  %v3798_v34 = vor.u32 %v4552_v26, %v3797_v23  ;;  %v4560_v63 = vld [vmem:[%s6867_s1 + $0x374] sm:$0xf0]  ;;  %v3782_v15 = vor.u32 %v4548_v61, %v3781_v58  ;;  %v3973_v26 = vld [vmem:[%s6867_s1 + $0x5a8] sm:$0xf] }
  0x93   :  { %2146 = vmatpush.bf16.msra.mxu2 %v3646_v35  ;;  %v3789_v35 = vld [vmem:[%s6867_s1 + $0x2c8] sm:$0xf]  ;;  %v4580_v11 = vld [vmem:[%s6867_s1 + $0x4b4] sm:$0xf0] }
  0x94   :  { %1293 = vmatpush.bf16.msra.mxu1 %v3582_v46  ;;  %v3989_v46 = vld [vmem:[%s6867_s1 + $0x5e8] sm:$0xf]  ;;  %v3790_v55 = vor.u32 %v4550_v39, %v3789_v35  ;;  %v4596_v27 = vld [vmem:[%s6867_s1 + $0x5b4] sm:$0xf0] }
  0x95   :  { %1274 = vmatpush.bf16.msra.mxu0 %v3518_v22  ;;  %v4558_v22 = vld [vmem:[%s6867_s1 + $0x354] sm:$0xf0]  ;;  %v3901_v30 = vld [vmem:[%s6867_s1 + $0x488] sm:$0xf]  ;;  %v3974_v39 = vor.u32 %v4596_v27, %v3973_v26 }
  0x96   :  { %2165 = vmatpush.bf16.msra.mxu3 %v3710_v47  ;;  %v4600_v47 = vld [vmem:[%s6867_s1 + $0x5f4] sm:$0xf0]  ;;  %v3822_v29 = vor.u32 %v4558_v22, %v3821_v20  ;;  %v3765_v32 = vld [vmem:[%s6867_s1 + $0x268] sm:$0xf] }
  0x97   :  { %2147 = vmatpush.bf16.msra.mxu2 %v3638_v49  ;;  %1223 = vmatmul.bf16.gmra.mxu1 %v5391_v8  ;;  %v3917_v49 = vld [vmem:[%s6867_s1 + $0x4c8] sm:$0xf]  ;;  %v3990_v2 = vor.u32 %v4600_v47, %v3989_v46  ;;  %v4578_v31 = vld [vmem:[%s6867_s1 + $0x494] sm:$0xf0] }
  0x98   :  { %2200 = vmatpush.bf16.msrb.mxu1 %v3862_v62  ;;  %1204 = vmatmul.bf16.gmra.mxu0 %v5124_v56  ;;  %v3829_v62 = vld [vmem:[%s6867_s1 + $0x368] sm:$0xf]  ;;  %v3918_v3 = vor.u32 %v4582_v52, %v3917_v49  ;;  %v3902_v40 = vor.u32 %v4578_v31, %v3901_v30  ;;  %v4594_v42 = vld [vmem:[%s6867_s1 + $0x594] sm:$0xf0] }
  0x99   :  { %1242 = vmatmul.bf16.gmra.mxu2 %v5393_v9  ;;  %2181 = vmatpush.bf16.msrb.mxu0 %v3798_v34  ;;  %v3830_v18 = vor.u32 %v4560_v63, %v3829_v62  ;;  %v4544_v34 = vld [vmem:[%s6867_s1 + $0x274] sm:$0xf0]  ;;  %v3813_v35 = vld [vmem:[%s6867_s1 + $0x328] sm:$0xf] }
  0x9a   :  { %2166 = vmatpush.bf16.msra.mxu3 %v3702_v4  ;;  %v3981_v4 = vld [vmem:[%s6867_s1 + $0x5c8] sm:$0xf]  ;;  %v4576_v46 = vld [vmem:[%s6867_s1 + $0x474] sm:$0xf0]  ;;  %v3766_v47 = vor.u32 %v4544_v34, %v3765_v32 }
  0x9b   :  { %2148 = vmatpush.bf16.msra.mxu2 %v3630_v7  ;;  %1261 = vmatmul.bf16.gmra.mxu3 %v5404_v13  ;;  %v4598_v7 = vld [vmem:[%s6867_s1 + $0x5d4] sm:$0xf0]  ;;  %v3965_v41 = vld [vmem:[%s6867_s1 + $0x588] sm:$0xf] }
  0x9c   :  { %2201 = vmatpush.bf16.msrb.mxu1 %v3854_v19  ;;  %v4546_v19 = vld [vmem:[%s6867_s1 + $0x294] sm:$0xf0]  ;;  %v3982_v23 = vor.u32 %v4598_v7, %v3981_v4  ;;  %v3757_v49 = vld [vmem:[%s6867_s1 + $0x248] sm:$0xf]  ;;  %v3966_v62 = vor.u32 %v4594_v42, %v3965_v41 }
  0x9d   :  { %2182 = vmatpush.bf16.msrb.mxu0 %v3790_v55  ;;  %v3774_v28 = vor.u32 %v4546_v19, %v3773_v16  ;;  %v4542_v55 = vld [vmem:[%s6867_s1 + $0x254] sm:$0xf0]  ;;  %v3805_v58 = vld [vmem:[%s6867_s1 + $0x308] sm:$0xf] }
  0x9e   :  { %2167 = vmatpush.bf16.msra.mxu3 %v3694_v24  ;;  %v3910_v24 = vor.u32 %v4580_v11, %v3909_v10  ;;  %v4632_v61 = vld [vmem:[%s6867_s1 + $0x7f4] sm:$0xf0]  ;;  %v3885_v7 = vld [vmem:[%s6867_s1 + $0x448] sm:$0xf]  ;;  %v3758_v11 = vor.u32 %v4542_v55, %v3757_v49 }
  0x9f   :  { %2149 = vmatpush.bf16.msra.mxu2 %v3622_v25  ;;  %v5917_v25 = vperm.slane %v180_v12, 0  ;;  %v4592_v4 = vld [vmem:[%s6867_s1 + $0x574] sm:$0xf0]  ;;  %v3749_v19 = vld [vmem:[%s6867_s1 + $0x228] sm:$0xf] }
  0xa0   :  { %2202 = vmatpush.bf16.msrb.mxu1 %v3846_v36  ;;  %v4556_v36 = vld [vmem:[%s6867_s1 + $0x334] sm:$0xf0]  ;;  %v4109_v26 = vld [vmem:[%s6867_s1 + $0x7c8] sm:$0xf] }
  0xa1   :  { %2183 = vmatpush.bf16.msrb.mxu0 %v3782_v15  ;;  %v972_v33 = vpop.f32.mrf.mxu0  ;;  %v3814_v52 = vor.u32 %v4556_v36, %v3813_v35  ;;  %v4574_v10 = vld [vmem:[%s6867_s1 + $0x454] sm:$0xf0]  ;;  %v3949_v31 = vld [vmem:[%s6867_s1 + $0x548] sm:$0xf] }
  0xa2   :  { %2168 = vmatpush.bf16.msra.mxu3 %v3686_v37  ;;  %v973_v37 = vadd.f32 %v972_v33, %v5917_v25  ;;  %v4540_v20 = vld [vmem:[%s6867_s1 + $0x234] sm:$0xf0]  ;;  %v3886_v30 = vor.u32 %v4574_v10, %v3885_v7  ;;  %v3877_v34 = vld [vmem:[%s6867_s1 + $0x428] sm:$0xf] }
  0xa3   :  { %2150 = vmatpush.bf16.msra.mxu2 %v3614_v38  ;;  %v991_v38 = vpop.f32.mrf.mxu1  ;;  %v4630_v27 = vld [vmem:[%s6867_s1 + $0x7d4] sm:$0xf0]  ;;  %v3750_v36 = vor.u32 %v4540_v20, %v3749_v19  ;;  %v3941_v42 = vld [vmem:[%s6867_s1 + $0x528] sm:$0xf]  ;;  %v4519_v20 = vld [vmem:[%s6867_s1 + $0xec] sm:$0xf] }
  0xa4   :  { %2203 = vmatpush.bf16.msrb.mxu1 %v3838_v59  ;;  %v992_v43 = vadd.f32 %v991_v38, %v973_v37  ;;  %v4554_v59 = vld [vmem:[%s6867_s1 + $0x314] sm:$0xf0]  ;;  %v3741_v37 = vld [vmem:[%s6867_s1 + $0x208] sm:$0xf] }
  0xa5   :  { %2184 = vmatpush.bf16.msrb.mxu0 %v3774_v28  ;;  %v3806_v12 = vor.u32 %v4554_v59, %v3805_v58  ;;  %v4590_v33 = vld [vmem:[%s6867_s1 + $0x554] sm:$0xf0] }
  0xa6   :  { %2169 = vmatpush.bf16.msra.mxu3 %v3678_v60  ;;  %v4117_v60 = vld [vmem:[%s6867_s1 + $0x7e8] sm:$0xf]  ;;  %v4572_v35 = vld [vmem:[%s6867_s1 + $0x434] sm:$0xf0] }
  0xa7   :  { %2219 = vmatpush.bf16.msrb.mxu2 %v3926_v45  ;;  %v3893_v45 = vld [vmem:[%s6867_s1 + $0x468] sm:$0xf]  ;;  %3609 = vmatmul.msk.bf16.vlgmr.msra.gmra.mxu1 %vm956_vm0, %v5511_v17  ;;  %v4118_v22 = vor.u32 %v4632_v61, %v4117_v60  ;;  %v4538_v38 = vld [vmem:[%s6867_s1 + $0x214] sm:$0xf0]  ;;  %v3878_v41 = vor.u32 %v4572_v35, %v3877_v34 }
  0xa8   :  { %2204 = vmatpush.bf16.msrb.mxu1 %v3830_v18  ;;  %1275 = vmatmul.bf16.vlgmr.msra.gmra.mxu0 %v5274_v6  ;;  %v3894_v63 = vor.u32 %v4576_v46, %v3893_v45  ;;  %v3869_v46 = vld [vmem:[%s6867_s1 + $0x408] sm:$0xf]  ;;  %v3742_v49 = vor.u32 %v4538_v38, %v3741_v37  ;;  %v4640_v61 = vld [vmem:[%s6867_s1 + $0x874] sm:$0xf0]  ;;  %v3663_v37 = vld [vmem:[%s6867_s1 + $0xd8] sm:$0xf0] }
  0xa9   :  { %2151 = vmatmul.bf16.vlgmr.msra.gmra.mxu2 %v4971_v48  ;;  %2185 = vmatpush.bf16.msrb.mxu0 %v3766_v47  ;;  %v974_v18 = vpop.f32.mrf.mxu0  ;;  %v4570_v47 = vld [vmem:[%s6867_s1 + $0x414] sm:$0xf0]  ;;  %v4149_v60 = vld [vmem:[%s6867_s1 + $0x868] sm:$0xf] }
  0xaa   :  { %2238 = vmatpush.bf16.msrb.mxu3 %v3990_v2  ;;  %v3957_v2 = vld [vmem:[%s6867_s1 + $0x568] sm:$0xf]  ;;  %v1029_v16 = vpop.f32.mrf.mxu3 }
  0xab   :  { %2220 = vmatpush.bf16.msrb.mxu2 %v3918_v3  ;;  %2170 = vmatmul.bf16.vlgmr.msra.gmra.mxu3 %v4982_v53  ;;  %v1010_v3 = vpop.f32.mrf.mxu2 }
  0xac   :  { %2205 = vmatpush.bf16.msrb.mxu1 %v3822_v29  ;;  %v1011_v15 = vadd.f32 %v1010_v3, %v992_v43  ;;  %v3958_v29 = vor.u32 %v4592_v4, %v3957_v2  ;;  %v4588_v43 = vld [vmem:[%s6867_s1 + $0x534] sm:$0xf0]  ;;  %v4101_v3 = vld [vmem:[%s6867_s1 + $0x7a8] sm:$0xf] }
  0xad   :  { %2186 = vmatpush.bf16.msrb.mxu0 %v3758_v11  ;;  %v4628_v4 = vld [vmem:[%s6867_s1 + $0x7b4] sm:$0xf0]  ;;  %v3942_v10 = vor.u32 %v4588_v43, %v3941_v42  ;;  %v3870_v11 = vor.u32 %v4570_v47, %v3869_v46  ;;  %v4037_v42 = vld [vmem:[%s6867_s1 + $0x6a8] sm:$0xf] }
  0xae   :  { %2239 = vmatpush.bf16.msrb.mxu3 %v3982_v23  ;;  %v975_v23 = vadd.f32 %v974_v18, %v5917_v25  ;;  %v6004_v28 = vadd.f32 %v1029_v16, %v1011_v15  ;;  %v4586_v16 = vld [vmem:[%s6867_s1 + $0x514] sm:$0xf0]  ;;  %v4150_v18 = vor.u32 %v4640_v61, %v4149_v60  ;;  %v4085_v46 = vld [vmem:[%s6867_s1 + $0x768] sm:$0xf] }
  0xaf   :  { %2221 = vmatpush.bf16.msrb.mxu2 %v3910_v24  ;;  %v993_v24 = vpop.f32.mrf.mxu1  ;;  %v4612_v43 = vld [vmem:[%s6867_s1 + $0x6b4] sm:$0xf0] }
  0xb0   :  { %2206 = vmatpush.bf16.msrb.mxu1 %v3814_v52  ;;  %v994_v32 = vadd.f32 %v993_v24, %v975_v23  ;;  %v4053_v52 = vld [vmem:[%s6867_s1 + $0x6e8] sm:$0xf]  ;;  %v4614_v24 = vld [vmem:[%s6867_s1 + $0x6d4] sm:$0xf0]  ;;  %v4038_v61 = vor.u32 %v4612_v43, %v4037_v42  ;;  %v3639_v43 = vld [vmem:[%s6867_s1 + $0x78] sm:$0xf0] }
  0xb1   :  { %2187 = vmatpush.bf16.msrb.mxu0 %v3750_v36  ;;  %v977_v59 = vpop.f32.mrf.mxu0  ;;  %v4045_v23 = vld [vmem:[%s6867_s1 + $0x6c8] sm:$0xf]  ;;  %v4517_v36 = vld [vmem:[%s6867_s1 + $0xcc] sm:$0xf] }
  0xb2   :  { %2240 = vmatpush.bf16.msrb.mxu3 %v3974_v39  ;;  %v4110_v39 = vor.u32 %v4630_v27, %v4109_v26  ;;  %v1031_v58 = vpop.f32.mrf.mxu3  ;;  %v4141_v26 = vld [vmem:[%s6867_s1 + $0x848] sm:$0xf]  ;;  %v4102_v27 = vor.u32 %v4628_v4, %v4101_v3  ;;  %v4046_v35 = vor.u32 %v4614_v24, %v4045_v23  ;;  %v4610_v3 = vld [vmem:[%s6867_s1 + $0x694] sm:$0xf0] }
  0xb3   :  { %2222 = vmatpush.bf16.msrb.mxu2 %v3902_v40  ;;  %v3950_v40 = vor.u32 %v4590_v33, %v3949_v31  ;;  %v1012_v45 = vpop.f32.mrf.mxu2  ;;  %v4626_v31 = vld [vmem:[%s6867_s1 + $0x794] sm:$0xf0] }
  0xb4   :  { %2207 = vmatpush.bf16.msrb.mxu1 %v3806_v12  ;;  %v1013_v55 = vadd.f32 %v1012_v45, %v994_v32  ;;  %v3933_v12 = vld [vmem:[%s6867_s1 + $0x508] sm:$0xf] }
  0xb5   :  { %2188 = vmatpush.bf16.msrb.mxu0 %v3742_v49  ;;  %v3934_v32 = vor.u32 %v4586_v16, %v3933_v12  ;;  %v4077_v12 = vld [vmem:[%s6867_s1 + $0x748] sm:$0xf] }
  0xb6   :  { %2241 = vmatpush.bf16.msrb.mxu3 %v3966_v62  ;;  %v4616_v62 = vld [vmem:[%s6867_s1 + $0x6f4] sm:$0xf0]  ;;  %v6055_v7 = vadd.f32 %v1031_v58, %v1013_v55 }
  0xb7   :  { %2223 = vmatpush.bf16.msrb.mxu2 %v3894_v63  ;;  %v978_v63 = vadd.f32 %v977_v59, %v5917_v25  ;;  %v996_v2 = vpop.f32.mrf.mxu1  ;;  %v4054_v19 = vor.u32 %v4616_v62, %v4053_v52  ;;  %3610 = vmatmul.msk.bf16.gmra.mxu1 %vm956_vm0, %v5620_v21  ;;  %v4133_v52 = vld [vmem:[%s6867_s1 + $0x828] sm:$0xf]  ;;  %v4636_v55 = vld [vmem:[%s6867_s1 + $0x834] sm:$0xf0]  ;;  %v4515_v62 = vld [vmem:[%s6867_s1 + $0xac] sm:$0xf] }
  0xb8   :  { %2276 = vmatpush.bf16.msra.mxu1 %v4118_v22  ;;  %v3671_v22 = vld [vmem:[%s6867_s1 + $0xf8] sm:$0xf0]  ;;  %1280 = vmatmul.bf16.gmra.mxu0 %v5406_v14  ;;  %v4624_v58 = vld [vmem:[%s6867_s1 + $0x774] sm:$0xf0]  ;;  %v4134_v4 = vor.u32 %v4636_v55, %v4133_v52  ;;  %v4061_v55 = vld [vmem:[%s6867_s1 + $0x708] sm:$0xf] }
  0xb9   :  { %v997_v15 = vadd.f32 %v996_v2, %v978_v63  ;;  %2156 = vmatmul.bf16.gmra.mxu2 %v5103_v44  ;;  %2257 = vmatpush.bf16.msra.mxu0 %v4054_v19  ;;  %v3674_v34 = vor.u32 %v4519_v20, %v3671_v22  ;;  %v3655_v63 = vld [vmem:[%s6867_s1 + $0xb8] sm:$0xf0]  ;;  %v4029_v2 = vld [vmem:[%s6867_s1 + $0x688] sm:$0xf]  ;;  %v4622_v19 = vld [vmem:[%s6867_s1 + $0x754] sm:$0xf0] }
  0xba   :  { %2242 = vmatpush.bf16.msrb.mxu3 %v3958_v29  ;;  %v4638_v29 = vld [vmem:[%s6867_s1 + $0x854] sm:$0xf0]  ;;  %v3658_v16 = vor.u32 %v4515_v62, %v3655_v63  ;;  %v4125_v20 = vld [vmem:[%s6867_s1 + $0x808] sm:$0xf]  ;;  %v3855_v62 = vld [vmem:[%s6867_s1 + $0x3d8] sm:$0xf0] }
  0xbb   :  { %2224 = vmatpush.bf16.msrb.mxu2 %v3886_v30  ;;  %2175 = vmatmul.bf16.gmra.mxu3 %v5114_v50  ;;  %v4093_v30 = vld [vmem:[%s6867_s1 + $0x788] sm:$0xf]  ;;  %v1015_v33 = vpop.f32.mrf.mxu2  ;;  %v4634_v22 = vld [vmem:[%s6867_s1 + $0x814] sm:$0xf0] }
  0xbc   :  { %2277 = vmatpush.bf16.msra.mxu1 %v4110_v39  ;;  %v1016_v38 = vadd.f32 %v1015_v33, %v997_v15  ;;  %v1034_v39 = vpop.f32.mrf.mxu3  ;;  %v4094_v45 = vor.u32 %v4626_v31, %v4093_v30 }
  0xbd   :  { %2258 = vmatpush.bf16.msra.mxu0 %v4046_v35  ;;  %v4078_v35 = vor.u32 %v4622_v19, %v4077_v12  ;;  %v3799_v19 = vld [vmem:[%s6867_s1 + $0x2f8] sm:$0xf0] }
  0xbe   :  { %2243 = vmatpush.bf16.msrb.mxu3 %v3950_v40  ;;  %v979_v40 = vpop.f32.mrf.mxu0  ;;  %v6117_v59 = vadd.f32 %v1034_v39, %v1016_v38 }
  0xbf   :  { %2225 = vmatpush.bf16.msrb.mxu2 %v3878_v41  ;;  %v4142_v41 = vor.u32 %v4638_v29, %v4141_v26  ;;  %v980_v47 = vadd.f32 %v979_v40, %v5917_v25  ;;  %v998_v49 = vpop.f32.mrf.mxu1  ;;  %v3666_v25 = vor.u32 %v4517_v36, %v3663_v37  ;;  %v3647_v26 = vld [vmem:[%s6867_s1 + $0x98] sm:$0xf0]  ;;  %v4608_v29 = vld [vmem:[%s6867_s1 + $0x674] sm:$0xf0]  ;;  %v4126_v36 = vor.u32 %v4634_v22, %v4125_v20  ;;  %v4069_v37 = vld [vmem:[%s6867_s1 + $0x728] sm:$0xf] }
  0xc0   :  { %2278 = vmatpush.bf16.msra.mxu1 %v4102_v27  ;;  %v4021_v27 = vld [vmem:[%s6867_s1 + $0x668] sm:$0xf]  ;;  %v4620_v40 = vld [vmem:[%s6867_s1 + $0x734] sm:$0xf0] }
  0xc1   :  { %v999_v60 = vadd.f32 %v998_v49, %v980_v47  ;;  %2259 = vmatpush.bf16.msra.mxu0 %v4038_v61  ;;  %v4022_v39 = vor.u32 %v4608_v29, %v4021_v27  ;;  %v4509_v49 = vld [vmem:[%s6867_s1 + $0x4c] sm:$0xf]  ;;  %v4070_v52 = vor.u32 %v4620_v40, %v4069_v37 }
  0xc2   :  { %2244 = vmatpush.bf16.msrb.mxu3 %v3942_v10  ;;  %v4086_v10 = vor.u32 %v4624_v58, %v4085_v46  ;;  %v4606_v46 = vld [vmem:[%s6867_s1 + $0x654] sm:$0xf0]  ;;  %v4565_v61 = vld [vmem:[%s6867_s1 + $0x3cc] sm:$0xf] }
  0xc3   :  { %2226 = vmatpush.bf16.msrb.mxu2 %v3870_v11  ;;  %v4513_v11 = vld [vmem:[%s6867_s1 + $0x8c] sm:$0xf]  ;;  %v1017_v15 = vpop.f32.mrf.mxu2 }
  0xc4   :  { %2279 = vmatpush.bf16.msra.mxu1 %v4094_v45  ;;  %v1018_v23 = vadd.f32 %v1017_v15, %v999_v60  ;;  %v1036_v24 = vpop.f32.mrf.mxu3  ;;  %v3650_v38 = vor.u32 %v4513_v11, %v3647_v26  ;;  %v4013_v45 = vld [vmem:[%s6867_s1 + $0x648] sm:$0xf]  ;;  %v3858_v11 = vor.u32 %v4565_v61, %v3855_v62  ;;  %v4507_v27 = vld [vmem:[%s6867_s1 + $0x2c] sm:$0xf] }
  0xc5   :  { %v4014_v60 = vor.u32 %v4606_v46, %v4013_v45  ;;  %v4563_v29 = vld [vmem:[%s6867_s1 + $0x3ac] sm:$0xf]  ;;  %v3615_v46 = vld [vmem:[%s6867_s1 + $0x18] sm:$0xf0] }
  0xc6   :  { %2245 = vmatpush.bf16.msrb.mxu3 %v3934_v32  ;;  %v1048_v30 = vpop.f32.mrf.mxu0  ;;  %v6155_v32 = vadd.f32 %v1036_v24, %v1018_v23  ;;  %v4505_v37 = vld [vmem:[%s6867_s1 + $0xc] sm:$0xf] }
  0xc7   :  { %2299 = vmatpush.bf16.msra.mxu2 %v4150_v18  ;;  %v4030_v18 = vor.u32 %v4610_v3, %v4029_v2  ;;  %v1067_v31 = vpop.f32.mrf.mxu1  ;;  %v1049_v33 = vadd.f32 %v1048_v30, %v6004_v28  ;;  %v4567_v28 = vld [vmem:[%s6867_s1 + $0x3ec] sm:$0xf]  ;;  %2208 = vmatmul.bf16.vlgmr.msrb.gmra.mxu1 %v4992_v57  ;;  %v3631_v3 = vld [vmem:[%s6867_s1 + $0x58] sm:$0xf0] }
  0xc8   :  { %2280 = vmatpush.bf16.msra.mxu1 %v4086_v10  ;;  %2189 = vmatmul.bf16.vlgmr.msrb.gmra.mxu0 %v4984_v54  ;;  %v4604_v10 = vld [vmem:[%s6867_s1 + $0x634] sm:$0xf0]  ;;  %v3634_v24 = vor.u32 %v4509_v49, %v3631_v3  ;;  %v3839_v49 = vld [vmem:[%s6867_s1 + $0x398] sm:$0xf0] }
  0xc9   :  { %2260 = vmatpush.bf16.msra.mxu0 %v4030_v18  ;;  %v1068_v42 = vadd.f32 %v1067_v31, %v1049_v33  ;;  %2227 = vmatmul.bf16.vlgmr.msrb.gmra.mxu2 %v5259_v0  ;;  %v4551_v18 = vld [vmem:[%s6867_s1 + $0x2ec] sm:$0xf]  ;;  %v3623_v31 = vld [vmem:[%s6867_s1 + $0x38] sm:$0xf0]  ;;  %v3997_v33 = vld [vmem:[%s6867_s1 + $0x608] sm:$0xf] }
  0xca   :  { %2314 = vmatpush.bf16.msra.mxu3 %v3674_v34  ;;  %v4511_v34 = vld [vmem:[%s6867_s1 + $0x6c] sm:$0xf] }
  0xcb   :  { %2300 = vmatpush.bf16.msra.mxu2 %v4142_v41  ;;  %v3863_v41 = vld [vmem:[%s6867_s1 + $0x3f8] sm:$0xf0]  ;;  %2246 = vmatmul.bf16.vlgmr.msrb.gmra.mxu3 %v5261_v1  ;;  %v3642_v58 = vor.u32 %v4511_v34, %v3639_v43  ;;  %v4602_v34 = vld [vmem:[%s6867_s1 + $0x614] sm:$0xf0] }
  0xcc   :  { %v3866_v47 = vor.u32 %v4567_v28, %v3863_v41  ;;  %2281 = vmatpush.bf16.msra.mxu1 %v4078_v35  ;;  %v1086_v63 = vpop.f32.mrf.mxu2  ;;  %v3802_v35 = vor.u32 %v4551_v18, %v3799_v19  ;;  %v3998_v40 = vor.u32 %v4602_v34, %v3997_v33  ;;  %v3735_v28 = vld [vmem:[%s6867_s1 + $0x1f8] sm:$0xf0]  ;;  %v4549_v41 = vld [vmem:[%s6867_s1 + $0x2cc] sm:$0xf] }
  0xcd   :  { %2261 = vmatpush.bf16.msra.mxu0 %v4022_v39  ;;  %v1087_v12 = vadd.f32 %v1086_v63, %v1068_v42  ;;  %v3626_v39 = vor.u32 %v4507_v27, %v3623_v31  ;;  %v3791_v42 = vld [vmem:[%s6867_s1 + $0x2d8] sm:$0xf0]  ;;  %v4533_v63 = vld [vmem:[%s6867_s1 + $0x1cc] sm:$0xf] }
  0xce   :  { %2315 = vmatpush.bf16.msra.mxu3 %v3666_v25  ;;  %v4618_v25 = vld [vmem:[%s6867_s1 + $0x714] sm:$0xf0]  ;;  %v1105_v2 = vpop.f32.mrf.mxu3  ;;  %v1050_v15 = vpop.f32.mrf.mxu0  ;;  %v4559_v18 = vld [vmem:[%s6867_s1 + $0x36c] sm:$0xf]  ;;  %v3831_v19 = vld [vmem:[%s6867_s1 + $0x378] sm:$0xf0] }
  0xcf   :  { %2301 = vmatpush.bf16.msra.mxu2 %v4134_v4  ;;  %v4005_v4 = vld [vmem:[%s6867_s1 + $0x628] sm:$0xf]  ;;  %v1051_v20 = vadd.f32 %v1050_v15, %v6055_v7  ;;  %v4062_v22 = vor.u32 %v4618_v25, %v4061_v55  ;;  %v6217_v23 = vadd.f32 %v1105_v2, %v1087_v12  ;;  %v3847_v7 = vld [vmem:[%s6867_s1 + $0x3b8] sm:$0xf0]  ;;  %v3794_v2 = vor.u32 %v4549_v41, %v3791_v42 }
  0xd0   :  { %2282 = vmatpush.bf16.msra.mxu1 %v4070_v52  ;;  %v4006_v26 = vor.u32 %v4604_v10, %v4005_v4  ;;  %v3927_v25 = vld [vmem:[%s6867_s1 + $0x4f8] sm:$0xf0]  ;;  %v3618_v4 = vor.u32 %v4505_v37, %v3615_v46  ;;  %v3834_v31 = vor.u32 %v4559_v18, %v3831_v19  ;;  %v4553_v19 = vld [vmem:[%s6867_s1 + $0x30c] sm:$0xf] }
  0xd1   :  { %2262 = vmatpush.bf16.msra.mxu0 %v4014_v60  ;;  %v4583_v60 = vld [vmem:[%s6867_s1 + $0x4ec] sm:$0xf]  ;;  %v3727_v10 = vld [vmem:[%s6867_s1 + $0x1d8] sm:$0xf0] }
  0xd2   :  { %2316 = vmatpush.bf16.msra.mxu3 %v3658_v16  ;;  %v1069_v16 = vpop.f32.mrf.mxu1  ;;  %v3823_v37 = vld [vmem:[%s6867_s1 + $0x358] sm:$0xf0] }
  0xd3   :  { %2302 = vmatpush.bf16.msra.mxu2 %v4126_v36  ;;  %v1070_v30 = vadd.f32 %v1069_v16, %v1051_v20  ;;  %v3850_v36 = vor.u32 %v4563_v29, %v3847_v7  ;;  %v3930_v16 = vor.u32 %v4583_v60, %v3927_v25  ;;  %v4581_v20 = vld [vmem:[%s6867_s1 + $0x4cc] sm:$0xf]  ;;  %v3719_v29 = vld [vmem:[%s6867_s1 + $0x1b8] sm:$0xf0] }
  0xd4   :  { %2283 = vmatpush.bf16.msra.mxu1 %v4062_v22  ;;  %v1088_v43 = vpop.f32.mrf.mxu2  ;;  %v3919_v22 = vld [vmem:[%s6867_s1 + $0x4d8] sm:$0xf0]  ;;  %v4545_v7 = vld [vmem:[%s6867_s1 + $0x28c] sm:$0xf] }
  0xd5   :  { %2263 = vmatpush.bf16.msra.mxu0 %v4006_v26  ;;  %v1089_v52 = vadd.f32 %v1088_v43, %v1070_v30  ;;  %v4531_v26 = vld [vmem:[%s6867_s1 + $0x1ac] sm:$0xf]  ;;  %v3775_v30 = vld [vmem:[%s6867_s1 + $0x298] sm:$0xf0] }
  0xd6   :  { %2317 = vmatpush.bf16.msra.mxu3 %v3650_v38  ;;  %v4535_v38 = vld [vmem:[%s6867_s1 + $0x1ec] sm:$0xf]  ;;  %v1107_v45 = vpop.f32.mrf.mxu3  ;;  %v1053_v55 = vpop.f32.mrf.mxu0  ;;  %v3911_v41 = vld [vmem:[%s6867_s1 + $0x4b8] sm:$0xf0]  ;;  %v3722_v43 = vor.u32 %v4531_v26, %v3719_v29  ;;  %v3778_v46 = vor.u32 %v4545_v7, %v3775_v30 }
  0xd7   :  { %2371 = vmatpush.bf16.msrb.mxu2 %v3866_v47  ;;  %v4561_v47 = vld [vmem:[%s6867_s1 + $0x38c] sm:$0xf]  ;;  %v1054_v61 = vadd.f32 %v1053_v55, %v6117_v59  ;;  %v3738_v62 = vor.u32 %v4535_v38, %v3735_v28  ;;  %v6271_v3 = vadd.f32 %v1107_v45, %v1089_v52  ;;  %v3783_v59 = vld [vmem:[%s6867_s1 + $0x2b8] sm:$0xf0]  ;;  %2213 = vmatmul.bf16.gmra.mxu1 %v5124_v56 }
  0xd8   :  { %2352 = vmatpush.bf16.msrb.mxu1 %v3802_v35  ;;  %v3842_v12 = vor.u32 %v4561_v47, %v3839_v49  ;;  %2194 = vmatmul.bf16.gmra.mxu0 %v5116_v51  ;;  %v3922_v35 = vor.u32 %v4581_v20, %v3919_v22  ;;  %v4579_v28 = vld [vmem:[%s6867_s1 + $0x4ac] sm:$0xf]  ;;  %v3711_v49 = vld [vmem:[%s6867_s1 + $0x198] sm:$0xf0] }
  0xd9   :  { %2264 = vmatpush.bf16.msra.mxu0 %v3998_v40  ;;  %2232 = vmatmul.bf16.gmra.mxu2 %v5391_v8  ;;  %v4529_v45 = vld [vmem:[%s6867_s1 + $0x18c] sm:$0xf]  ;;  %v3914_v60 = vor.u32 %v4579_v28, %v3911_v41  ;;  %v3759_v18 = vld [vmem:[%s6867_s1 + $0x258] sm:$0xf0] }
  0xda   :  { %2318 = vmatpush.bf16.msra.mxu3 %v3642_v58  ;;  %v1072_v58 = vpop.f32.mrf.mxu1  ;;  %v4543_v52 = vld [vmem:[%s6867_s1 + $0x26c] sm:$0xf]  ;;  %v3807_v20 = vld [vmem:[%s6867_s1 + $0x318] sm:$0xf0] }
  0xdb   :  { %2372 = vmatpush.bf16.msrb.mxu2 %v3858_v11  ;;  %v4547_v11 = vld [vmem:[%s6867_s1 + $0x2ac] sm:$0xf]  ;;  %v1073_v15 = vadd.f32 %v1072_v58, %v1054_v61  ;;  %2251 = vmatmul.bf16.gmra.mxu3 %v5393_v9  ;;  %v3815_v61 = vld [vmem:[%s6867_s1 + $0x338] sm:$0xf0] }
  0xdc   :  { %2353 = vmatpush.bf16.msrb.mxu1 %v3794_v2  ;;  %v3786_v27 = vor.u32 %v4547_v11, %v3783_v59  ;;  %v1091_v33 = vpop.f32.mrf.mxu2  ;;  %v4555_v25 = vld [vmem:[%s6867_s1 + $0x32c] sm:$0xf]  ;;  %v3903_v2 = vld [vmem:[%s6867_s1 + $0x498] sm:$0xf0] }
  0xdd   :  { %2333 = vmatpush.bf16.msrb.mxu0 %v3738_v62  ;;  %v1092_v38 = vadd.f32 %v1091_v33, %v1073_v15  ;;  %v3714_v62 = vor.u32 %v4529_v45, %v3711_v49  ;;  %v3703_v11 = vld [vmem:[%s6867_s1 + $0x178] sm:$0xf0]  ;;  %v4541_v59 = vld [vmem:[%s6867_s1 + $0x24c] sm:$0xf] }
  0xde   :  { %2319 = vmatpush.bf16.msra.mxu3 %v3634_v24  ;;  %v3730_v24 = vor.u32 %v4533_v63, %v3727_v10  ;;  %v1110_v34 = vpop.f32.mrf.mxu3  ;;  %v4577_v63 = vld [vmem:[%s6867_s1 + $0x48c] sm:$0xf]  ;;  %v3887_v45 = vld [vmem:[%s6867_s1 + $0x458] sm:$0xf0] }
  0xdf   :  { %2373 = vmatpush.bf16.msrb.mxu2 %v3850_v36  ;;  %v4557_v36 = vld [vmem:[%s6867_s1 + $0x34c] sm:$0xf]  ;;  %v6326_v47 = vadd.f32 %v1110_v34, %v1092_v38  ;;  %v3906_v29 = vor.u32 %v4577_v63, %v3903_v2  ;;  %v4119_v38 = vld [vmem:[%s6867_s1 + $0x7f8] sm:$0xf0] }
  0xe0   :  { %2354 = vmatpush.bf16.msrb.mxu1 %v3786_v27  ;;  %v3826_v55 = vor.u32 %v4557_v36, %v3823_v37  ;;  %v4527_v10 = vld [vmem:[%s6867_s1 + $0x16c] sm:$0xf]  ;;  %v3810_v36 = vor.u32 %v4553_v19, %v3807_v20  ;;  %v4103_v20 = vld [vmem:[%s6867_s1 + $0x7b8] sm:$0xf0] }
  0xe1   :  { %2334 = vmatpush.bf16.msrb.mxu0 %v3730_v24  ;;  %v3706_v7 = vor.u32 %v4527_v10, %v3703_v11  ;;  %v4575_v30 = vld [vmem:[%s6867_s1 + $0x46c] sm:$0xf] }
  0xe2   :  { %2320 = vmatpush.bf16.msra.mxu3 %v3626_v39  ;;  %v1055_v39 = vpop.f32.mrf.mxu0  ;;  %v1074_v40 = vpop.f32.mrf.mxu1  ;;  %v4525_v33 = vld [vmem:[%s6867_s1 + $0x14c] sm:$0xf] }
  0xe3   :  { %2374 = vmatpush.bf16.msrb.mxu2 %v3842_v12  ;;  %v1056_v42 = vadd.f32 %v1055_v39, %v6155_v32  ;;  %v3767_v32 = vld [vmem:[%s6867_s1 + $0x278] sm:$0xf0]  ;;  %v3818_v12 = vor.u32 %v4555_v25, %v3815_v61  ;;  %v4631_v37 = vld [vmem:[%s6867_s1 + $0x7ec] sm:$0xf] }
  0xe4   :  { %2355 = vmatpush.bf16.msrb.mxu1 %v3778_v46  ;;  %v1093_v15 = vpop.f32.mrf.mxu2  ;;  %v4539_v39 = vld [vmem:[%s6867_s1 + $0x22c] sm:$0xf]  ;;  %v4122_v28 = vor.u32 %v4631_v37, %v4119_v38  ;;  %v3743_v25 = vld [vmem:[%s6867_s1 + $0x218] sm:$0xf0] }
  0xe5   :  { %v1075_v58 = vadd.f32 %v1074_v40, %v1056_v42  ;;  %2335 = vmatpush.bf16.msrb.mxu0 %v3722_v43  ;;  %v3751_v40 = vld [vmem:[%s6867_s1 + $0x238] sm:$0xf0]  ;;  %v4573_v43 = vld [vmem:[%s6867_s1 + $0x44c] sm:$0xf] }
  0xe6   :  { %2321 = vmatpush.bf16.msra.mxu3 %v3618_v4  ;;  %v3770_v4 = vor.u32 %v4543_v52, %v3767_v32  ;;  %v4523_v46 = vld [vmem:[%s6867_s1 + $0x12c] sm:$0xf]  ;;  %v3754_v49 = vor.u32 %v4539_v39, %v3751_v40  ;;  %v4111_v32 = vld [vmem:[%s6867_s1 + $0x7d8] sm:$0xf0]  ;;  %v3890_v11 = vor.u32 %v4573_v43, %v3887_v45 }
  0xe7   :  { %2375 = vmatpush.bf16.msrb.mxu2 %v3834_v31  ;;  %v1094_v22 = vadd.f32 %v1093_v15, %v1075_v58  ;;  %v3895_v31 = vld [vmem:[%s6867_s1 + $0x478] sm:$0xf0]  ;;  %2284 = vmatmul.bf16.vlgmr.msra.gmra.mxu1 %v5274_v6  ;;  %v4629_v52 = vld [vmem:[%s6867_s1 + $0x7cc] sm:$0xf] }
  0xe8   :  { %2356 = vmatpush.bf16.msrb.mxu1 %v3770_v4  ;;  %2265 = vmatmul.bf16.vlgmr.msra.gmra.mxu0 %v5272_v5  ;;  %v3898_v41 = vor.u32 %v4575_v30, %v3895_v31  ;;  %v4114_v61 = vor.u32 %v4629_v52, %v4111_v32  ;;  %v4615_v2 = vld [vmem:[%s6867_s1 + $0x6ec] sm:$0xf]  ;;  %v4055_v4 = vld [vmem:[%s6867_s1 + $0x6f8] sm:$0xf0] }
  0xe9   :  { %2336 = vmatpush.bf16.msrb.mxu0 %v3714_v62  ;;  %4155 = vmatmul.msk.bf16.vlgmr.msra.gmra.mxu2 %vm956_vm0, %v5511_v17  ;;  %v3879_v15 = vld [vmem:[%s6867_s1 + $0x438] sm:$0xf0]  ;;  %v4627_v19 = vld [vmem:[%s6867_s1 + $0x7ac] sm:$0xf] }
  0xea   :  { %2390 = vmatpush.bf16.msrb.mxu3 %v3930_v16  ;;  %v1112_v16 = vpop.f32.mrf.mxu3  ;;  %v1124_v24 = vpop.f32.mrf.mxu0  ;;  %v4613_v37 = vld [vmem:[%s6867_s1 + $0x6cc] sm:$0xf]  ;;  %v4047_v38 = vld [vmem:[%s6867_s1 + $0x6d8] sm:$0xf0] }
  0xeb   :  { %2376 = vmatpush.bf16.msrb.mxu2 %v3826_v55  ;;  %v6367_v26 = vpop.f32.mrf.mxu1  ;;  %v6370_v27 = vadd.f32 %v1124_v24, %v6217_v23  ;;  %v6381_v34 = vadd.f32 %v1112_v16, %v1094_v22  ;;  %v3695_v23 = vld [vmem:[%s6867_s1 + $0x158] sm:$0xf0]  ;;  %2322 = vmatmul.bf16.vlgmr.msra.gmra.mxu3 %v4971_v48  ;;  %v4521_v16 = vld [vmem:[%s6867_s1 + $0x10c] sm:$0xf]  ;;  %v4050_v32 = vor.u32 %v4613_v37, %v4047_v38 }
  0xec   :  { %v3698_v42 = vor.u32 %v4525_v33, %v3695_v23  ;;  %v3687_v48 = vld [vmem:[%s6867_s1 + $0x138] sm:$0xf0]  ;;  %v6421_v55 = vpop.f32.mrf.mxu2  ;;  %v4599_v22 = vld [vmem:[%s6867_s1 + $0x5ec] sm:$0xf] }
  0xed   :  { %2337 = vmatpush.bf16.msrb.mxu0 %v3706_v7  ;;  %v3991_v24 = vld [vmem:[%s6867_s1 + $0x5f8] sm:$0xf0]  ;;  %v4106_v7 = vor.u32 %v4627_v19, %v4103_v20  ;;  %v4569_v33 = vld [vmem:[%s6867_s1 + $0x40c] sm:$0xf] }
  0xee   :  { %2391 = vmatpush.bf16.msrb.mxu3 %v3922_v35  ;;  %v3762_v35 = vor.u32 %v4541_v59, %v3759_v18  ;;  %v3690_v59 = vor.u32 %v4523_v46, %v3687_v48  ;;  %v3871_v23 = vld [vmem:[%s6867_s1 + $0x418] sm:$0xf0]  ;;  %v4625_v46 = vld [vmem:[%s6867_s1 + $0x78c] sm:$0xf] }
  0xef   :  { %2377 = vmatpush.bf16.msrb.mxu2 %v3818_v12  ;;  %v4571_v12 = vld [vmem:[%s6867_s1 + $0x42c] sm:$0xf]  ;;  %v4095_v48 = vld [vmem:[%s6867_s1 + $0x798] sm:$0xf0]  ;;  %v3874_v52 = vor.u32 %v4569_v33, %v3871_v23 }
  0xf0   :  { %2357 = vmatpush.bf16.msrb.mxu1 %v3762_v35  ;;  %v3882_v30 = vor.u32 %v4571_v12, %v3879_v15  ;;  %v3994_v35 = vor.u32 %v4599_v22, %v3991_v24  ;;  %v4623_v12 = vld [vmem:[%s6867_s1 + $0x76c] sm:$0xf]  ;;  %v4087_v15 = vld [vmem:[%s6867_s1 + $0x778] sm:$0xf0] }
  0xf1   :  { %2338 = vmatpush.bf16.msrb.mxu0 %v3698_v42  ;;  %v3983_v42 = vld [vmem:[%s6867_s1 + $0x5d8] sm:$0xf0]  ;;  %v4593_v19 = vld [vmem:[%s6867_s1 + $0x58c] sm:$0xf] }
  0xf2   :  { %2392 = vmatpush.bf16.msrb.mxu3 %v3914_v60  ;;  %v6423_v58 = vpop.f32.mrf.mxu3  ;;  %v4537_v60 = vld [vmem:[%s6867_s1 + $0x20c] sm:$0xf]  ;;  %v1126_v62 = vpop.f32.mrf.mxu0  ;;  %v4031_v20 = vld [vmem:[%s6867_s1 + $0x698] sm:$0xf0] }
  0xf3   :  { %2378 = vmatpush.bf16.msrb.mxu2 %v3810_v36  ;;  %v6431_v63 = vpop.f32.mrf.mxu1  ;;  %v6440_v10 = vadd.f32 %v1126_v62, %v6271_v3  ;;  %v3679_v3 = vld [vmem:[%s6867_s1 + $0x118] sm:$0xf0]  ;;  %v3746_v18 = vor.u32 %v4537_v60, %v3743_v25  ;;  %v4639_v36 = vld [vmem:[%s6867_s1 + $0x86c] sm:$0xf] }
  0xf4   :  { %2358 = vmatpush.bf16.msrb.mxu1 %v3754_v49  ;;  %v3682_v31 = vor.u32 %v4521_v16, %v3679_v3  ;;  %v6481_v39 = vpop.f32.mrf.mxu2  ;;  %v4611_v62 = vld [vmem:[%s6867_s1 + $0x6ac] sm:$0xf] }
  0xf5   :  { %2339 = vmatpush.bf16.msrb.mxu0 %v3690_v59  ;;  %v4098_v59 = vor.u32 %v4625_v46, %v4095_v48  ;;  %v3959_v46 = vld [vmem:[%s6867_s1 + $0x578] sm:$0xf0] }
  0xf6   :  { %2393 = vmatpush.bf16.msrb.mxu3 %v3906_v29  ;;  %v4058_v29 = vor.u32 %v4615_v2, %v4055_v4  ;;  %v3975_v2 = vld [vmem:[%s6867_s1 + $0x5b8] sm:$0xf0]  ;;  %v4637_v4 = vld [vmem:[%s6867_s1 + $0x84c] sm:$0xf] }
  0xf7   :  { %2447 = vmatpush.bf16.msra.mxu2 %v4122_v28  ;;  %v4151_v28 = vld [vmem:[%s6867_s1 + $0x878] sm:$0xf0]  ;;  %2289 = vmatmul.bf16.gmra.mxu1 %v5406_v14 }
  0xf8   :  { %2359 = vmatpush.bf16.msrb.mxu1 %v3746_v18  ;;  %v4154_v60 = vor.u32 %v4639_v36, %v4151_v28  ;;  %2270 = vmatmul.bf16.gmra.mxu0 %v5404_v13  ;;  %v4079_v36 = vld [vmem:[%s6867_s1 + $0x758] sm:$0xf0] }
  0xf9   :  { %2340 = vmatpush.bf16.msrb.mxu0 %v3682_v31  ;;  %4156 = vmatmul.msk.bf16.gmra.mxu2 %vm956_vm0, %v5620_v21  ;;  %v4135_v31 = vld [vmem:[%s6867_s1 + $0x838] sm:$0xf0] }
  0xfa   :  { %2394 = vmatpush.bf16.msrb.mxu3 %v3898_v41  ;;  %v6483_v40 = vpop.f32.mrf.mxu3  ;;  %v4597_v41 = vld [vmem:[%s6867_s1 + $0x5cc] sm:$0xf]  ;;  %v1129_v43 = vpop.f32.mrf.mxu0 }
  0xfb   :  { %2448 = vmatpush.bf16.msra.mxu2 %v4114_v61  ;;  %v6494_v45 = vpop.f32.mrf.mxu1  ;;  %v6503_v49 = vadd.f32 %v1129_v43, %v6326_v47  ;;  %v3986_v25 = vor.u32 %v4597_v41, %v3983_v42  ;;  %v4595_v61 = vld [vmem:[%s6867_s1 + $0x5ac] sm:$0xf]  ;;  %v4039_v47 = vld [vmem:[%s6867_s1 + $0x6b8] sm:$0xf0]  ;;  %2327 = vmatmul.bf16.gmra.mxu3 %v5103_v44 }
  0xfc   :  { %2428 = vmatpush.bf16.msra.mxu1 %v4058_v29  ;;  %v4042_v16 = vor.u32 %v4611_v62, %v4039_v47  ;;  %v3978_v3 = vor.u32 %v4595_v61, %v3975_v2  ;;  %v4609_v44 = vld [vmem:[%s6867_s1 + $0x68c] sm:$0xf]  ;;  %v6543_v22 = vpop.f32.mrf.mxu2  ;;  %v3967_v29 = vld [vmem:[%s6867_s1 + $0x598] sm:$0xf0] }
  0xfd   :  { %2409 = vmatpush.bf16.msra.mxu0 %v3994_v35  ;;  %v4621_v35 = vld [vmem:[%s6867_s1 + $0x74c] sm:$0xf]  ;;  %v4034_v38 = vor.u32 %v4609_v44, %v4031_v20  ;;  %v3970_v28 = vor.u32 %v4593_v19, %v3967_v29  ;;  %v4023_v42 = vld [vmem:[%s6867_s1 + $0x678] sm:$0xf0] }
  0xfe   :  { %2395 = vmatpush.bf16.msrb.mxu3 %v3890_v11  ;;  %v4143_v11 = vld [vmem:[%s6867_s1 + $0x858] sm:$0xf0]  ;;  %v4607_v41 = vld [vmem:[%s6867_s1 + $0x66c] sm:$0xf]  ;;  %v4082_v48 = vor.u32 %v4621_v35, %v4079_v36 }
  0xff   :  { %2449 = vmatpush.bf16.msra.mxu2 %v4106_v7  ;;  %v4146_v18 = vor.u32 %v4637_v4, %v4143_v11  ;;  %v4090_v7 = vor.u32 %v4623_v12, %v4087_v15  ;;  %v4015_v62 = vld [vmem:[%s6867_s1 + $0x658] sm:$0xf0]  ;;  %v4619_v47 = vld [vmem:[%s6867_s1 + $0x72c] sm:$0xf] }
 0x100   :  { %2429 = vmatpush.bf16.msra.mxu1 %v4050_v32  ;;  %v4127_v32 = vld [vmem:[%s6867_s1 + $0x818] sm:$0xf0]  ;;  %v4589_v12 = vld [vmem:[%s6867_s1 + $0x54c] sm:$0xf] }
 0x101   :  { %2410 = vmatpush.bf16.msra.mxu0 %v3986_v25  ;;  %v4605_v25 = vld [vmem:[%s6867_s1 + $0x64c] sm:$0xf]  ;;  %v4071_v2 = vld [vmem:[%s6867_s1 + $0x738] sm:$0xf0] }
 0x102   :  { %2396 = vmatpush.bf16.msrb.mxu3 %v3882_v30  ;;  %v6545_v24 = vpop.f32.mrf.mxu3  ;;  %v4635_v30 = vld [vmem:[%s6867_s1 + $0x82c] sm:$0xf]  ;;  %v1131_v33 = vpop.f32.mrf.mxu0  ;;  %v3951_v15 = vld [vmem:[%s6867_s1 + $0x558] sm:$0xf0]  ;;  %v4074_v19 = vor.u32 %v4619_v47, %v4071_v2 }
 0x103   :  { %2450 = vmatpush.bf16.msra.mxu2 %v4098_v59  ;;  %v6556_v23 = vpop.f32.mrf.mxu1  ;;  %v6565_v37 = vadd.f32 %v1131_v33, %v6381_v34  ;;  %v4138_v43 = vor.u32 %v4635_v30, %v4135_v31  ;;  %v4591_v34 = vld [vmem:[%s6867_s1 + $0x56c] sm:$0xf]  ;;  %v3954_v20 = vor.u32 %v4589_v12, %v3951_v15  ;;  %v4007_v29 = vld [vmem:[%s6867_s1 + $0x638] sm:$0xf0] }
 0x104   :  { %2430 = vmatpush.bf16.msra.mxu1 %v4042_v16  ;;  %v3962_v61 = vor.u32 %v4591_v34, %v3959_v46  ;;  %v6597_v11 = vpop.f32.mrf.mxu2  ;;  %v4603_v44 = vld [vmem:[%s6867_s1 + $0x62c] sm:$0xf]  ;;  %v4063_v30 = vld [vmem:[%s6867_s1 + $0x718] sm:$0xf0] }
 0x105   :  { %2411 = vmatpush.bf16.msra.mxu0 %v3978_v3  ;;  %v4587_v31 = vld [vmem:[%s6867_s1 + $0x52c] sm:$0xf]  ;;  %v3943_v33 = vld [vmem:[%s6867_s1 + $0x538] sm:$0xf0]  ;;  %v4010_v35 = vor.u32 %v4603_v44, %v4007_v29 }
 0x106   :  { %2397 = vmatpush.bf16.msrb.mxu3 %v3874_v52  ;;  %v4633_v52 = vld [vmem:[%s6867_s1 + $0x80c] sm:$0xf]  ;;  %v4660_v29 = vld [vmem:[%s6870_s3 + $0x58] sm:$0xff] }
 0x107   :  { %2451 = vmatpush.bf16.msra.mxu2 %v4090_v7  ;;  %v4130_v4 = vor.u32 %v4633_v52, %v4127_v32  ;;  %v4617_v7 = vld [vmem:[%s6867_s1 + $0x70c] sm:$0xf]  ;;  %2360 = vmatmul.bf16.vlgmr.msrb.gmra.mxu1 %v4984_v54  ;;  %v4664_v32 = vld [vmem:[%s6870_s3 + $0x78] sm:$0xff] }
 0x108   :  { %2431 = vmatpush.bf16.msra.mxu1 %v4034_v38  ;;  %2341 = vmatmul.bf16.vlgmr.msrb.gmra.mxu0 %v4982_v53  ;;  %v4066_v36 = vor.u32 %v4617_v7, %v4063_v30  ;;  %v3946_v53 = vor.u32 %v4587_v31, %v3943_v33  ;;  %v4601_v54 = vld [vmem:[%s6867_s1 + $0x60c] sm:$0xf]  ;;  %v3999_v38 = vld [vmem:[%s6867_s1 + $0x618] sm:$0xf0]  ;;  %v4659_v33 = vld [vmem:[%s6870_s3 + $0x50] sm:$0xff] }
 0x109   :  { %2412 = vmatpush.bf16.msra.mxu0 %v3970_v28  ;;  %2379 = vmatmul.bf16.vlgmr.msrb.gmra.mxu2 %v4992_v57  ;;  %v4698_v57 = vld [vmem:[%s6869_s2] sm:$0x3]  ;;  %v4662_v15 = vld [vmem:[%s6870_s3 + $0x68] sm:$0xff] }
 0x10a   :  { %2470 = vmatpush.bf16.msra.mxu3 %v4154_v60  ;;  %v4026_v60 = vor.u32 %v4607_v41, %v4023_v42  ;;  %v6599_v59 = vpop.f32.mrf.mxu3  ;;  %v1200_v16 = vpop.f32.mrf.mxu0  ;;  %v6640_v28 = vperm.slane %v4698_v57, 1  ;;  %v4585_v42 = vld [vmem:[%s6867_s1 + $0x50c] sm:$0xf] }
 0x10b   :  { %2452 = vmatpush.bf16.msra.mxu2 %v4082_v48  ;;  %v6607_v3 = vpop.f32.mrf.mxu1  ;;  %2398 = vmatmul.bf16.vlgmr.msrb.gmra.mxu3 %v5259_v0  ;;  %v4002_v48 = vor.u32 %v4601_v54, %v3999_v38  ;;  %v4654_v44 = vld [vmem:[%s6870_s3 + $0x28] sm:$0xff] }
 0x10c   :  { %2432 = vmatpush.bf16.msra.mxu1 %v4026_v60  ;;  %v1238_v0 = vpop.f32.mrf.mxu2  ;;  %v1144_v60 = vadd.f32 %v6367_v26, %v6640_v28  ;;  %v4655_v26 = vld [vmem:[%s6870_s3 + $0x30] sm:$0xff]  ;;  %v1149_v7 = vadd.f32 %v6494_v45, %v6640_v28 }
 0x10d   :  { %2413 = vmatpush.bf16.msra.mxu0 %v3962_v61  ;;  %v4663_v61 = vld [vmem:[%s6870_s3 + $0x70] sm:$0xff] }
 0x10e   :  { %2471 = vmatpush.bf16.msra.mxu3 %v4146_v18  ;;  %v4018_v18 = vor.u32 %v4605_v25, %v4015_v62  ;;  %v4656_v25 = vld [vmem:[%s6870_s3 + $0x38] sm:$0xff]  ;;  %v1163_v62 = vadd.f32 %v6421_v55, %v1144_v60  ;;  %v1146_v55 = vadd.f32 %v6431_v63, %v6640_v28 }
 0x10f   :  { %2453 = vmatpush.bf16.msra.mxu2 %v4074_v19 }
 0x110   :  { %2433 = vmatpush.bf16.msra.mxu1 %v4018_v18  ;;  %v1182_v18 = vadd.f32 %v6423_v58, %v1163_v62 }
 0x111   :  { %2414 = vmatpush.bf16.msra.mxu0 %v3954_v20 }
 0x112   :  { %2472 = vmatpush.bf16.msra.mxu3 %v4138_v43  ;;  %v1257_v41 = vpop.f32.mrf.mxu3  ;;  %v3935_v43 = vld [vmem:[%s6867_s1 + $0x518] sm:$0xf0]  ;;  %v1202_v34 = vpop.f32.mrf.mxu0  ;;  %v1201_v19 = vadd.f32 %v1200_v16, %v1182_v18  ;;  %v4653_v16 = vld [vmem:[%s6870_s3 + $0x20] sm:$0xff]  ;;  %v1307_v18 = vmax.f32 %v6440_v10, 0.0 }
 0x113   :  { %v1221_v46 = vpop.f32.mrf.mxu1  ;;  %2454 = vmatpush.bf16.msra.mxu2 %v4066_v36  ;;  %v3938_v52 = vor.u32 %v4585_v42, %v3935_v43  ;;  %v4651_v42 = vld [vmem:[%s6870_s3 + $0x10] sm:$0xff] }
 0x114   :  { %2434 = vmatpush.bf16.msra.mxu1 %v4010_v35  ;;  %v1240_v47 = vpop.f32.mrf.mxu2  ;;  %v1220_v63 = vadd.f32 %v6607_v3, %v1201_v19  ;;  %v4652_v3 = vld [vmem:[%s6870_s3 + $0x18] sm:$0xff]  ;;  %v1168_v35 = vadd.f32 %v6543_v22, %v1149_v7  ;;  %v4658_v22 = vld [vmem:[%s6870_s3 + $0x48] sm:$0xff] }
 0x115   :  { %2415 = vmatpush.bf16.msra.mxu0 %v3946_v53 }
 0x116   :  { %2473 = vmatpush.bf16.msra.mxu3 %v4130_v4  ;;  %v1239_v30 = vadd.f32 %v1238_v0, %v1220_v63  ;;  %v6712_v0 = vld [vmem:[%s6869_s2 + $0x2] sm:$0x3] }
 0x117   :  { %2365 = vmatmul.bf16.gmra.mxu1 %v5116_v51  ;;  %v1165_v51 = vadd.f32 %v6481_v39, %v1146_v55 }
 0x118   :  { %2435 = vmatpush.bf16.msra.mxu1 %v4002_v48  ;;  %2346 = vmatmul.bf16.gmra.mxu0 %v5114_v50  ;;  %v4661_v50 = vld [vmem:[%s6870_s3 + $0x60] sm:$0xff]  ;;  %v1258_v36 = vadd.f32 %v1257_v41, %v1239_v30  ;;  %v1187_v41 = vadd.f32 %v6545_v24, %v1168_v35  ;;  %v1305_v48 = vmax.f32 %v6370_v27, 0.0 }
 0x119   :  { %2416 = vmatpush.bf16.msra.mxu0 %v3938_v52  ;;  %2384 = vmatmul.bf16.gmra.mxu2 %v5124_v56  ;;  %v1184_v39 = vadd.f32 %v6483_v40, %v1165_v51  ;;  %v1151_v52 = vadd.f32 %v6556_v23, %v6640_v28 }
 0x11a   :  { %v6660_v2 = vpop.f32.mrf.mxu3  ;;  %v1205_v4 = vpop.f32.mrf.mxu0 }
 0x11b   :  { %v6662_v12 = vpop.f32.mrf.mxu1  ;;  %2403 = vmatmul.bf16.gmra.mxu3 %v5391_v8  ;;  %v1203_v31 = vadd.f32 %v1202_v34, %v1184_v39  ;;  %v1206_v24 = vadd.f32 %v1205_v4, %v1187_v41  ;;  %v4649_v4 = vld [vmem:[%s6870_s3] sm:$0xff] }
 0x11c   :  { %2828 = vmatpush.bf16.msrb.mxu1 %v4664_v32  ;;  %v1243_v58 = vpop.f32.mrf.mxu2 }
 0x11d   :  { %2809 = vmatpush.bf16.msrb.mxu0 %v4656_v25  ;;  %v1222_v38 = vadd.f32 %v1221_v46, %v1203_v31  ;;  %v6727_v46 = vperm.slane %v6712_v0, 0  ;;  %v1225_v62 = vadd.f32 %v6662_v12, %v1206_v24 }
 0x11f   :  { %v1241_v43 = vadd.f32 %v1240_v47, %v1222_v38 }
 0x120   :  { %2829 = vmatpush.bf16.msrb.mxu1 %v4663_v61 }
 0x121   :  { %2810 = vmatpush.bf16.msrb.mxu0 %v4655_v26 }
 0x122   :  { %v6684_v56 = vpop.f32.mrf.mxu3  ;;  %v6686_v8 = vpop.f32.mrf.mxu0 }
 0x123   :  { %v6688_v20 = vpop.f32.mrf.mxu1 }
 0x124   :  { %2830 = vmatpush.bf16.msrb.mxu1 %v4662_v15  ;;  %v1245_v53 = vpop.f32.mrf.mxu2 }
 0x125   :  { %2811 = vmatpush.bf16.msrb.mxu0 %v4654_v44 }
 0x127   :  { %2436 = vmatmul.bf16.vlgmr.msra.gmra.mxu1 %v5272_v5  ;;  %v4657_v5 = vld [vmem:[%s6870_s3 + $0x40] sm:$0xff] }
 0x128   :  { %2831 = vmatpush.bf16.msrb.mxu1 %v4661_v50  ;;  %2417 = vmatmul.bf16.vlgmr.msra.gmra.mxu0 %v5261_v1  ;;  %v4650_v1 = vld [vmem:[%s6870_s3 + $0x8] sm:$0xff] }
 0x129   :  { %2812 = vmatpush.bf16.msrb.mxu0 %v4653_v16  ;;  %2455 = vmatmul.bf16.vlgmr.msra.gmra.mxu2 %v5274_v6  ;;  %v1170_v6 = vadd.f32 %v6597_v11, %v1151_v52 }
 0x12a   :  { %v6707_v40 = vpop.f32.mrf.mxu3  ;;  %v1276_v54 = vpop.f32.mrf.mxu0 }
 0x12b   :  { %v1295_v45 = vpop.f32.mrf.mxu1  ;;  %v1277_v57 = vadd.f32 %v1276_v54, %v1258_v36  ;;  %4157 = vmatmul.msk.bf16.vlgmr.msra.gmra.mxu3 %vm956_vm0, %v5511_v17  ;;  %v1260_v17 = vadd.f32 %v6660_v2, %v1241_v43  ;;  %v1189_v11 = vadd.f32 %v6599_v59, %v1170_v6  ;;  %v1244_v2 = vadd.f32 %v1243_v58, %v1225_v62 }
 0x12c   :  { %2832 = vmatpush.bf16.msrb.mxu1 %v4660_v29  ;;  %v2152_v60 = vpop.f32.mrf.mxu2 }
 0x12d   :  { %2813 = vmatpush.bf16.msrb.mxu0 %v4652_v3  ;;  %v1296_v34 = vadd.f32 %v1295_v45, %v1277_v57  ;;  %v2153_v23 = vadd.f32 %v2152_v60, %v6727_v46  ;;  %v1208_v55 = vadd.f32 %v6686_v8, %v1189_v11  ;;  %v1263_v12 = vadd.f32 %v6684_v56, %v1244_v2 }
 0x12e   :  { %v1309_v56 = vmax.f32 %v6503_v49, 0.0 }
 0x12f   :  { %v1306_v32 = vmax.f32 %v1296_v34, 0.0  ;;  %v1227_v39 = vadd.f32 %v6688_v20, %v1208_v55 }
 0x130   :  { %2833 = vmatpush.bf16.msrb.mxu1 %v4659_v33 }
 0x131   :  { %2814 = vmatpush.bf16.msrb.mxu0 %v4651_v42  ;;  %v1313_v27 = vpack.c.bf16 %v1306_v32, %v1305_v48  ;;  %v1246_v7 = vadd.f32 %v1245_v53, %v1227_v39 }
 0x132   :  { %v2171_v25 = vpop.f32.mrf.mxu3  ;;  %v1278_v28 = vpop.f32.mrf.mxu0 }
 0x133   :  { %v1297_v61 = vpop.f32.mrf.mxu1  ;;  %1317 = vst [vmem:[#allocation2] sm:$0xff] %v1313_v27  ;;  %v1279_v47 = vadd.f32 %v1278_v28, %v1260_v17  ;;  %v2172_v26 = vadd.f32 %v2171_v25, %v2153_v23  ;;  %v1265_v30 = vadd.f32 %v6707_v40, %v1246_v7 }
 0x134   :  { %2834 = vmatpush.bf16.msrb.mxu1 %v4658_v22  ;;  %v2154_v50 = vpop.f32.mrf.mxu2 }
 0x135   :  { %2815 = vmatpush.bf16.msrb.mxu0 %v4650_v1  ;;  %v1298_v15 = vadd.f32 %v1297_v61, %v1279_v47  ;;  %v2155_v63 = vadd.f32 %v2154_v50, %v6727_v46 }
 0x137   :  { %v1308_v19 = vmax.f32 %v1298_v15, 0.0  ;;  %2441 = vmatmul.bf16.gmra.mxu1 %v5404_v13 }
 0x138   :  { %2835 = vmatpush.bf16.msrb.mxu1 %v4657_v5  ;;  %2422 = vmatmul.bf16.gmra.mxu0 %v5393_v9 }
 0x139   :  { %2816 = vmatpush.bf16.msrb.mxu0 %v4649_v4  ;;  %v1314_v44 = vpack.c.bf16 %v1308_v19, %v1307_v18  ;;  %2460 = vmatmul.bf16.gmra.mxu2 %v5406_v14  ;;  %v1311_v14 = vmax.f32 %v6565_v37, 0.0 }
 0x13a   :  { %v2173_v51 = vpop.f32.mrf.mxu3  ;;  %v1281_v16 = vpop.f32.mrf.mxu0  ;;  %v4161_v41 = vld [vmem:[#allocation2] sm:$0xf]  ;;  %v4641_v43 = vld [vmem:[#allocation2 + $0x4] sm:$0xf] }
 0x13b   :  { %v1300_v29 = vpop.f32.mrf.mxu1  ;;  %1318 = vst [vmem:[#allocation2 + $0x10] sm:$0xff] %v1314_v44  ;;  %v1282_v59 = vadd.f32 %v1281_v16, %v1263_v12  ;;  %v2174_v58 = vadd.f32 %v2173_v51, %v2155_v63  ;;  %4158 = vmatmul.msk.bf16.gmra.mxu3 %vm956_vm0, %v5620_v21 }
 0x13c   :  { %v2157_v31 = vpop.f32.mrf.mxu2 }
 0x13d   :  { %v1301_v10 = vadd.f32 %v1300_v29, %v1282_v59  ;;  %v2158_v33 = vadd.f32 %v2157_v31, %v6727_v46 }
 0x13f   :  { %v1310_v8 = vmax.f32 %v1301_v10, 0.0 }
 0x141   :  { %v1315_v20 = vpack.c.bf16 %v1310_v8, %v1309_v56 }
 0x142   :  { %v2176_v3 = vpop.f32.mrf.mxu3  ;;  %v1283_v35 = vpop.f32.mrf.mxu0  ;;  %v4643_v21 = vld [vmem:[#allocation2 + $0xc] sm:$0xf0]  ;;  %v4163_v45 = vld [vmem:[#allocation2 + $0x10] sm:$0xf0] }
 0x143   :  { %v1302_v36 = vpop.f32.mrf.mxu1  ;;  %1319 = vst [vmem:[#allocation2 + $0x20] sm:$0xff] %v1315_v20  ;;  %v1284_v9 = vadd.f32 %v1283_v35, %v1265_v30  ;;  %v2177_v13 = vadd.f32 %v2176_v3, %v2158_v33  ;;  %v4162_v48 = vor.u32 %v4643_v21, %v4161_v41  ;;  %v4166_v52 = vor.u32 %v4641_v43, %v4163_v45 }
 0x144   :  { %v2159_v38 = vpop.f32.mrf.mxu2 }
 0x145   :  { %v1303_v53 = vadd.f32 %v1302_v36, %v1284_v9  ;;  %v2160_v40 = vadd.f32 %v2159_v38, %v6727_v46 }
 0x147   :  { %v1312_v54 = vmax.f32 %v1303_v53, 0.0  ;;  %2836 = vmatmul.bf16.vlgmr.msrb.gmra.mxu1 %v4166_v52 }
 0x148   :  { %2817 = vmatmul.bf16.vlgmr.msrb.gmra.mxu0 %v4162_v48 }
 0x149   :  { %v1316_v49 = vpack.c.bf16 %v1312_v54, %v1311_v14 }
 0x14a   :  { %v2178_v57 = vpop.f32.mrf.mxu3  ;;  %v2190_v42 = vpop.f32.mrf.mxu0  ;;  %v4645_v11 = vld [vmem:[#allocation2 + $0x24] sm:$0xf] }
 0x14b   :  { %v2209_v22 = vpop.f32.mrf.mxu1  ;;  %1320 = vst [vmem:[#allocation2 + $0x30] sm:$0xff] %v1316_v49  ;;  %v2191_v34 = vadd.f32 %v2190_v42, %v2172_v26  ;;  %v2179_v24 = vadd.f32 %v2178_v57, %v2160_v40  ;;  %v4177_v26 = vld [vmem:[#allocation2 + $0x20] sm:$0xf] }
 0x14c   :  { %v2228_v37 = vpop.f32.mrf.mxu2 }
 0x14d   :  { %v2210_v32 = vadd.f32 %v2209_v22, %v2191_v34 }
 0x14f   :  { %v2229_v5 = vadd.f32 %v2228_v37, %v2210_v32 }
 0x152   :  { %v2247_v1 = vpop.f32.mrf.mxu3  ;;  %v2192_v6 = vpop.f32.mrf.mxu0  ;;  %v4647_v25 = vld [vmem:[#allocation2 + $0x2c] sm:$0xf0]  ;;  %v4179_v23 = vld [vmem:[#allocation2 + $0x30] sm:$0xf0] }
 0x153   :  { %v2211_v17 = vpop.f32.mrf.mxu1  ;;  %v2193_v27 = vadd.f32 %v2192_v6, %v2174_v58  ;;  %v2248_v60 = vadd.f32 %v2247_v1, %v2229_v5  ;;  %v4178_v15 = vor.u32 %v4647_v25, %v4177_v26  ;;  %v4182_v18 = vor.u32 %v4645_v11, %v4179_v23  ;;  %v4672_v1 = vld [vmem:[%s6870_s3 + $0xb8] sm:$0xff]  ;;  %v4671_v6 = vld [vmem:[%s6870_s3 + $0xb0] sm:$0xff]  ;;  %v4670_v23 = vld [vmem:[%s6870_s3 + $0xa8] sm:$0xff] }
 0x154   :  { %v2230_v28 = vpop.f32.mrf.mxu2  ;;  %v4680_v5 = vld [vmem:[%s6870_s3 + $0xf8] sm:$0xff]  ;;  %2847 = vmatpush.bf16.msrb.mxu2 %v4672_v1  ;;  %v1460_v26 = vperm.slane %v6712_v0, 1  ;;  %v4675_v0 = vld [vmem:[%s6870_s3 + $0xd0] sm:$0xff] }
 0x155   :  { %v2212_v46 = vadd.f32 %v2211_v17, %v2193_v27  ;;  %2866 = vmatpush.bf16.msrb.mxu3 %v4680_v5  ;;  %v4679_v17 = vld [vmem:[%s6870_s3 + $0xf0] sm:$0xff] }
 0x157   :  { %v2231_v62 = vadd.f32 %v2230_v28, %v2212_v46  ;;  %2841 = vmatmul.bf16.gmra.mxu1 %v4182_v18  ;;  %v4678_v28 = vld [vmem:[%s6870_s3 + $0xe8] sm:$0xff]  ;;  %v4676_v18 = vld [vmem:[%s6870_s3 + $0xd8] sm:$0xff] }
 0x158   :  { %2822 = vmatmul.bf16.gmra.mxu0 %v4178_v15  ;;  %2848 = vmatpush.bf16.msrb.mxu2 %v4671_v6  ;;  %v4668_v15 = vld [vmem:[%s6870_s3 + $0x98] sm:$0xff] }
 0x159   :  { %2867 = vmatpush.bf16.msrb.mxu3 %v4679_v17 }
 0x15a   :  { %v2249_v61 = vpop.f32.mrf.mxu3  ;;  %v2195_v47 = vpop.f32.mrf.mxu0 }
 0x15b   :  { %v2214_v4 = vpop.f32.mrf.mxu1  ;;  %v2196_v2 = vadd.f32 %v2195_v47, %v2177_v13  ;;  %v2250_v55 = vadd.f32 %v2249_v61, %v2231_v62  ;;  %v4669_v61 = vld [vmem:[%s6870_s3 + $0xa0] sm:$0xff] }
 0x15c   :  { %v2233_v12 = vpop.f32.mrf.mxu2  ;;  %2849 = vmatpush.bf16.msrb.mxu2 %v4670_v23  ;;  %v4677_v62 = vld [vmem:[%s6870_s3 + $0xe0] sm:$0xff] }
 0x15d   :  { %v2215_v19 = vadd.f32 %v2214_v4, %v2196_v2  ;;  %2868 = vmatpush.bf16.msrb.mxu3 %v4678_v28 }
 0x15f   :  { %v2234_v50 = vadd.f32 %v2233_v12, %v2215_v19  ;;  %v4667_v19 = vld [vmem:[%s6870_s3 + $0x90] sm:$0xff] }
 0x160   :  { %2850 = vmatpush.bf16.msrb.mxu2 %v4669_v61 }
 0x161   :  { %2869 = vmatpush.bf16.msrb.mxu3 %v4677_v62 }
 0x162   :  { %v2252_v44 = vpop.f32.mrf.mxu3  ;;  %v2197_v51 = vpop.f32.mrf.mxu0 }
 0x163   :  { %v2216_v63 = vpop.f32.mrf.mxu1  ;;  %v2198_v16 = vadd.f32 %v2197_v51, %v2179_v24  ;;  %v2253_v29 = vadd.f32 %v2252_v44, %v2234_v50 }
 0x164   :  { %v2235_v59 = vpop.f32.mrf.mxu2  ;;  %2851 = vmatpush.bf16.msrb.mxu2 %v4668_v15 }
 0x165   :  { %v2217_v39 = vadd.f32 %v2216_v63, %v2198_v16  ;;  %2870 = vmatpush.bf16.msrb.mxu3 %v4676_v18  ;;  %v4666_v16 = vld [vmem:[%s6870_s3 + $0x88] sm:$0xff] }
 0x167   :  { %v2236_v7 = vadd.f32 %v2235_v59, %v2217_v39 }
 0x168   :  { %2852 = vmatpush.bf16.msrb.mxu2 %v4667_v19 }
 0x169   :  { %2871 = vmatpush.bf16.msrb.mxu3 %v4675_v0 }
 0x16a   :  { %v2254_v58 = vpop.f32.mrf.mxu3  ;;  %v2266_v10 = vpop.f32.mrf.mxu0 }
 0x16b   :  { %v2285_v56 = vpop.f32.mrf.mxu1  ;;  %v2267_v8 = vadd.f32 %v2266_v10, %v2248_v60  ;;  %v2255_v30 = vadd.f32 %v2254_v58, %v2236_v7  ;;  %v4665_v7 = vld [vmem:[%s6870_s3 + $0x80] sm:$0xff] }
 0x16c   :  { %v2304_v31 = vpop.f32.mrf.mxu2  ;;  %2853 = vmatpush.bf16.msrb.mxu2 %v4666_v16  ;;  %v4673_v10 = vld [vmem:[%s6870_s3 + $0xc0] sm:$0xff] }
 0x16d   :  { %v2286_v20 = vadd.f32 %v2285_v56, %v2267_v8 }
 0x16f   :  { %v6761_v33 = vadd.f32 %v2304_v31, %v2286_v20 }
 0x170   :  { %2854 = vmatpush.bf16.msrb.mxu2 %v4665_v7 }
 0x172   :  { %v2323_v3 = vpop.f32.mrf.mxu3  ;;  %v2268_v35 = vpop.f32.mrf.mxu0 }
 0x173   :  { %v2287_v36 = vpop.f32.mrf.mxu1  ;;  %v2269_v9 = vadd.f32 %v2268_v35, %v2250_v55  ;;  %v2324_v55 = vadd.f32 %v2323_v3, %v1460_v26 }
 0x174   :  { %v2306_v53 = vpop.f32.mrf.mxu2 }
 0x175   :  { %v2288_v13 = vadd.f32 %v2287_v36, %v2269_v9 }
 0x177   :  { %v6763_v54 = vadd.f32 %v2306_v53, %v2288_v13 }
 0x17a   :  { %v2325_v14 = vpop.f32.mrf.mxu3  ;;  %v2271_v21 = vpop.f32.mrf.mxu0 }
 0x17b   :  { %v2290_v45 = vpop.f32.mrf.mxu1  ;;  %v2272_v49 = vadd.f32 %v2271_v21, %v2253_v29  ;;  %v4674_v29 = vld [vmem:[%s6870_s3 + $0xc8] sm:$0xff]  ;;  %v2326_v59 = vadd.f32 %v2325_v14, %v1460_v26 }
 0x17c   :  { %v2309_v57 = vpop.f32.mrf.mxu2  ;;  %2872 = vmatpush.bf16.msrb.mxu3 %v4674_v29 }
 0x17d   :  { %v2291_v38 = vadd.f32 %v2290_v45, %v2272_v49 }
 0x17f   :  { %v6767_v42 = vadd.f32 %v2309_v57, %v2291_v38 }
 0x180   :  { %2873 = vmatpush.bf16.msrb.mxu3 %v4673_v10 }
 0x182   :  { %v6765_v40 = vpop.f32.mrf.mxu3  ;;  %v2273_v22 = vpop.f32.mrf.mxu0 }
 0x183   :  { %v2292_v41 = vpop.f32.mrf.mxu1  ;;  %v2274_v43 = vadd.f32 %v2273_v22, %v2255_v30  ;;  %v2329_v9 = vadd.f32 %v6765_v40, %v1460_v26 }
 0x184   :  { %v2311_v48 = vpop.f32.mrf.mxu2 }
 0x185   :  { %v2293_v34 = vadd.f32 %v2292_v41, %v2274_v43 }
 0x187   :  { %v6771_v24 = vadd.f32 %v2311_v48, %v2293_v34  ;;  %v2485_v48 = vmax.f32 %v6761_v33, 0.0 }
 0x18a   :  { %v6769_v52 = vpop.f32.mrf.mxu3  ;;  %v2342_v32 = vpop.f32.mrf.mxu0 }
 0x18b   :  { %v2361_v37 = vpop.f32.mrf.mxu1  ;;  %v2343_v12 = vadd.f32 %v2342_v32, %v2324_v55  ;;  %v2331_v32 = vadd.f32 %v6769_v52, %v1460_v26 }
 0x18c   :  { %v2380_v27 = vpop.f32.mrf.mxu2 }
 0x18d   :  { %v2362_v39 = vadd.f32 %v2361_v37, %v2343_v12  ;;  %v4688_v12 = vld [vmem:[%s6872_s5 + $0x38] sm:$0xff] }
 0x18e   :  { %2955 = vmatpush.bf16.msra.mxu0 %v4688_v12  ;;  %4689 = vmatpush.bf16.msra.mxu1 %v4688_v12 }
 0x18f   :  { %v2381_v58 = vadd.f32 %v2380_v27, %v2362_v39 }
 0x192   :  { %v2399_v60 = vpop.f32.mrf.mxu3  ;;  %v2344_v46 = vpop.f32.mrf.mxu0 }
 0x193   :  { %v2363_v25 = vpop.f32.mrf.mxu1  ;;  %v2345_v56 = vadd.f32 %v2344_v46, %v2326_v59  ;;  %v2400_v20 = vadd.f32 %v2399_v60, %v2381_v58 }
 0x194   :  { %v2382_v47 = vpop.f32.mrf.mxu2 }
 0x195   :  { %v2364_v35 = vadd.f32 %v2363_v25, %v2345_v56 }
 0x197   :  { %v2383_v13 = vadd.f32 %v2382_v47, %v2364_v35  ;;  %v2487_v47 = vmax.f32 %v6763_v54, 0.0  ;;  %v4685_v35 = vld [vmem:[%s6872_s5 + $0x20] sm:$0xff] }
 0x19a   :  { %v2401_v4 = vpop.f32.mrf.mxu3  ;;  %v2347_v11 = vpop.f32.mrf.mxu0 }
 0x19b   :  { %v2366_v2 = vpop.f32.mrf.mxu1  ;;  %v2348_v53 = vadd.f32 %v2347_v11, %v2329_v9  ;;  %v2402_v49 = vadd.f32 %v2401_v4, %v2383_v13 }
 0x19c   :  { %v2385_v44 = vpop.f32.mrf.mxu2 }
 0x19d   :  { %v2367_v41 = vadd.f32 %v2366_v2, %v2348_v53 }
 0x19f   :  { %v2386_v37 = vadd.f32 %v2385_v44, %v2367_v41  ;;  %v2489_v44 = vmax.f32 %v6767_v42, 0.0 }
 0x1a2   :  { %v2404_v50 = vpop.f32.mrf.mxu3  ;;  %v2349_v51 = vpop.f32.mrf.mxu0 }
 0x1a3   :  { %v2368_v63 = vpop.f32.mrf.mxu1  ;;  %v2350_v5 = vadd.f32 %v2349_v51, %v2331_v32  ;;  %v2405_v60 = vadd.f32 %v2404_v50, %v2386_v37  ;;  %v4687_v51 = vld [vmem:[%s6872_s5 + $0x30] sm:$0xff] }
 0x1a4   :  { %v2387_v8 = vpop.f32.mrf.mxu2  ;;  %2956 = vmatpush.bf16.msra.mxu0 %v4687_v51  ;;  %4690 = vmatpush.bf16.msra.mxu1 %v4687_v51 }
 0x1a5   :  { %v2369_v23 = vadd.f32 %v2368_v63, %v2350_v5 }
 0x1a7   :  { %v2388_v33 = vadd.f32 %v2387_v8, %v2369_v23 }
 0x1aa   :  { %v2406_v30 = vpop.f32.mrf.mxu3  ;;  %v2418_v31 = vpop.f32.mrf.mxu0 }
 0x1ab   :  { %v2437_v3 = vpop.f32.mrf.mxu1  ;;  %v2419_v36 = vadd.f32 %v2418_v31, %v2400_v20  ;;  %v2407_v15 = vadd.f32 %v2406_v30, %v2388_v33  ;;  %v4686_v30 = vld [vmem:[%s6872_s5 + $0x28] sm:$0xff]  ;;  %v2491_v31 = vmax.f32 %v6771_v24, 0.0  ;;  %v4684_v24 = vld [vmem:[%s6872_s5 + $0x18] sm:$0xff] }
 0x1ac   :  { %v2456_v21 = vpop.f32.mrf.mxu2  ;;  %2957 = vmatpush.bf16.msra.mxu0 %v4686_v30  ;;  %4691 = vmatpush.bf16.msra.mxu1 %v4686_v30 }
 0x1ad   :  { %v2438_v14 = vadd.f32 %v2437_v3, %v2419_v36 }
 0x1af   :  { %v2457_v38 = vadd.f32 %v2456_v21, %v2438_v14 }
 0x1b0   :  { %2958 = vmatpush.bf16.msra.mxu0 %v4685_v35  ;;  %4692 = vmatpush.bf16.msra.mxu1 %v4685_v35 }
 0x1b2   :  { %v2475_v45 = vpop.f32.mrf.mxu3  ;;  %v2420_v57 = vpop.f32.mrf.mxu0 }
 0x1b3   :  { %v2439_v22 = vpop.f32.mrf.mxu1  ;;  %v2476_v43 = vadd.f32 %v2475_v45, %v2457_v38  ;;  %v2421_v34 = vadd.f32 %v2420_v57, %v2402_v49  ;;  %v4683_v49 = vld [vmem:[%s6872_s5 + $0x10] sm:$0xff]  ;;  %v4682_v38 = vld [vmem:[%s6872_s5 + $0x8] sm:$0xff]  ;;  %v4681_v57 = vld [vmem:[%s6872_s5] sm:$0xff] }
 0x1b4   :  { %v2458_v17 = vpop.f32.mrf.mxu2  ;;  %2959 = vmatpush.bf16.msra.mxu0 %v4684_v24  ;;  %4693 = vmatpush.bf16.msra.mxu1 %v4684_v24 }
 0x1b5   :  { %v2486_v1 = vmax.f32 %v2476_v43, 0.0  ;;  %v2440_v6 = vadd.f32 %v2439_v22, %v2421_v34  ;;  %v4697_v43 = vld [vmem:[%s6871_s4] ss:$0 sm:$0xff] }
 0x1b7   :  { %v2493_v40 = vpack.c.bf16 %v2486_v1, %v2485_v48  ;;  %v2459_v46 = vadd.f32 %v2458_v17, %v2440_v6 }
 0x1b8   :  { %2960 = vmatpush.bf16.msra.mxu0 %v4683_v49  ;;  %4694 = vmatpush.bf16.msra.mxu1 %v4683_v49 }
 0x1b9   :  { %2497 = vst [vmem:[#allocation2 + $0x8] sm:$0xff] %v2493_v40 }
 0x1ba   :  { %v2477_v27 = vpop.f32.mrf.mxu3  ;;  %v2423_v25 = vpop.f32.mrf.mxu0 }
 0x1bb   :  { %v2478_v28 = vadd.f32 %v2477_v27, %v2459_v46  ;;  %v2424_v61 = vadd.f32 %v2423_v25, %v2405_v60  ;;  %v2442_v62 = vpop.f32.mrf.mxu1 }
 0x1bc   :  { %v2461_v11 = vpop.f32.mrf.mxu2  ;;  %2961 = vmatpush.bf16.msra.mxu0 %v4682_v38  ;;  %4695 = vmatpush.bf16.msra.mxu1 %v4682_v38 }
 0x1bd   :  { %v2488_v4 = vmax.f32 %v2478_v28, 0.0  ;;  %v2443_v26 = vadd.f32 %v2442_v62, %v2424_v61 }
 0x1bf   :  { %v2494_v52 = vpack.c.bf16 %v2488_v4, %v2487_v47  ;;  %v2462_v18 = vadd.f32 %v2461_v11, %v2443_v26 }
 0x1c0   :  { %v4169_v29 = vld [vmem:[#allocation2 + $0x8] sm:$0xf]  ;;  %v4642_v58 = vld [vmem:[#allocation2 + $0xc] sm:$0xf]  ;;  %2962 = vmatpush.bf16.msra.mxu0 %v4681_v57  ;;  %4696 = vmatpush.bf16.msra.mxu1 %v4681_v57 }
 0x1c1   :  { %2498 = vst [vmem:[#allocation2 + $0x18] sm:$0xff] %v2494_v52 }
 0x1c2   :  { %v2480_v2 = vpop.f32.mrf.mxu3  ;;  %v2425_v55 = vpop.f32.mrf.mxu0 }
 0x1c3   :  { %v2481_v19 = vadd.f32 %v2480_v2, %v2462_v18  ;;  %v2426_v0 = vadd.f32 %v2425_v55, %v2407_v15  ;;  %v2444_v54 = vpop.f32.mrf.mxu1 }
 0x1c4   :  { %v2463_v39 = vpop.f32.mrf.mxu2 }
 0x1c5   :  { %v2490_v50 = vmax.f32 %v2481_v19, 0.0  ;;  %v2445_v16 = vadd.f32 %v2444_v54, %v2426_v0 }
 0x1c7   :  { %v2495_v63 = vpack.c.bf16 %v2490_v50, %v2489_v44  ;;  %v2464_v10 = vadd.f32 %v2463_v39, %v2445_v16 }
 0x1c8   :  { %v4644_v59 = vld [vmem:[#allocation2 + $0x14] sm:$0xf0]  ;;  %v4171_v7 = vld [vmem:[#allocation2 + $0x18] sm:$0xf0] }
 0x1c9   :  { %2499 = vst [vmem:[#allocation2 + $0x28] sm:$0xff] %v2495_v63  ;;  %v4170_v56 = vor.u32 %v4644_v59, %v4169_v29  ;;  %v4174_v8 = vor.u32 %v4642_v58, %v4171_v7 }
 0x1ca   :  { %v2482_v42 = vpop.f32.mrf.mxu3  ;;  %v2818_v22 = vpop.f32.mrf.mxu0 }
 0x1cb   :  { %v2483_v20 = vadd.f32 %v2482_v42, %v2464_v10  ;;  %2855 = vmatmul.bf16.vlgmr.msrb.gmra.mxu2 %v4170_v56  ;;  %2874 = vmatmul.bf16.vlgmr.msrb.gmra.mxu3 %v4174_v8  ;;  %v2837_v41 = vpop.f32.mrf.mxu1  ;;  %v2819_v48 = vadd.f32 %v4697_v43, %v2818_v22 }
 0x1cd   :  { %v2492_v3 = vmax.f32 %v2483_v20, 0.0  ;;  %v2838_v5 = vadd.f32 %v2837_v41, %v2819_v48 }
 0x1cf   :  { %v2496_v36 = vpack.c.bf16 %v2492_v3, %v2491_v31 }
 0x1d0   :  { %v4185_v9 = vld [vmem:[#allocation2 + $0x28] sm:$0xf]  ;;  %v4646_v53 = vld [vmem:[#allocation2 + $0x2c] sm:$0xf] }
 0x1d1   :  { %2500 = vst [vmem:[#allocation2 + $0x38] sm:$0xff] %v2496_v36 }
 0x1d2   :  { %v2820_v34 = vpop.f32.mrf.mxu0 }
 0x1d3   :  { %v2839_v1 = vpop.f32.mrf.mxu1  ;;  %v2821_v40 = vadd.f32 %v4697_v43, %v2820_v34 }
 0x1d5   :  { %v2840_v27 = vadd.f32 %v2839_v1, %v2821_v40 }
 0x1d8   :  { %v4648_v13 = vld [vmem:[#allocation2 + $0x34] sm:$0xf0]  ;;  %v4187_v14 = vld [vmem:[#allocation2 + $0x38] sm:$0xf0] }
 0x1d9   :  { %v4186_v21 = vor.u32 %v4648_v13, %v4185_v9  ;;  %v4190_v45 = vor.u32 %v4646_v53, %v4187_v14 }
 0x1da   :  { %v2823_v6 = vpop.f32.mrf.mxu0 }
 0x1db   :  { %2860 = vmatmul.bf16.gmra.mxu2 %v4186_v21  ;;  %2879 = vmatmul.bf16.gmra.mxu3 %v4190_v45  ;;  %v2842_v61 = vpop.f32.mrf.mxu1  ;;  %v2824_v33 = vadd.f32 %v4697_v43, %v2823_v6 }
 0x1dd   :  { %v2843_v2 = vadd.f32 %v2842_v61, %v2824_v33 }
 0x1e2   :  { %v2825_v4 = vpop.f32.mrf.mxu0 }
 0x1e3   :  { %v2826_v15 = vadd.f32 %v4697_v43, %v2825_v4  ;;  %v2844_v55 = vpop.f32.mrf.mxu1 }
 0x1e5   :  { %v2845_v19 = vadd.f32 %v2844_v55, %v2826_v15 }
 0x24e   :  { %v2856_v32 = vpop.f32.mrf.mxu2  ;;  %v2875_v37 = vpop.f32.mrf.mxu3 }
 0x24f   :  { %v2857_v17 = vadd.f32 %v2856_v32, %v2838_v5 }
 0x251   :  { %v2876_v25 = vadd.f32 %v2875_v37, %v2857_v17 }
 0x253   :  { %v2885_v62 = vmax.f32 %v2876_v25, 0.0 }
 0x256   :  { %v2858_v60 = vpop.f32.mrf.mxu2  ;;  %v2877_v46 = vpop.f32.mrf.mxu3 }
 0x257   :  { %v2859_v23 = vadd.f32 %v2858_v60, %v2840_v27 }
 0x259   :  { %v2878_v28 = vadd.f32 %v2877_v46, %v2859_v23 }
 0x25b   :  { %v2886_v47 = vmax.f32 %v2878_v28, 0.0 }
 0x25d   :  { %v2889_v52 = vpack.c.bf16 %v2886_v47, %v2885_v62 }
 0x25e   :  { %v2861_v26 = vpop.f32.mrf.mxu2  ;;  %v2880_v11 = vpop.f32.mrf.mxu3 }
 0x25f   :  { %2963 = vmatmul.bf16.vlgmr.msra.gmra.mxu0 %v2889_v52  ;;  %v2862_v18 = vadd.f32 %v2861_v26, %v2843_v2 }
 0x261   :  { %v2881_v12 = vadd.f32 %v2880_v11, %v2862_v18 }
 0x263   :  { %v2887_v51 = vmax.f32 %v2881_v12, 0.0 }
 0x266   :  { %v2863_v0 = vpop.f32.mrf.mxu2  ;;  %v2882_v50 = vpop.f32.mrf.mxu3 }
 0x267   :  { %v2864_v44 = vadd.f32 %v2863_v0, %v2845_v19 }
 0x269   :  { %v2883_v54 = vadd.f32 %v2882_v50, %v2864_v44 }
 0x26b   :  { %v2888_v63 = vmax.f32 %v2883_v54, 0.0 }
 0x26d   :  { %v2890_v16 = vpack.c.bf16 %v2888_v63, %v2887_v51 }
 0x26f   :  { %2968 = vmatmul.bf16.vlgmr.msra.gmra.mxu1 %v2890_v16 }
 0x2dc   :  { %v2964_v29 = vpop.f32.mrf.mxu0 }
 0x2dd   :  { %v2974_v39 = vmax.f32 %v2964_v29, 0.0 }
 0x2df   :  { %v2978_v59 = vpack.c.bf16 %v2974_v39, %v2974_v39 }
 0x2e1   :  { %2983 = vst.msk [vmem:[%s6873_s6] sm:$0xf] %vm2982_vm1, %v2978_v59 }
 0x2e4   :  { %v2966_v58 = vpop.f32.mrf.mxu0 }
 0x2e5   :  { %v2975_v7 = vmax.f32 %v2966_v58, 0.0 }
 0x2e7   :  { %v2979_v10 = vpack.c.bf16 %v2975_v7, %v2975_v7 }
 0x2e9   :  { %2984 = vst.msk [vmem:[%s6873_s6 + $0x4] sm:$0xf] %vm2982_vm1, %v2979_v10 }
 0x2ec   :  { %v2969_v56 = vpop.f32.mrf.mxu1 }
 0x2ed   :  { %v2976_v8 = vmax.f32 %v2969_v56, 0.0 }
 0x2ef   :  { %v2980_v42 = vpack.c.bf16 %v2976_v8, %v2976_v8 }
 0x2f1   :  { %2985 = vst.msk [vmem:[%s6873_s6 + $0x8] sm:$0xf] %vm2982_vm1, %v2980_v42 }
 0x2f4   :  { %v2971_v30 = vpop.f32.mrf.mxu1 }
 0x2f5   :  { %v2977_v20 = vmax.f32 %v2971_v30, 0.0 }
 0x2f7   :  { %v2981_v31 = vpack.c.bf16 %v2977_v20, %v2977_v20 }
 0x2f9   :  { %2986 = vst.msk [vmem:[%s6873_s6 + $0xc] sm:$0xf] %vm2982_vm1, %v2981_v31 }

</bundles_post_ra>
